<compile_context>
chip_gen: v5e
topology: v5e:2x2
jax: 0.10.0
libtpu: 0.0.40
codegen_flags: <defaults>
</compile_context>

<pallas_src>
import functools

import jax
import jax.numpy as jnp
from jax.experimental import pallas as pl
from jax.experimental.pallas import tpu as pltpu

CP = 128  # carried (lane-dense) channel count for all internal feature maps


def _round_up(x, m):
    return (x + m - 1) // m * m


# ---------------------------------------------------------------------------
# Pallas kernels
# ---------------------------------------------------------------------------

# --- single-K GEMM: one dot, fused epilogue, one store ---------------------

def _gemm1_kernel(a_ref, b_ref, s_ref, c_ref, o_ref, *, apply_relu):
    y = jnp.dot(a_ref[...], b_ref[...], preferred_element_type=jnp.float32)
    y = y * s_ref[...] + c_ref[...]
    if apply_relu:
        y = jnp.maximum(y, 0.0)
    o_ref[...] = y.astype(o_ref.dtype)


def _gemm1_res_kernel(a_ref, b_ref, s_ref, c_ref, r_ref, o_ref, *, apply_relu):
    y = jnp.dot(a_ref[...], b_ref[...], preferred_element_type=jnp.float32)
    y = y * s_ref[...] + c_ref[...] + r_ref[...].astype(jnp.float32)
    if apply_relu:
        y = jnp.maximum(y, 0.0)
    o_ref[...] = y.astype(o_ref.dtype)


# --- multi-K fallback: f32 VMEM scratch accumulator, single output store ---

def _gemm_acc_kernel(a_ref, b_ref, s_ref, c_ref, o_ref, acc_ref, *,
                     apply_relu):
    k = pl.program_id(2)

    @pl.when(k == 0)
    def _():
        acc_ref[...] = jnp.zeros_like(acc_ref)

    acc_ref[...] += jnp.dot(a_ref[...], b_ref[...],
                            preferred_element_type=jnp.float32)

    @pl.when(k == pl.num_programs(2) - 1)
    def _():
        y = acc_ref[...] * s_ref[...] + c_ref[...]
        if apply_relu:
            y = jnp.maximum(y, 0.0)
        o_ref[...] = y.astype(o_ref.dtype)


def _gemm_acc_res_kernel(a_ref, b_ref, s_ref, c_ref, r_ref, o_ref, acc_ref, *,
                         apply_relu):
    k = pl.program_id(2)

    @pl.when(k == 0)
    def _():
        acc_ref[...] = jnp.zeros_like(acc_ref)

    acc_ref[...] += jnp.dot(a_ref[...], b_ref[...],
                            preferred_element_type=jnp.float32)

    @pl.when(k == pl.num_programs(2) - 1)
    def _():
        y = acc_ref[...] * s_ref[...] + c_ref[...] + r_ref[...].astype(jnp.float32)
        if apply_relu:
            y = jnp.maximum(y, 0.0)
        o_ref[...] = y.astype(o_ref.dtype)


def fused_matmul(a, b, scale, bias, *, relu, residual=None,
                 out_dtype=jnp.bfloat16):
    """out = maybe_relu((a @ b) * scale + bias (+ residual)).

    a: (M, K) bf16 activations/patches.
    b: (Kp, Np) bf16 weights, pre-padded at init (Kp, Np multiples of 128).
    scale/bias: (Np,) f32 (folded BatchNorm).
    residual: optional (M, Np) bf16, fused into the epilogue.
    Returns (M, Np) out_dtype (lane-dense output; padded rows sliced off).
    """
    M, K = a.shape
    Kp, Np = b.shape
    assert K <= Kp and Kp % 128 == 0 and Np % 128 == 0

    # Tile selection: M rounded to 16 (bf16 sublane packing), tm<=512;
    # N tiles of <=256; K collapsed to a single step whenever it fits.
    Mp = _round_up(M, 16)
    if Mp <= 512:
        tm = Mp
    else:
        tm = 256
        Mp = _round_up(Mp, tm)

    if Np <= 256:
        tn = Np
    elif Np % 256 == 0:
        tn = 256
    else:
        tn = 128

    single_k = Kp <= 2048
    if single_k:
        tk = Kp
    elif Kp % 512 == 0:
        tk = 512
    elif Kp % 256 == 0:
        tk = 256
    else:
        tk = 128

    a = a.astype(jnp.bfloat16)
    if Mp != M or Kp != K:
        a = jnp.pad(a, ((0, Mp - M), (0, Kp - K)))

    s2 = scale.reshape(1, Np)
    c2 = bias.reshape(1, Np)
    args = [a, b, s2, c2]

    r = None
    if residual is not None:
        r = residual.astype(jnp.bfloat16)
        if r.shape[0] != Mp:
            r = jnp.pad(r, ((0, Mp - r.shape[0]), (0, 0)))

    if single_k:
        grid = (Mp // tm, Np // tn)
        dims = ("parallel", "parallel")
        in_specs = [
            pl.BlockSpec((tm, tk), lambda i, j: (i, 0)),
            pl.BlockSpec((tk, tn), lambda i, j: (0, j)),
            pl.BlockSpec((1, tn), lambda i, j: (0, j)),
            pl.BlockSpec((1, tn), lambda i, j: (0, j)),
        ]
        out_spec = pl.BlockSpec((tm, tn), lambda i, j: (i, j))
        scratch = []
        if r is not None:
            in_specs.append(pl.BlockSpec((tm, tn), lambda i, j: (i, j)))
            args.append(r)
            kernel = functools.partial(_gemm1_res_kernel, apply_relu=relu)
        else:
            kernel = functools.partial(_gemm1_kernel, apply_relu=relu)
    else:
        grid = (Mp // tm, Np // tn, Kp // tk)
        dims = ("parallel", "parallel", "arbitrary")
        in_specs = [
            pl.BlockSpec((tm, tk), lambda i, j, k: (i, k)),
            pl.BlockSpec((tk, tn), lambda i, j, k: (k, j)),
            pl.BlockSpec((1, tn), lambda i, j, k: (0, j)),
            pl.BlockSpec((1, tn), lambda i, j, k: (0, j)),
        ]
        out_spec = pl.BlockSpec((tm, tn), lambda i, j, k: (i, j))
        scratch = [pltpu.VMEM((tm, tn), jnp.float32)]
        if r is not None:
            in_specs.append(pl.BlockSpec((tm, tn), lambda i, j, k: (i, j)))
            args.append(r)
            kernel = functools.partial(_gemm_acc_res_kernel, apply_relu=relu)
        else:
            kernel = functools.partial(_gemm_acc_kernel, apply_relu=relu)

    out = pl.pallas_call(
        kernel,
        out_shape=jax.ShapeDtypeStruct((Mp, Np), out_dtype),
        grid_spec=pltpu.PrefetchScalarGridSpec(
            num_scalar_prefetch=0,
            grid=grid,
            in_specs=in_specs,
            out_specs=out_spec,
            scratch_shapes=scratch,
        ),
        compiler_params=pltpu.CompilerParams(
            dimension_semantics=dims,
            vmem_limit_bytes=32 * 1024 * 1024,
        ),
    )(*args)
    return out[:M] if Mp != M else out


# --- fused head: GAP(axial) + GAP(longitud) + concat + Linear(256,5) -------

def _head_kernel(ax_ref, lg_ref, wa_ref, wl_ref, b_ref, o_ref, *,
                 inv_hw_ax, inv_hw_lg):
    ax = (jnp.sum(ax_ref[...].astype(jnp.float32), axis=1)
          * inv_hw_ax).astype(jnp.bfloat16)                      # (N, CP)
    lg = (jnp.sum(lg_ref[...].astype(jnp.float32), axis=1)
          * inv_hw_lg).astype(jnp.bfloat16)                      # (N, CP)
    y = jnp.dot(ax, wa_ref[...], preferred_element_type=jnp.float32)
    y = y + jnp.dot(lg, wl_ref[...], preferred_element_type=jnp.float32)
    o_ref[...] = y + b_ref[...]


def fused_head(ax_feat, lg_feat, w_ax, w_lg, bias):
    # ax_feat: (N, HWa, CP) bf16; lg_feat: (N, HWl, CP) bf16.
    N = ax_feat.shape[0]
    kernel = functools.partial(_head_kernel,
                               inv_hw_ax=1.0 / ax_feat.shape[1],
                               inv_hw_lg=1.0 / lg_feat.shape[1])
    return pl.pallas_call(
        kernel,
        out_shape=jax.ShapeDtypeStruct((N, w_ax.shape[1]), jnp.float32),
        in_specs=[pl.BlockSpec(memory_space=pltpu.MemorySpace.VMEM)] * 5,
        out_specs=pl.BlockSpec(memory_space=pltpu.MemorySpace.VMEM),
    )(ax_feat, lg_feat, w_ax, w_lg, bias)


# ---------------------------------------------------------------------------
# JAX glue: im2col, conv+BN, pooling, ResNet blocks (all bf16 activations)
# ---------------------------------------------------------------------------

def im2col(x, kh, kw, stride, pad):
    # x: NHWC (bf16) -> (N*Ho*Wo, kh*kw*C) bf16.
    N, H, W, C = x.shape
    xp = jnp.pad(x, ((0, 0), (pad, pad), (pad, pad), (0, 0)))
    Ho = (H + 2 * pad - kh) // stride + 1
    Wo = (W + 2 * pad - kw) // stride + 1
    cols = []
    for i in range(kh):
        for j in range(kw):
            cols.append(xp[:, i:i + stride * Ho:stride,
                           j:j + stride * Wo:stride, :])
    patches = jnp.stack(cols, axis=3)                 # (N,Ho,Wo,kh*kw,C)
    return patches.reshape(N * Ho * Wo, kh * kw * C), (N, Ho, Wo)


def conv_bn(x, p, kh, kw, stride, pad, relu, residual=None):
    # p['w']: (Kp, Coutp) bf16 with BN folded into p['scale'] / p['bias'].
    N, H, W, Cin = x.shape
    if kh == 1 and kw == 1 and pad == 0:
        # 1x1 conv: no im2col, just a strided spatial subsample.
        xs = x[:, ::stride, ::stride, :]
        _, Ho, Wo, _ = xs.shape
        a = xs.reshape(N * Ho * Wo, Cin)
    else:
        a, (_, Ho, Wo) = im2col(x, kh, kw, stride, pad)
    r = None
    if residual is not None:
        r = residual.reshape(N * Ho * Wo, residual.shape[-1])
    out = fused_matmul(a, p['w'], p['scale'], p['bias'], relu=relu, residual=r)
    return out.reshape(N, Ho, Wo, p['w'].shape[1])


def maxpool_3x3_s2(x):
    # PyTorch MaxPool2d(kernel=3, stride=2, padding=1); lowest-value padding.
    # Streaming pairwise max over the 9 taps (no 9x stacked materialization).
    N, H, W, C = x.shape
    pad, k, s = 1, 3, 2
    neg = float(jnp.finfo(x.dtype).min)
    xp = jnp.pad(x, ((0, 0), (pad, pad), (pad, pad), (0, 0)),
                 constant_values=neg)
    Ho = (H + 2 * pad - k) // s + 1
    Wo = (W + 2 * pad - k) // s + 1
    out = None
    for i in range(k):
        for j in range(k):
            tap = xp[:, i:i + s * Ho:s, j:j + s * Wo:s, :]
            out = tap if out is None else jnp.maximum(out, tap)
    return out


def basic_block(x, p, stride):
    identity = x
    out = conv_bn(x, p['conv1'], 3, 3, stride, 1, relu=True)
    if 'down' in p:
        identity = conv_bn(x, p['down'], 1, 1, stride, 0, relu=False)
    # Residual add + ReLU fused into conv2's matmul epilogue.
    out = conv_bn(out, p['conv2'], 3, 3, 1, 1, relu=True, residual=identity)
    return out


def resnet_branch(x, p):
    # Truncated ResNet18: conv1/bn1/relu/maxpool/layer1/layer2; returns the
    # flattened spatial feature map (N, H*W, CP) for the fused GAP+fc head.
    x = conv_bn(x, p['conv1'], 7, 7, 2, 3, relu=True)
    x = maxpool_3x3_s2(x)
    x = basic_block(x, p['layer1_0'], 1)
    x = basic_block(x, p['layer1_1'], 1)
    x = basic_block(x, p['layer2_0'], 2)
    x = basic_block(x, p['layer2_1'], 1)
    N, H, W, C = x.shape
    return x.reshape(N, H * W, C)


def net_forward(x_nchw, params):
    # Cast once to bf16 BEFORE any transpose / im2col / pad copies.
    x_bf = x_nchw.astype(jnp.bfloat16)
    # axial branch: plain NCHW -> NHWC
    ax_in = jnp.transpose(x_bf, (0, 2, 3, 1))         # (N, H, W, n_slices)
    # longitud branch: torch.transpose(x, 1, 3) gives NCHW=(N, W, H, n_slices);
    # its NHWC form is (N, H, n_slices, W), i.e. channels == original width.
    lg_in = jnp.transpose(x_bf, (0, 2, 1, 3))         # (N, H, n_slices, W)

    ax_feat = resnet_branch(ax_in, params['axial'])        # (N, HWa, 128)
    lg_feat = resnet_branch(lg_in, params['longitud'])     # (N, HWl, 128)
    logits = fused_head(ax_feat, lg_feat, params['fc_w_ax'],
                        params['fc_w_lg'], params['fc_bias'])
    return logits[:, :5]                                    # (N, 5)


# ---------------------------------------------------------------------------
# Deterministic parameter initialization (synthetic weights, pre-padded to the
# lane-dense GEMM layout at init time so the forward pass does no weight prep).
# ---------------------------------------------------------------------------

def _fold_bn(gamma, beta, mean, var, eps=1e-5):
    s = gamma / jnp.sqrt(var + eps)
    return s, beta - mean * s


def _init_bn(key, c):
    k1, k2, k3, k4 = jax.random.split(key, 4)
    gamma = jax.random.uniform(k1, (c,), jnp.float32, 0.5, 1.5)
    beta = jax.random.normal(k2, (c,), jnp.float32) * 0.1
    mean = jax.random.normal(k3, (c,), jnp.float32) * 0.1
    var = jax.random.uniform(k4, (c,), jnp.float32, 0.5, 1.5)
    # TODO(synk): BatchNorm is folded in inference mode (running stats);
    # training-mode batch statistics are not implemented.
    return _fold_bn(gamma, beta, mean, var)


def _prep_conv(w_key, bn_key, kh, kw, cin_real, cout_real, cin_carried,
               cout_carried):
    """Build a conv+BN layer in pre-padded GEMM form.

    Weight rows for padded (always-zero) input channels and columns for padded
    output channels are zero; padded output channels get scale=bias=0 so they
    stay exactly zero through the network.
    """
    w = jax.random.normal(w_key, (kh, kw, cin_real, cout_real),
                          jnp.float32) * 0.05
    w_full = jnp.zeros((kh, kw, cin_carried, cout_carried), jnp.float32)
    w_full = w_full.at[:, :, :cin_real, :cout_real].set(w)
    K = kh * kw * cin_carried
    Kp = _round_up(K, 128)
    w2d = jnp.zeros((Kp, cout_carried), jnp.float32)
    w2d = w2d.at[:K, :].set(w_full.reshape(K, cout_carried))
    s_real, b_real = _init_bn(bn_key, cout_real)
    scale = jnp.zeros((cout_carried,), jnp.float32).at[:cout_real].set(s_real)
    bias = jnp.zeros((cout_carried,), jnp.float32).at[:cout_real].set(b_real)
    return {'w': w2d.astype(jnp.bfloat16), 'scale': scale, 'bias': bias}


def _init_branch(key, in_ch):
    keys = iter(jax.random.split(key, 64))
    p = {'conv1': _prep_conv(next(keys), next(keys), 7, 7, in_ch, 64,
                             in_ch, CP)}

    def block(cin_real, cout_real, downsample):
        b = {'conv1': _prep_conv(next(keys), next(keys), 3, 3,
                                 cin_real, cout_real, CP, CP),
             'conv2': _prep_conv(next(keys), next(keys), 3, 3,
                                 cout_real, cout_real, CP, CP)}
        if downsample:
            b['down'] = _prep_conv(next(keys), next(keys), 1, 1,
                                   cin_real, cout_real, CP, CP)
        return b

    p['layer1_0'] = block(64, 64, False)
    p['layer1_1'] = block(64, 64, False)
    p['layer2_0'] = block(64, 128, True)
    p['layer2_1'] = block(128, 128, False)
    return p


def init_params(key, n_slices, width):
    k1, k2, k3, k4 = jax.random.split(key, 4)
    # Original module fixes longitud.conv1 in_channels=200 (== input width);
    # here it is the synthetic input width.
    fc_w = jax.random.normal(k3, (256, 5), jnp.float32) * 0.05
    fc_b = jax.random.normal(k4, (5,), jnp.float32) * 0.05
    fc_w_p = jnp.zeros((256, 128), jnp.float32).at[:, :5].set(fc_w)
    fc_b_p = jnp.zeros((1, 128), jnp.float32).at[0, :5].set(fc_b)
    return {
        'axial': _init_branch(k1, n_slices),
        'longitud': _init_branch(k2, width),
        # fc split into the two concat halves so the head kernel needs no
        # in-kernel concat: y = ax @ W[:128] + lg @ W[128:] + b.
        'fc_w_ax': fc_w_p[:128].astype(jnp.bfloat16),
        'fc_w_lg': fc_w_p[128:].astype(jnp.bfloat16),
        'fc_bias': fc_b_p,
    }


if __name__ == "__main__":
    key = jax.random.PRNGKey(0)
    kx, kp = jax.random.split(key)

    N, n_slices, H, W = 2, 4, 16, 16
    x = jax.random.normal(kx, (N, n_slices, H, W), jnp.float32)
    params = init_params(kp, n_slices=n_slices, width=W)

    out = jax.jit(net_forward)(x, params)
    out = jax.block_until_ready(out)
    assert out.shape == (N, 5), out.shape
    assert bool(jnp.all(jnp.isfinite(out)))
    print("KERNEL_OK")
</pallas_src>

<mosaic_0001>
module attributes {stable_mosaic.version = 11 : i64} {
  func.func @_gemm1_kernel(%arg0: i32, %arg1: i32, %arg2: memref<128x256xbf16, #tpu.memory_space<vmem>>, %arg3: memref<256x128xbf16, #tpu.memory_space<vmem>>, %arg4: memref<1x128xf32, #tpu.memory_space<vmem>>, %arg5: memref<1x128xf32, #tpu.memory_space<vmem>>, %arg6: memref<128x128xbf16, #tpu.memory_space<vmem>>) attributes {dimension_semantics = [#tpu.dimension_semantics<parallel>, #tpu.dimension_semantics<parallel>], iteration_bounds = array<i64: 1, 1>, scalar_prefetch = 0 : i64, scratch_operands = 0 : i64, tpu.core_type = #tpu.core_type<tc>, window_params = [{transform_indices = @transform_0, window_bounds = array<i64: 128, 256>}, {transform_indices = @transform_1, window_bounds = array<i64: 256, 128>}, {transform_indices = @transform_2, window_bounds = array<i64: 1, 128>}, {transform_indices = @transform_3, window_bounds = array<i64: 1, 128>}, {transform_indices = @transform_4, window_bounds = array<i64: 128, 128>}]} {
    %c0 = arith.constant 0 : index
    %c0_0 = arith.constant 0 : index
    %0 = vector.load %arg2[%c0, %c0_0] : memref<128x256xbf16, #tpu.memory_space<vmem>>, vector<128x256xbf16>
    %c0_1 = arith.constant 0 : index
    %c0_2 = arith.constant 0 : index
    %1 = vector.load %arg3[%c0_1, %c0_2] : memref<256x128xbf16, #tpu.memory_space<vmem>>, vector<256x128xbf16>
    %cst = arith.constant dense<0.000000e+00> : vector<128x128xf32>
    %2 = tpu.matmul %0, %1, %cst {dimension_numbers = #tpu.dot_dimension_numbers<[1], [0], [0], [1], [0, 0, 1, 1], [], []>} : vector<128x256xbf16>, vector<256x128xbf16>, vector<128x128xf32> -> vector<128x128xf32>
    %c0_3 = arith.constant 0 : index
    %c0_4 = arith.constant 0 : index
    %3 = vector.load %arg4[%c0_3, %c0_4] : memref<1x128xf32, #tpu.memory_space<vmem>>, vector<1x128xf32>
    %4 = vector.broadcast %3 : vector<1x128xf32> to vector<128x128xf32>
    %5 = arith.mulf %2, %4 : vector<128x128xf32>
    %c0_5 = arith.constant 0 : index
    %c0_6 = arith.constant 0 : index
    %6 = vector.load %arg5[%c0_5, %c0_6] : memref<1x128xf32, #tpu.memory_space<vmem>>, vector<1x128xf32>
    %7 = vector.broadcast %6 : vector<1x128xf32> to vector<128x128xf32>
    %8 = arith.addf %5, %7 : vector<128x128xf32>
    %cst_7 = arith.constant 0.000000e+00 : f32
    %9 = vector.broadcast %cst_7 : f32 to vector<128x128xf32>
    %10 = arith.maximumf %8, %9 : vector<128x128xf32>
    %11 = arith.truncf %10 : vector<128x128xf32> to vector<128x128xbf16>
    %c0_8 = arith.constant 0 : index
    %c0_9 = arith.constant 0 : index
    %12 = vector.load %arg6[%c0_8, %c0_9] : memref<128x128xbf16, #tpu.memory_space<vmem>>, vector<128x128xbf16>
    tpu.vector_store %arg6[%c0_8, %c0_9], %11 {strides = array<i32>} : memref<128x128xbf16, #tpu.memory_space<vmem>>, vector<128x128xbf16>,
    return
  }
  func.func @transform_0(%arg0: i32, %arg1: i32) -> (i32, i32) {
    %c0_i32 = arith.constant 0 : i32
    %c0_i32_0 = arith.constant 0 : i32
    return %arg0, %c0_i32 : i32, i32
  }
  func.func @transform_1(%arg0: i32, %arg1: i32) -> (i32, i32) {
    %c0_i32 = arith.constant 0 : i32
    %c0_i32_0 = arith.constant 0 : i32
    return %c0_i32, %arg1 : i32, i32
  }
  func.func @transform_2(%arg0: i32, %arg1: i32) -> (i32, i32) {
    %c0_i32 = arith.constant 0 : i32
    %c0_i32_0 = arith.constant 0 : i32
    return %c0_i32, %arg1 : i32, i32
  }
  func.func @transform_3(%arg0: i32, %arg1: i32) -> (i32, i32) {
    %c0_i32 = arith.constant 0 : i32
    %c0_i32_0 = arith.constant 0 : i32
    return %c0_i32, %arg1 : i32, i32
  }
  func.func @transform_4(%arg0: i32, %arg1: i32) -> (i32, i32) {
    %c0_i32 = arith.constant 0 : i32
    return %arg0, %arg1 : i32, i32
  }
}

module attributes {stable_mosaic.version = 11 : i64} {
  func.func @_gemm1_kernel(%arg0: i32, %arg1: i32, %arg2: memref<32x1152xbf16, #tpu.memory_space<vmem>>, %arg3: memref<1152x128xbf16, #tpu.memory_space<vmem>>, %arg4: memref<1x128xf32, #tpu.memory_space<vmem>>, %arg5: memref<1x128xf32, #tpu.memory_space<vmem>>, %arg6: memref<32x128xbf16, #tpu.memory_space<vmem>>) attributes {dimension_semantics = [#tpu.dimension_semantics<parallel>, #tpu.dimension_semantics<parallel>], iteration_bounds = array<i64: 1, 1>, scalar_prefetch = 0 : i64, scratch_operands = 0 : i64, tpu.core_type = #tpu.core_type<tc>, window_params = [{transform_indices = @transform_0, window_bounds = array<i64: 32, 1152>}, {transform_indices = @transform_1, window_bounds = array<i64: 1152, 128>}, {transform_indices = @transform_2, window_bounds = array<i64: 1, 128>}, {transform_indices = @transform_3, window_bounds = array<i64: 1, 128>}, {transform_indices = @transform_4, window_bounds = array<i64: 32, 128>}]} {
    %c0 = arith.constant 0 : index
    %c0_0 = arith.constant 0 : index
    %0 = vector.load %arg2[%c0, %c0_0] : memref<32x1152xbf16, #tpu.memory_space<vmem>>, vector<32x1152xbf16>
    %c0_1 = arith.constant 0 : index
    %c0_2 = arith.constant 0 : index
    %1 = vector.load %arg3[%c0_1, %c0_2] : memref<1152x128xbf16, #tpu.memory_space<vmem>>, vector<1152x128xbf16>
    %cst = arith.constant dense<0.000000e+00> : vector<32x128xf32>
    %2 = tpu.matmul %0, %1, %cst {dimension_numbers = #tpu.dot_dimension_numbers<[1], [0], [0], [1], [0, 0, 1, 1], [], []>} : vector<32x1152xbf16>, vector<1152x128xbf16>, vector<32x128xf32> -> vector<32x128xf32>
    %c0_3 = arith.constant 0 : index
    %c0_4 = arith.constant 0 : index
    %3 = vector.load %arg4[%c0_3, %c0_4] : memref<1x128xf32, #tpu.memory_space<vmem>>, vector<1x128xf32>
    %4 = vector.broadcast %3 : vector<1x128xf32> to vector<32x128xf32>
    %5 = arith.mulf %2, %4 : vector<32x128xf32>
    %c0_5 = arith.constant 0 : index
    %c0_6 = arith.constant 0 : index
    %6 = vector.load %arg5[%c0_5, %c0_6] : memref<1x128xf32, #tpu.memory_space<vmem>>, vector<1x128xf32>
    %7 = vector.broadcast %6 : vector<1x128xf32> to vector<32x128xf32>
    %8 = arith.addf %5, %7 : vector<32x128xf32>
    %cst_7 = arith.constant 0.000000e+00 : f32
    %9 = vector.broadcast %cst_7 : f32 to vector<32x128xf32>
    %10 = arith.maximumf %8, %9 : vector<32x128xf32>
    %11 = arith.truncf %10 : vector<32x128xf32> to vector<32x128xbf16>
    %c0_8 = arith.constant 0 : index
    %c0_9 = arith.constant 0 : index
    %12 = vector.load %arg6[%c0_8, %c0_9] : memref<32x128xbf16, #tpu.memory_space<vmem>>, vector<32x128xbf16>
    tpu.vector_store %arg6[%c0_8, %c0_9], %11 {strides = array<i32>} : memref<32x128xbf16, #tpu.memory_space<vmem>>, vector<32x128xbf16>,
    return
  }
  func.func @transform_0(%arg0: i32, %arg1: i32) -> (i32, i32) {
    %c0_i32 = arith.constant 0 : i32
    %c0_i32_0 = arith.constant 0 : i32
    return %arg0, %c0_i32 : i32, i32
  }
  func.func @transform_1(%arg0: i32, %arg1: i32) -> (i32, i32) {
    %c0_i32 = arith.constant 0 : i32
    %c0_i32_0 = arith.constant 0 : i32
    return %c0_i32, %arg1 : i32, i32
  }
  func.func @transform_2(%arg0: i32, %arg1: i32) -> (i32, i32) {
    %c0_i32 = arith.constant 0 : i32
    %c0_i32_0 = arith.constant 0 : i32
    return %c0_i32, %arg1 : i32, i32
  }
  func.func @transform_3(%arg0: i32, %arg1: i32) -> (i32, i32) {
    %c0_i32 = arith.constant 0 : i32
    %c0_i32_0 = arith.constant 0 : i32
    return %c0_i32, %arg1 : i32, i32
  }
  func.func @transform_4(%arg0: i32, %arg1: i32) -> (i32, i32) {
    %c0_i32 = arith.constant 0 : i32
    return %arg0, %arg1 : i32, i32
  }
}

module attributes {stable_mosaic.version = 11 : i64} {
  func.func @_gemm1_res_kernel(%arg0: i32, %arg1: i32, %arg2: memref<32x1152xbf16, #tpu.memory_space<vmem>>, %arg3: memref<1152x128xbf16, #tpu.memory_space<vmem>>, %arg4: memref<1x128xf32, #tpu.memory_space<vmem>>, %arg5: memref<1x128xf32, #tpu.memory_space<vmem>>, %arg6: memref<32x128xbf16, #tpu.memory_space<vmem>>, %arg7: memref<32x128xbf16, #tpu.memory_space<vmem>>) attributes {dimension_semantics = [#tpu.dimension_semantics<parallel>, #tpu.dimension_semantics<parallel>], iteration_bounds = array<i64: 1, 1>, scalar_prefetch = 0 : i64, scratch_operands = 0 : i64, tpu.core_type = #tpu.core_type<tc>, window_params = [{transform_indices = @transform_0, window_bounds = array<i64: 32, 1152>}, {transform_indices = @transform_1, window_bounds = array<i64: 1152, 128>}, {transform_indices = @transform_2, window_bounds = array<i64: 1, 128>}, {transform_indices = @transform_3, window_bounds = array<i64: 1, 128>}, {transform_indices = @transform_4, window_bounds = array<i64: 32, 128>}, {transform_indices = @transform_5, window_bounds = array<i64: 32, 128>}]} {
    %c0 = arith.constant 0 : index
    %c0_0 = arith.constant 0 : index
    %0 = vector.load %arg2[%c0, %c0_0] : memref<32x1152xbf16, #tpu.memory_space<vmem>>, vector<32x1152xbf16>
    %c0_1 = arith.constant 0 : index
    %c0_2 = arith.constant 0 : index
    %1 = vector.load %arg3[%c0_1, %c0_2] : memref<1152x128xbf16, #tpu.memory_space<vmem>>, vector<1152x128xbf16>
    %cst = arith.constant dense<0.000000e+00> : vector<32x128xf32>
    %2 = tpu.matmul %0, %1, %cst {dimension_numbers = #tpu.dot_dimension_numbers<[1], [0], [0], [1], [0, 0, 1, 1], [], []>} : vector<32x1152xbf16>, vector<1152x128xbf16>, vector<32x128xf32> -> vector<32x128xf32>
    %c0_3 = arith.constant 0 : index
    %c0_4 = arith.constant 0 : index
    %3 = vector.load %arg4[%c0_3, %c0_4] : memref<1x128xf32, #tpu.memory_space<vmem>>, vector<1x128xf32>
    %4 = vector.broadcast %3 : vector<1x128xf32> to vector<32x128xf32>
    %5 = arith.mulf %2, %4 : vector<32x128xf32>
    %c0_5 = arith.constant 0 : index
    %c0_6 = arith.constant 0 : index
    %6 = vector.load %arg5[%c0_5, %c0_6] : memref<1x128xf32, #tpu.memory_space<vmem>>, vector<1x128xf32>
    %7 = vector.broadcast %6 : vector<1x128xf32> to vector<32x128xf32>
    %8 = arith.addf %5, %7 : vector<32x128xf32>
    %c0_7 = arith.constant 0 : index
    %c0_8 = arith.constant 0 : index
    %9 = vector.load %arg6[%c0_7, %c0_8] : memref<32x128xbf16, #tpu.memory_space<vmem>>, vector<32x128xbf16>
    %10 = arith.extf %9 : vector<32x128xbf16> to vector<32x128xf32>
    %11 = arith.addf %8, %10 : vector<32x128xf32>
    %cst_9 = arith.constant 0.000000e+00 : f32
    %12 = vector.broadcast %cst_9 : f32 to vector<32x128xf32>
    %13 = arith.maximumf %11, %12 : vector<32x128xf32>
    %14 = arith.truncf %13 : vector<32x128xf32> to vector<32x128xbf16>
    %c0_10 = arith.constant 0 : index
    %c0_11 = arith.constant 0 : index
    %15 = vector.load %arg7[%c0_10, %c0_11] : memref<32x128xbf16, #tpu.memory_space<vmem>>, vector<32x128xbf16>
    tpu.vector_store %arg7[%c0_10, %c0_11], %14 {strides = array<i32>} : memref<32x128xbf16, #tpu.memory_space<vmem>>, vector<32x128xbf16>,
    return
  }
  func.func @transform_0(%arg0: i32, %arg1: i32) -> (i32, i32) {
    %c0_i32 = arith.constant 0 : i32
    %c0_i32_0 = arith.constant 0 : i32
    return %arg0, %c0_i32 : i32, i32
  }
  func.func @transform_1(%arg0: i32, %arg1: i32) -> (i32, i32) {
    %c0_i32 = arith.constant 0 : i32
    %c0_i32_0 = arith.constant 0 : i32
    return %c0_i32, %arg1 : i32, i32
  }
  func.func @transform_2(%arg0: i32, %arg1: i32) -> (i32, i32) {
    %c0_i32 = arith.constant 0 : i32
    %c0_i32_0 = arith.constant 0 : i32
    return %c0_i32, %arg1 : i32, i32
  }
  func.func @transform_3(%arg0: i32, %arg1: i32) -> (i32, i32) {
    %c0_i32 = arith.constant 0 : i32
    %c0_i32_0 = arith.constant 0 : i32
    return %c0_i32, %arg1 : i32, i32
  }
  func.func @transform_4(%arg0: i32, %arg1: i32) -> (i32, i32) {
    %c0_i32 = arith.constant 0 : i32
    return %arg0, %arg1 : i32, i32
  }
  func.func @transform_5(%arg0: i32, %arg1: i32) -> (i32, i32) {
    %c0_i32 = arith.constant 0 : i32
    return %arg0, %arg1 : i32, i32
  }
}

module attributes {stable_mosaic.version = 11 : i64} {
  func.func @_gemm1_kernel(%arg0: i32, %arg1: i32, %arg2: memref<16x1152xbf16, #tpu.memory_space<vmem>>, %arg3: memref<1152x128xbf16, #tpu.memory_space<vmem>>, %arg4: memref<1x128xf32, #tpu.memory_space<vmem>>, %arg5: memref<1x128xf32, #tpu.memory_space<vmem>>, %arg6: memref<16x128xbf16, #tpu.memory_space<vmem>>) attributes {dimension_semantics = [#tpu.dimension_semantics<parallel>, #tpu.dimension_semantics<parallel>], iteration_bounds = array<i64: 1, 1>, scalar_prefetch = 0 : i64, scratch_operands = 0 : i64, tpu.core_type = #tpu.core_type<tc>, window_params = [{transform_indices = @transform_0, window_bounds = array<i64: 16, 1152>}, {transform_indices = @transform_1, window_bounds = array<i64: 1152, 128>}, {transform_indices = @transform_2, window_bounds = array<i64: 1, 128>}, {transform_indices = @transform_3, window_bounds = array<i64: 1, 128>}, {transform_indices = @transform_4, window_bounds = array<i64: 16, 128>}]} {
    %c0 = arith.constant 0 : index
    %c0_0 = arith.constant 0 : index
    %0 = vector.load %arg2[%c0, %c0_0] : memref<16x1152xbf16, #tpu.memory_space<vmem>>, vector<16x1152xbf16>
    %c0_1 = arith.constant 0 : index
    %c0_2 = arith.constant 0 : index
    %1 = vector.load %arg3[%c0_1, %c0_2] : memref<1152x128xbf16, #tpu.memory_space<vmem>>, vector<1152x128xbf16>
    %cst = arith.constant dense<0.000000e+00> : vector<16x128xf32>
    %2 = tpu.matmul %0, %1, %cst {dimension_numbers = #tpu.dot_dimension_numbers<[1], [0], [0], [1], [0, 0, 1, 1], [], []>} : vector<16x1152xbf16>, vector<1152x128xbf16>, vector<16x128xf32> -> vector<16x128xf32>
    %c0_3 = arith.constant 0 : index
    %c0_4 = arith.constant 0 : index
    %3 = vector.load %arg4[%c0_3, %c0_4] : memref<1x128xf32, #tpu.memory_space<vmem>>, vector<1x128xf32>
    %4 = vector.broadcast %3 : vector<1x128xf32> to vector<16x128xf32>
    %5 = arith.mulf %2, %4 : vector<16x128xf32>
    %c0_5 = arith.constant 0 : index
    %c0_6 = arith.constant 0 : index
    %6 = vector.load %arg5[%c0_5, %c0_6] : memref<1x128xf32, #tpu.memory_space<vmem>>, vector<1x128xf32>
    %7 = vector.broadcast %6 : vector<1x128xf32> to vector<16x128xf32>
    %8 = arith.addf %5, %7 : vector<16x128xf32>
    %cst_7 = arith.constant 0.000000e+00 : f32
    %9 = vector.broadcast %cst_7 : f32 to vector<16x128xf32>
    %10 = arith.maximumf %8, %9 : vector<16x128xf32>
    %11 = arith.truncf %10 : vector<16x128xf32> to vector<16x128xbf16>
    %c0_8 = arith.constant 0 : index
    %c0_9 = arith.constant 0 : index
    %12 = vector.load %arg6[%c0_8, %c0_9] : memref<16x128xbf16, #tpu.memory_space<vmem>>, vector<16x128xbf16>
    tpu.vector_store %arg6[%c0_8, %c0_9], %11 {strides = array<i32>} : memref<16x128xbf16, #tpu.memory_space<vmem>>, vector<16x128xbf16>,
    return
  }
  func.func @transform_0(%arg0: i32, %arg1: i32) -> (i32, i32) {
    %c0_i32 = arith.constant 0 : i32
    %c0_i32_0 = arith.constant 0 : i32
    return %arg0, %c0_i32 : i32, i32
  }
  func.func @transform_1(%arg0: i32, %arg1: i32) -> (i32, i32) {
    %c0_i32 = arith.constant 0 : i32
    %c0_i32_0 = arith.constant 0 : i32
    return %c0_i32, %arg1 : i32, i32
  }
  func.func @transform_2(%arg0: i32, %arg1: i32) -> (i32, i32) {
    %c0_i32 = arith.constant 0 : i32
    %c0_i32_0 = arith.constant 0 : i32
    return %c0_i32, %arg1 : i32, i32
  }
  func.func @transform_3(%arg0: i32, %arg1: i32) -> (i32, i32) {
    %c0_i32 = arith.constant 0 : i32
    %c0_i32_0 = arith.constant 0 : i32
    return %c0_i32, %arg1 : i32, i32
  }
  func.func @transform_4(%arg0: i32, %arg1: i32) -> (i32, i32) {
    %c0_i32 = arith.constant 0 : i32
    return %arg0, %arg1 : i32, i32
  }
}

module attributes {stable_mosaic.version = 11 : i64} {
  func.func @_gemm1_kernel(%arg0: i32, %arg1: i32, %arg2: memref<16x128xbf16, #tpu.memory_space<vmem>>, %arg3: memref<128x128xbf16, #tpu.memory_space<vmem>>, %arg4: memref<1x128xf32, #tpu.memory_space<vmem>>, %arg5: memref<1x128xf32, #tpu.memory_space<vmem>>, %arg6: memref<16x128xbf16, #tpu.memory_space<vmem>>) attributes {dimension_semantics = [#tpu.dimension_semantics<parallel>, #tpu.dimension_semantics<parallel>], iteration_bounds = array<i64: 1, 1>, scalar_prefetch = 0 : i64, scratch_operands = 0 : i64, tpu.core_type = #tpu.core_type<tc>, window_params = [{transform_indices = @transform_0, window_bounds = array<i64: 16, 128>}, {transform_indices = @transform_1, window_bounds = array<i64: 128, 128>}, {transform_indices = @transform_2, window_bounds = array<i64: 1, 128>}, {transform_indices = @transform_3, window_bounds = array<i64: 1, 128>}, {transform_indices = @transform_4, window_bounds = array<i64: 16, 128>}]} {
    %c0 = arith.constant 0 : index
    %c0_0 = arith.constant 0 : index
    %0 = vector.load %arg2[%c0, %c0_0] : memref<16x128xbf16, #tpu.memory_space<vmem>>, vector<16x128xbf16>
    %c0_1 = arith.constant 0 : index
    %c0_2 = arith.constant 0 : index
    %1 = vector.load %arg3[%c0_1, %c0_2] : memref<128x128xbf16, #tpu.memory_space<vmem>>, vector<128x128xbf16>
    %cst = arith.constant dense<0.000000e+00> : vector<16x128xf32>
    %2 = tpu.matmul %0, %1, %cst {dimension_numbers = #tpu.dot_dimension_numbers<[1], [0], [0], [1], [0, 0, 1, 1], [], []>} : vector<16x128xbf16>, vector<128x128xbf16>, vector<16x128xf32> -> vector<16x128xf32>
    %c0_3 = arith.constant 0 : index
    %c0_4 = arith.constant 0 : index
    %3 = vector.load %arg4[%c0_3, %c0_4] : memref<1x128xf32, #tpu.memory_space<vmem>>, vector<1x128xf32>
    %4 = vector.broadcast %3 : vector<1x128xf32> to vector<16x128xf32>
    %5 = arith.mulf %2, %4 : vector<16x128xf32>
    %c0_5 = arith.constant 0 : index
    %c0_6 = arith.constant 0 : index
    %6 = vector.load %arg5[%c0_5, %c0_6] : memref<1x128xf32, #tpu.memory_space<vmem>>, vector<1x128xf32>
    %7 = vector.broadcast %6 : vector<1x128xf32> to vector<16x128xf32>
    %8 = arith.addf %5, %7 : vector<16x128xf32>
    %9 = arith.truncf %8 : vector<16x128xf32> to vector<16x128xbf16>
    %c0_7 = arith.constant 0 : index
    %c0_8 = arith.constant 0 : index
    %10 = vector.load %arg6[%c0_7, %c0_8] : memref<16x128xbf16, #tpu.memory_space<vmem>>, vector<16x128xbf16>
    tpu.vector_store %arg6[%c0_7, %c0_8], %9 {strides = array<i32>} : memref<16x128xbf16, #tpu.memory_space<vmem>>, vector<16x128xbf16>,
    return
  }
  func.func @transform_0(%arg0: i32, %arg1: i32) -> (i32, i32) {
    %c0_i32 = arith.constant 0 : i32
    %c0_i32_0 = arith.constant 0 : i32
    return %arg0, %c0_i32 : i32, i32
  }
  func.func @transform_1(%arg0: i32, %arg1: i32) -> (i32, i32) {
    %c0_i32 = arith.constant 0 : i32
    %c0_i32_0 = arith.constant 0 : i32
    return %c0_i32, %arg1 : i32, i32
  }
  func.func @transform_2(%arg0: i32, %arg1: i32) -> (i32, i32) {
    %c0_i32 = arith.constant 0 : i32
    %c0_i32_0 = arith.constant 0 : i32
    return %c0_i32, %arg1 : i32, i32
  }
  func.func @transform_3(%arg0: i32, %arg1: i32) -> (i32, i32) {
    %c0_i32 = arith.constant 0 : i32
    %c0_i32_0 = arith.constant 0 : i32
    return %c0_i32, %arg1 : i32, i32
  }
  func.func @transform_4(%arg0: i32, %arg1: i32) -> (i32, i32) {
    %c0_i32 = arith.constant 0 : i32
    return %arg0, %arg1 : i32, i32
  }
}

module attributes {stable_mosaic.version = 11 : i64} {
  func.func @_gemm1_res_kernel(%arg0: i32, %arg1: i32, %arg2: memref<16x1152xbf16, #tpu.memory_space<vmem>>, %arg3: memref<1152x128xbf16, #tpu.memory_space<vmem>>, %arg4: memref<1x128xf32, #tpu.memory_space<vmem>>, %arg5: memref<1x128xf32, #tpu.memory_space<vmem>>, %arg6: memref<16x128xbf16, #tpu.memory_space<vmem>>, %arg7: memref<16x128xbf16, #tpu.memory_space<vmem>>) attributes {dimension_semantics = [#tpu.dimension_semantics<parallel>, #tpu.dimension_semantics<parallel>], iteration_bounds = array<i64: 1, 1>, scalar_prefetch = 0 : i64, scratch_operands = 0 : i64, tpu.core_type = #tpu.core_type<tc>, window_params = [{transform_indices = @transform_0, window_bounds = array<i64: 16, 1152>}, {transform_indices = @transform_1, window_bounds = array<i64: 1152, 128>}, {transform_indices = @transform_2, window_bounds = array<i64: 1, 128>}, {transform_indices = @transform_3, window_bounds = array<i64: 1, 128>}, {transform_indices = @transform_4, window_bounds = array<i64: 16, 128>}, {transform_indices = @transform_5, window_bounds = array<i64: 16, 128>}]} {
    %c0 = arith.constant 0 : index
    %c0_0 = arith.constant 0 : index
    %0 = vector.load %arg2[%c0, %c0_0] : memref<16x1152xbf16, #tpu.memory_space<vmem>>, vector<16x1152xbf16>
    %c0_1 = arith.constant 0 : index
    %c0_2 = arith.constant 0 : index
    %1 = vector.load %arg3[%c0_1, %c0_2] : memref<1152x128xbf16, #tpu.memory_space<vmem>>, vector<1152x128xbf16>
    %cst = arith.constant dense<0.000000e+00> : vector<16x128xf32>
    %2 = tpu.matmul %0, %1, %cst {dimension_numbers = #tpu.dot_dimension_numbers<[1], [0], [0], [1], [0, 0, 1, 1], [], []>} : vector<16x1152xbf16>, vector<1152x128xbf16>, vector<16x128xf32> -> vector<16x128xf32>
    %c0_3 = arith.constant 0 : index
    %c0_4 = arith.constant 0 : index
    %3 = vector.load %arg4[%c0_3, %c0_4] : memref<1x128xf32, #tpu.memory_space<vmem>>, vector<1x128xf32>
    %4 = vector.broadcast %3 : vector<1x128xf32> to vector<16x128xf32>
    %5 = arith.mulf %2, %4 : vector<16x128xf32>
    %c0_5 = arith.constant 0 : index
    %c0_6 = arith.constant 0 : index
    %6 = vector.load %arg5[%c0_5, %c0_6] : memref<1x128xf32, #tpu.memory_space<vmem>>, vector<1x128xf32>
    %7 = vector.broadcast %6 : vector<1x128xf32> to vector<16x128xf32>
    %8 = arith.addf %5, %7 : vector<16x128xf32>
    %c0_7 = arith.constant 0 : index
    %c0_8 = arith.constant 0 : index
    %9 = vector.load %arg6[%c0_7, %c0_8] : memref<16x128xbf16, #tpu.memory_space<vmem>>, vector<16x128xbf16>
    %10 = arith.extf %9 : vector<16x128xbf16> to vector<16x128xf32>
    %11 = arith.addf %8, %10 : vector<16x128xf32>
    %cst_9 = arith.constant 0.000000e+00 : f32
    %12 = vector.broadcast %cst_9 : f32 to vector<16x128xf32>
    %13 = arith.maximumf %11, %12 : vector<16x128xf32>
    %14 = arith.truncf %13 : vector<16x128xf32> to vector<16x128xbf16>
    %c0_10 = arith.constant 0 : index
    %c0_11 = arith.constant 0 : index
    %15 = vector.load %arg7[%c0_10, %c0_11] : memref<16x128xbf16, #tpu.memory_space<vmem>>, vector<16x128xbf16>
    tpu.vector_store %arg7[%c0_10, %c0_11], %14 {strides = array<i32>} : memref<16x128xbf16, #tpu.memory_space<vmem>>, vector<16x128xbf16>,
    return
  }
  func.func @transform_0(%arg0: i32, %arg1: i32) -> (i32, i32) {
    %c0_i32 = arith.constant 0 : i32
    %c0_i32_0 = arith.constant 0 : i32
    return %arg0, %c0_i32 : i32, i32
  }
  func.func @transform_1(%arg0: i32, %arg1: i32) -> (i32, i32) {
    %c0_i32 = arith.constant 0 : i32
    %c0_i32_0 = arith.constant 0 : i32
    return %c0_i32, %arg1 : i32, i32
  }
  func.func @transform_2(%arg0: i32, %arg1: i32) -> (i32, i32) {
    %c0_i32 = arith.constant 0 : i32
    %c0_i32_0 = arith.constant 0 : i32
    return %c0_i32, %arg1 : i32, i32
  }
  func.func @transform_3(%arg0: i32, %arg1: i32) -> (i32, i32) {
    %c0_i32 = arith.constant 0 : i32
    %c0_i32_0 = arith.constant 0 : i32
    return %c0_i32, %arg1 : i32, i32
  }
  func.func @transform_4(%arg0: i32, %arg1: i32) -> (i32, i32) {
    %c0_i32 = arith.constant 0 : i32
    return %arg0, %arg1 : i32, i32
  }
  func.func @transform_5(%arg0: i32, %arg1: i32) -> (i32, i32) {
    %c0_i32 = arith.constant 0 : i32
    return %arg0, %arg1 : i32, i32
  }
}

module attributes {stable_mosaic.version = 11 : i64} {
  func.func @_gemm1_kernel(%arg0: i32, %arg1: i32, %arg2: memref<32x896xbf16, #tpu.memory_space<vmem>>, %arg3: memref<896x128xbf16, #tpu.memory_space<vmem>>, %arg4: memref<1x128xf32, #tpu.memory_space<vmem>>, %arg5: memref<1x128xf32, #tpu.memory_space<vmem>>, %arg6: memref<32x128xbf16, #tpu.memory_space<vmem>>) attributes {dimension_semantics = [#tpu.dimension_semantics<parallel>, #tpu.dimension_semantics<parallel>], iteration_bounds = array<i64: 1, 1>, scalar_prefetch = 0 : i64, scratch_operands = 0 : i64, tpu.core_type = #tpu.core_type<tc>, window_params = [{transform_indices = @transform_0, window_bounds = array<i64: 32, 896>}, {transform_indices = @transform_1, window_bounds = array<i64: 896, 128>}, {transform_indices = @transform_2, window_bounds = array<i64: 1, 128>}, {transform_indices = @transform_3, window_bounds = array<i64: 1, 128>}, {transform_indices = @transform_4, window_bounds = array<i64: 32, 128>}]} {
    %c0 = arith.constant 0 : index
    %c0_0 = arith.constant 0 : index
    %0 = vector.load %arg2[%c0, %c0_0] : memref<32x896xbf16, #tpu.memory_space<vmem>>, vector<32x896xbf16>
    %c0_1 = arith.constant 0 : index
    %c0_2 = arith.constant 0 : index
    %1 = vector.load %arg3[%c0_1, %c0_2] : memref<896x128xbf16, #tpu.memory_space<vmem>>, vector<896x128xbf16>
    %cst = arith.constant dense<0.000000e+00> : vector<32x128xf32>
    %2 = tpu.matmul %0, %1, %cst {dimension_numbers = #tpu.dot_dimension_numbers<[1], [0], [0], [1], [0, 0, 1, 1], [], []>} : vector<32x896xbf16>, vector<896x128xbf16>, vector<32x128xf32> -> vector<32x128xf32>
    %c0_3 = arith.constant 0 : index
    %c0_4 = arith.constant 0 : index
    %3 = vector.load %arg4[%c0_3, %c0_4] : memref<1x128xf32, #tpu.memory_space<vmem>>, vector<1x128xf32>
    %4 = vector.broadcast %3 : vector<1x128xf32> to vector<32x128xf32>
    %5 = arith.mulf %2, %4 : vector<32x128xf32>
    %c0_5 = arith.constant 0 : index
    %c0_6 = arith.constant 0 : index
    %6 = vector.load %arg5[%c0_5, %c0_6] : memref<1x128xf32, #tpu.memory_space<vmem>>, vector<1x128xf32>
    %7 = vector.broadcast %6 : vector<1x128xf32> to vector<32x128xf32>
    %8 = arith.addf %5, %7 : vector<32x128xf32>
    %cst_7 = arith.constant 0.000000e+00 : f32
    %9 = vector.broadcast %cst_7 : f32 to vector<32x128xf32>
    %10 = arith.maximumf %8, %9 : vector<32x128xf32>
    %11 = arith.truncf %10 : vector<32x128xf32> to vector<32x128xbf16>
    %c0_8 = arith.constant 0 : index
    %c0_9 = arith.constant 0 : index
    %12 = vector.load %arg6[%c0_8, %c0_9] : memref<32x128xbf16, #tpu.memory_space<vmem>>, vector<32x128xbf16>
    tpu.vector_store %arg6[%c0_8, %c0_9], %11 {strides = array<i32>} : memref<32x128xbf16, #tpu.memory_space<vmem>>, vector<32x128xbf16>,
    return
  }
  func.func @transform_0(%arg0: i32, %arg1: i32) -> (i32, i32) {
    %c0_i32 = arith.constant 0 : i32
    %c0_i32_0 = arith.constant 0 : i32
    return %arg0, %c0_i32 : i32, i32
  }
  func.func @transform_1(%arg0: i32, %arg1: i32) -> (i32, i32) {
    %c0_i32 = arith.constant 0 : i32
    %c0_i32_0 = arith.constant 0 : i32
    return %c0_i32, %arg1 : i32, i32
  }
  func.func @transform_2(%arg0: i32, %arg1: i32) -> (i32, i32) {
    %c0_i32 = arith.constant 0 : i32
    %c0_i32_0 = arith.constant 0 : i32
    return %c0_i32, %arg1 : i32, i32
  }
  func.func @transform_3(%arg0: i32, %arg1: i32) -> (i32, i32) {
    %c0_i32 = arith.constant 0 : i32
    %c0_i32_0 = arith.constant 0 : i32
    return %c0_i32, %arg1 : i32, i32
  }
  func.func @transform_4(%arg0: i32, %arg1: i32) -> (i32, i32) {
    %c0_i32 = arith.constant 0 : i32
    return %arg0, %arg1 : i32, i32
  }
}

module attributes {stable_mosaic.version = 11 : i64} {
  func.func @_head_kernel(%arg0: memref<2x4x128xbf16, #tpu.memory_space<vmem>>, %arg1: memref<2x2x128xbf16, #tpu.memory_space<vmem>>, %arg2: memref<128x128xbf16, #tpu.memory_space<vmem>>, %arg3: memref<128x128xbf16, #tpu.memory_space<vmem>>, %arg4: memref<1x128xf32, #tpu.memory_space<vmem>>, %arg5: memref<2x128xf32, #tpu.memory_space<vmem>>) attributes {dimension_semantics = [], scalar_prefetch = 0 : i64, scratch_operands = 0 : i64, tpu.core_type = #tpu.core_type<tc>} {
    %c0 = arith.constant 0 : index
    %c0_0 = arith.constant 0 : index
    %c0_1 = arith.constant 0 : index
    %0 = vector.load %arg0[%c0, %c0_0, %c0_1] : memref<2x4x128xbf16, #tpu.memory_space<vmem>>, vector<2x4x128xbf16>
    %1 = arith.extf %0 : vector<2x4x128xbf16> to vector<2x4x128xf32>
    %cst = arith.constant dense<0.000000e+00> : vector<2x128xf32>
    %2 = vector.multi_reduction <add>, %1, %cst [1] : vector<2x4x128xf32> to vector<2x128xf32>
    %cst_2 = arith.constant 2.500000e-01 : f32
    %3 = vector.broadcast %cst_2 : f32 to vector<2x128xf32>
    %4 = arith.mulf %2, %3 : vector<2x128xf32>
    %5 = arith.truncf %4 : vector<2x128xf32> to vector<2x128xbf16>
    %c0_3 = arith.constant 0 : index
    %c0_4 = arith.constant 0 : index
    %c0_5 = arith.constant 0 : index
    %6 = vector.load %arg1[%c0_3, %c0_4, %c0_5] : memref<2x2x128xbf16, #tpu.memory_space<vmem>>, vector<2x2x128xbf16>
    %7 = arith.extf %6 : vector<2x2x128xbf16> to vector<2x2x128xf32>
    %cst_6 = arith.constant dense<0.000000e+00> : vector<2x128xf32>
    %8 = vector.multi_reduction <add>, %7, %cst_6 [1] : vector<2x2x128xf32> to vector<2x128xf32>
    %cst_7 = arith.constant 5.000000e-01 : f32
    %9 = vector.broadcast %cst_7 : f32 to vector<2x128xf32>
    %10 = arith.mulf %8, %9 : vector<2x128xf32>
    %11 = arith.truncf %10 : vector<2x128xf32> to vector<2x128xbf16>
    %c0_8 = arith.constant 0 : index
    %c0_9 = arith.constant 0 : index
    %12 = vector.load %arg2[%c0_8, %c0_9] : memref<128x128xbf16, #tpu.memory_space<vmem>>, vector<128x128xbf16>
    %cst_10 = arith.constant dense<0.000000e+00> : vector<2x128xf32>
    %13 = tpu.matmul %5, %12, %cst_10 {dimension_numbers = #tpu.dot_dimension_numbers<[1], [0], [0], [1], [0, 0, 1, 1], [], []>} : vector<2x128xbf16>, vector<128x128xbf16>, vector<2x128xf32> -> vector<2x128xf32>
    %c0_11 = arith.constant 0 : index
    %c0_12 = arith.constant 0 : index
    %14 = vector.load %arg3[%c0_11, %c0_12] : memref<128x128xbf16, #tpu.memory_space<vmem>>, vector<128x128xbf16>
    %cst_13 = arith.constant dense<0.000000e+00> : vector<2x128xf32>
    %15 = tpu.matmul %11, %14, %cst_13 {dimension_numbers = #tpu.dot_dimension_numbers<[1], [0], [0], [1], [0, 0, 1, 1], [], []>} : vector<2x128xbf16>, vector<128x128xbf16>, vector<2x128xf32> -> vector<2x128xf32>
    %16 = arith.addf %13, %15 : vector<2x128xf32>
    %c0_14 = arith.constant 0 : index
    %c0_15 = arith.constant 0 : index
    %17 = vector.load %arg4[%c0_14, %c0_15] : memref<1x128xf32, #tpu.memory_space<vmem>>, vector<1x128xf32>
    %18 = vector.broadcast %17 : vector<1x128xf32> to vector<2x128xf32>
    %19 = arith.addf %16, %18 : vector<2x128xf32>
    %c0_16 = arith.constant 0 : index
    %c0_17 = arith.constant 0 : index
    %20 = vector.load %arg5[%c0_16, %c0_17] : memref<2x128xf32, #tpu.memory_space<vmem>>, vector<2x128xf32>
    tpu.vector_store %arg5[%c0_16, %c0_17], %19 {strides = array<i32>} : memref<2x128xf32, #tpu.memory_space<vmem>>, vector<2x128xf32>,
    return
  }
}

</mosaic_0001>

<bundles_post_ra>
// kernel: net_forward.21
= control target key start
LH: loop header
LB: loop body
LE: loop exit
PB: predicated region body
PF: predicated region fallthrough
CT: control target
= control target key end

     0   :  { %s891_s1 = inlined_call_operand.vmem [shape: bf16[256,128], index: 1, kind: input, shape index: {}]   ;;  %s892_s0 = inlined_call_operand.vmem [shape: bf16[128,256], index: 0, kind: input, shape index: {}]   ;;  %s893_s2 = inlined_call_operand.vmem [shape: f32[1,128], index: 2, kind: input, shape index: {}]   ;;  %s894_s3 = inlined_call_operand.vmem [shape: f32[1,128], index: 3, kind: input, shape index: {}]   ;;  %s895_s4 = inlined_call_operand.vmem [shape: bf16[128,128], index: 4, kind: output, shape index: {}]  }
   0x1   :  { %v582_v0 = vld [vmem:[%s891_s1 + $0x38] sm:$0xff]  ;;  %v581_v2 = vld [vmem:[%s891_s1 + $0x30] sm:$0xff]  ;;  %v580_v4 = vld [vmem:[%s891_s1 + $0x28] sm:$0xff] }
   0x2   :  { %v590_v1 = vld [vmem:[%s891_s1 + $0x78] sm:$0xff]  ;;  %241 = vmatpush.bf16.msra.mxu0 %v582_v0  ;;  %638 = vmatpush.bf16.msra.mxu2 %v582_v0  ;;  %v589_v3 = vld [vmem:[%s891_s1 + $0x70] sm:$0xff]  ;;  %v588_v5 = vld [vmem:[%s891_s1 + $0x68] sm:$0xff] }
   0x3   :  { %290 = vmatpush.bf16.msra.mxu1 %v590_v1  ;;  %646 = vmatpush.bf16.msra.mxu3 %v590_v1  ;;  %v579_v6 = vld [vmem:[%s891_s1 + $0x20] sm:$0xff]  ;;  %v578_v8 = vld [vmem:[%s891_s1 + $0x18] sm:$0xff]  ;;  %v577_v10 = vld [vmem:[%s891_s1 + $0x10] sm:$0xff] }
   0x4   :  { %v587_v7 = vld [vmem:[%s891_s1 + $0x60] sm:$0xff]  ;;  %v586_v9 = vld [vmem:[%s891_s1 + $0x58] sm:$0xff]  ;;  %v585_v11 = vld [vmem:[%s891_s1 + $0x50] sm:$0xff] }
   0x5   :  { %v576_v12 = vld [vmem:[%s891_s1 + $0x8] sm:$0xff]  ;;  %v575_v14 = vld [vmem:[%s891_s1] sm:$0xff]  ;;  %v441_v28 = vld [vmem:[%s892_s0 + $0x10] sm:$0xf] }
   0x6   :  { %242 = vmatpush.bf16.msra.mxu0 %v581_v2  ;;  %639 = vmatpush.bf16.msra.mxu2 %v581_v2  ;;  %v584_v13 = vld [vmem:[%s891_s1 + $0x48] sm:$0xff]  ;;  %v583_v15 = vld [vmem:[%s891_s1 + $0x40] sm:$0xff]  ;;  %v562_v29 = vld [vmem:[%s892_s0 + $0x14] sm:$0xf0] }
   0x7   :  { %291 = vmatpush.bf16.msra.mxu1 %v589_v3  ;;  %647 = vmatpush.bf16.msra.mxu3 %v589_v3  ;;  %v433_v16 = vld [vmem:[%s892_s0] sm:$0xf]  ;;  %v560_v17 = vld [vmem:[%s892_s0 + $0x4] sm:$0xf0]  ;;  %v559_v20 = vld [vmem:[%s892_s0 + $0x4] sm:$0xf]  ;;  %v442_v36 = vor.u32 %v562_v29, %v441_v28 }
   0x8   :  { %v465_v18 = vld [vmem:[%s892_s0 + $0x40] sm:$0xf]  ;;  %v568_v19 = vld [vmem:[%s892_s0 + $0x44] sm:$0xf0]  ;;  %v435_v21 = vld [vmem:[%s892_s0 + $0x8] sm:$0xf0]  ;;  %v434_v24 = vor.u32 %v560_v17, %v433_v16 }
   0x9   :  { %v567_v22 = vld [vmem:[%s892_s0 + $0x44] sm:$0xf]  ;;  %v467_v23 = vld [vmem:[%s892_s0 + $0x48] sm:$0xf0]  ;;  %v466_v25 = vor.u32 %v568_v19, %v465_v18  ;;  %v438_v26 = vor.u32 %v559_v20, %v435_v21  ;;  %v473_v30 = vld [vmem:[%s892_s0 + $0x50] sm:$0xf] }
   0xa   :  { %243 = vmatpush.bf16.msra.mxu0 %v580_v4  ;;  %640 = vmatpush.bf16.msra.mxu2 %v580_v4  ;;  %v470_v27 = vor.u32 %v567_v22, %v467_v23  ;;  %v570_v31 = vld [vmem:[%s892_s0 + $0x54] sm:$0xf0]  ;;  %v561_v32 = vld [vmem:[%s892_s0 + $0x14] sm:$0xf]  ;;  %v443_v33 = vld [vmem:[%s892_s0 + $0x18] sm:$0xf0] }
   0xb   :  { %292 = vmatpush.bf16.msra.mxu1 %v588_v5  ;;  %648 = vmatpush.bf16.msra.mxu3 %v588_v5  ;;  %v569_v34 = vld [vmem:[%s892_s0 + $0x54] sm:$0xf]  ;;  %v475_v35 = vld [vmem:[%s892_s0 + $0x58] sm:$0xf0]  ;;  %v474_v37 = vor.u32 %v570_v31, %v473_v30  ;;  %v446_v38 = vor.u32 %v561_v32, %v443_v33  ;;  %v449_v40 = vld [vmem:[%s892_s0 + $0x20] sm:$0xf] }
   0xc   :  { %v478_v39 = vor.u32 %v569_v34, %v475_v35  ;;  %v564_v41 = vld [vmem:[%s892_s0 + $0x24] sm:$0xf0]  ;;  %v481_v42 = vld [vmem:[%s892_s0 + $0x60] sm:$0xf]  ;;  %v563_v44 = vld [vmem:[%s892_s0 + $0x24] sm:$0xf] }
   0xd   :  { %v572_v43 = vld [vmem:[%s892_s0 + $0x64] sm:$0xf0]  ;;  %v451_v45 = vld [vmem:[%s892_s0 + $0x28] sm:$0xf0]  ;;  %v571_v46 = vld [vmem:[%s892_s0 + $0x64] sm:$0xf]  ;;  %v450_v48 = vor.u32 %v564_v41, %v449_v40 }
   0xe   :  { %244 = vmatpush.bf16.msra.mxu0 %v579_v6  ;;  %641 = vmatpush.bf16.msra.mxu2 %v579_v6  ;;  %v483_v47 = vld [vmem:[%s892_s0 + $0x68] sm:$0xf0]  ;;  %v482_v49 = vor.u32 %v572_v43, %v481_v42  ;;  %v454_v50 = vor.u32 %v563_v44, %v451_v45  ;;  %v457_v52 = vld [vmem:[%s892_s0 + $0x30] sm:$0xf]  ;;  %v566_v53 = vld [vmem:[%s892_s0 + $0x34] sm:$0xf0] }
   0xf   :  { %293 = vmatpush.bf16.msra.mxu1 %v587_v7  ;;  %649 = vmatpush.bf16.msra.mxu3 %v587_v7  ;;  %v486_v51 = vor.u32 %v571_v46, %v483_v47  ;;  %v489_v54 = vld [vmem:[%s892_s0 + $0x70] sm:$0xf]  ;;  %v574_v55 = vld [vmem:[%s892_s0 + $0x74] sm:$0xf0]  ;;  %v565_v56 = vld [vmem:[%s892_s0 + $0x34] sm:$0xf]  ;;  %v458_v60 = vor.u32 %v566_v53, %v457_v52 }
  0x10   :  { %v459_v57 = vld [vmem:[%s892_s0 + $0x38] sm:$0xf0]  ;;  %v573_v58 = vld [vmem:[%s892_s0 + $0x74] sm:$0xf]  ;;  %v490_v61 = vor.u32 %v574_v55, %v489_v54  ;;  %v828_v3 = vld [vmem:[%s893_s2] ss:$0 sm:$0xff] }
  0x11   :  { %v491_v59 = vld [vmem:[%s892_s0 + $0x78] sm:$0xf0]  ;;  %v462_v62 = vor.u32 %v565_v56, %v459_v57  ;;  %v834_v7 = vld [vmem:[%s894_s3] ss:$0 sm:$0xff] }
  0x12   :  { %245 = vmatpush.bf16.msra.mxu0 %v578_v8  ;;  %642 = vmatpush.bf16.msra.mxu2 %v578_v8  ;;  %v494_v63 = vor.u32 %v573_v58, %v491_v59 }
  0x13   :  { %294 = vmatpush.bf16.msra.mxu1 %v586_v9  ;;  %650 = vmatpush.bf16.msra.mxu3 %v586_v9 }
  0x16   :  { %246 = vmatpush.bf16.msra.mxu0 %v577_v10  ;;  %643 = vmatpush.bf16.msra.mxu2 %v577_v10 }
  0x17   :  { %295 = vmatpush.bf16.msra.mxu1 %v585_v11  ;;  %651 = vmatpush.bf16.msra.mxu3 %v585_v11 }
  0x1a   :  { %247 = vmatpush.bf16.msra.mxu0 %v576_v12  ;;  %644 = vmatpush.bf16.msra.mxu2 %v576_v12 }
  0x1b   :  { %296 = vmatpush.bf16.msra.mxu1 %v584_v13  ;;  %652 = vmatpush.bf16.msra.mxu3 %v584_v13 }
  0x1e   :  { %248 = vmatpush.bf16.msra.mxu0 %v575_v14  ;;  %645 = vmatpush.bf16.msra.mxu2 %v575_v14 }
  0x1f   :  { %297 = vmatpush.bf16.msra.mxu1 %v583_v15  ;;  %653 = vmatpush.bf16.msra.mxu3 %v583_v15 }
  0x21   :  { %249 = vmatmul.bf16.vlgmr.msra.gmra.mxu0 %v434_v24  ;;  %269 = vmatmul.bf16.vlgmr.msra.gmra.mxu2 %v466_v25 }
  0x22   :  { %298 = vmatmul.bf16.vlgmr.msra.gmra.mxu1 %v438_v26  ;;  %318 = vmatmul.bf16.vlgmr.msra.gmra.mxu3 %v470_v27 }
  0x31   :  { %254 = vmatmul.bf16.gmra.mxu0 %v442_v36  ;;  %274 = vmatmul.bf16.gmra.mxu2 %v474_v37 }
  0x32   :  { %303 = vmatmul.bf16.gmra.mxu1 %v446_v38  ;;  %323 = vmatmul.bf16.gmra.mxu3 %v478_v39 }
  0x41   :  { %259 = vmatmul.bf16.gmra.mxu0 %v450_v48  ;;  %279 = vmatmul.bf16.gmra.mxu2 %v482_v49 }
  0x42   :  { %308 = vmatmul.bf16.gmra.mxu1 %v454_v50  ;;  %328 = vmatmul.bf16.gmra.mxu3 %v486_v51 }
  0x51   :  { %264 = vmatmul.bf16.gmra.mxu0 %v458_v60  ;;  %284 = vmatmul.bf16.gmra.mxu2 %v490_v61 }
  0x52   :  { %313 = vmatmul.bf16.gmra.mxu1 %v462_v62  ;;  %333 = vmatmul.bf16.gmra.mxu3 %v494_v63 }
  0x9e   :  { %v250_v0 = vpop.f32.mrf.mxu0 }
  0x9f   :  { %v299_v1 = vpop.f32.mrf.mxu1 }
  0xa0   :  { %v300_v2 = vadd.f32 %v299_v1, %v250_v0 }
  0xa2   :  { %v343_v6 = vmul.f32 %v828_v3, %v300_v2 }
  0xa4   :  { %v270_v4 = vpop.f32.mrf.mxu2  ;;  %v363_v12 = vadd.f32 %v834_v7, %v343_v6 }
  0xa5   :  { %v319_v5 = vpop.f32.mrf.mxu3 }
  0xa6   :  { %v252_v8 = vpop.f32.mrf.mxu0  ;;  %v320_v10 = vadd.f32 %v319_v5, %v270_v4  ;;  %v379_v18 = vmax.f32 %v363_v12, 0.0 }
  0xa7   :  { %v301_v9 = vpop.f32.mrf.mxu1 }
  0xa8   :  { %v302_v11 = vadd.f32 %v301_v9, %v252_v8  ;;  %v351_v14 = vmul.f32 %v828_v3, %v320_v10 }
  0xaa   :  { %v344_v13 = vmul.f32 %v828_v3, %v302_v11  ;;  %v371_v23 = vadd.f32 %v834_v7, %v351_v14 }
  0xac   :  { %v364_v15 = vadd.f32 %v834_v7, %v344_v13  ;;  %v272_v16 = vpop.f32.mrf.mxu2  ;;  %v387_v28 = vmax.f32 %v371_v23, 0.0 }
  0xad   :  { %v321_v17 = vpop.f32.mrf.mxu3 }
  0xae   :  { %v380_v19 = vmax.f32 %v364_v15, 0.0  ;;  %v322_v20 = vadd.f32 %v321_v17, %v272_v16  ;;  %v255_v21 = vpop.f32.mrf.mxu0 }
  0xaf   :  { %v304_v22 = vpop.f32.mrf.mxu1 }
  0xb0   :  { %v594_v24 = vpack.c.bf16 %v380_v19, %v379_v18  ;;  %v352_v25 = vmul.f32 %v828_v3, %v322_v20  ;;  %v305_v27 = vadd.f32 %v304_v22, %v255_v21 }
  0xb2   :  { %595 = vst [vmem:[%s895_s4] sm:$0xff] %v594_v24   ;;  %v372_v26 = vadd.f32 %v834_v7, %v352_v25  ;;  %v345_v33 = vmul.f32 %v828_v3, %v305_v27 }
  0xb4   :  { %v388_v29 = vmax.f32 %v372_v26, 0.0  ;;  %v275_v30 = vpop.f32.mrf.mxu2  ;;  %v365_v38 = vadd.f32 %v834_v7, %v345_v33 }
  0xb5   :  { %v324_v31 = vpop.f32.mrf.mxu3 }
  0xb6   :  { %v614_v32 = vpack.c.bf16 %v388_v29, %v387_v28  ;;  %v257_v34 = vpop.f32.mrf.mxu0  ;;  %v325_v36 = vadd.f32 %v324_v31, %v275_v30  ;;  %v381_v44 = vmax.f32 %v365_v38, 0.0 }
  0xb7   :  { %v306_v35 = vpop.f32.mrf.mxu1 }
  0xb8   :  { %634 = vst [vmem:[%s895_s4 + $0x20] sm:$0xff] %v614_v32   ;;  %v307_v37 = vadd.f32 %v306_v35, %v257_v34  ;;  %v353_v40 = vmul.f32 %v828_v3, %v325_v36 }
  0xba   :  { %v346_v39 = vmul.f32 %v828_v3, %v307_v37  ;;  %v373_v49 = vadd.f32 %v834_v7, %v353_v40 }
  0xbc   :  { %v366_v41 = vadd.f32 %v834_v7, %v346_v39  ;;  %v277_v42 = vpop.f32.mrf.mxu2  ;;  %v389_v54 = vmax.f32 %v373_v49, 0.0 }
  0xbd   :  { %v326_v43 = vpop.f32.mrf.mxu3 }
  0xbe   :  { %v382_v45 = vmax.f32 %v366_v41, 0.0  ;;  %v327_v46 = vadd.f32 %v326_v43, %v277_v42  ;;  %v260_v47 = vpop.f32.mrf.mxu0 }
  0xbf   :  { %v309_v48 = vpop.f32.mrf.mxu1 }
  0xc0   :  { %v599_v50 = vpack.c.bf16 %v382_v45, %v381_v44  ;;  %v354_v51 = vmul.f32 %v828_v3, %v327_v46  ;;  %v310_v53 = vadd.f32 %v309_v48, %v260_v47 }
  0xc2   :  { %631 = vst [vmem:[%s895_s4 + $0x8] sm:$0xff] %v599_v50   ;;  %v374_v52 = vadd.f32 %v834_v7, %v354_v51  ;;  %v347_v59 = vmul.f32 %v828_v3, %v310_v53 }
  0xc4   :  { %v390_v55 = vmax.f32 %v374_v52, 0.0  ;;  %v280_v56 = vpop.f32.mrf.mxu2  ;;  %v367_v0 = vadd.f32 %v834_v7, %v347_v59 }
  0xc5   :  { %v329_v57 = vpop.f32.mrf.mxu3 }
  0xc6   :  { %v619_v58 = vpack.c.bf16 %v390_v55, %v389_v54  ;;  %v262_v60 = vpop.f32.mrf.mxu0  ;;  %v330_v62 = vadd.f32 %v329_v57, %v280_v56  ;;  %v383_v8 = vmax.f32 %v367_v0, 0.0 }
  0xc7   :  { %v311_v61 = vpop.f32.mrf.mxu1 }
  0xc8   :  { %635 = vst [vmem:[%s895_s4 + $0x28] sm:$0xff] %v619_v58   ;;  %v312_v63 = vadd.f32 %v311_v61, %v262_v60  ;;  %v355_v2 = vmul.f32 %v828_v3, %v330_v62 }
  0xca   :  { %v348_v1 = vmul.f32 %v828_v3, %v312_v63  ;;  %v375_v13 = vadd.f32 %v834_v7, %v355_v2 }
  0xcc   :  { %v368_v4 = vadd.f32 %v834_v7, %v348_v1  ;;  %v282_v5 = vpop.f32.mrf.mxu2  ;;  %v391_v18 = vmax.f32 %v375_v13, 0.0 }
  0xcd   :  { %v331_v6 = vpop.f32.mrf.mxu3 }
  0xce   :  { %v384_v9 = vmax.f32 %v368_v4, 0.0  ;;  %v332_v10 = vadd.f32 %v331_v6, %v282_v5  ;;  %v265_v11 = vpop.f32.mrf.mxu0 }
  0xcf   :  { %v314_v12 = vpop.f32.mrf.mxu1 }
  0xd0   :  { %v604_v14 = vpack.c.bf16 %v384_v9, %v383_v8  ;;  %v356_v15 = vmul.f32 %v828_v3, %v332_v10  ;;  %v315_v17 = vadd.f32 %v314_v12, %v265_v11 }
  0xd2   :  { %632 = vst [vmem:[%s895_s4 + $0x10] sm:$0xff] %v604_v14   ;;  %v376_v16 = vadd.f32 %v834_v7, %v356_v15  ;;  %v349_v23 = vmul.f32 %v828_v3, %v315_v17 }
  0xd4   :  { %v392_v19 = vmax.f32 %v376_v16, 0.0  ;;  %v285_v20 = vpop.f32.mrf.mxu2  ;;  %v369_v28 = vadd.f32 %v834_v7, %v349_v23 }
  0xd5   :  { %v334_v21 = vpop.f32.mrf.mxu3 }
  0xd6   :  { %v624_v22 = vpack.c.bf16 %v392_v19, %v391_v18  ;;  %v267_v24 = vpop.f32.mrf.mxu0  ;;  %v335_v26 = vadd.f32 %v334_v21, %v285_v20  ;;  %v385_v34 = vmax.f32 %v369_v28, 0.0 }
  0xd7   :  { %v316_v25 = vpop.f32.mrf.mxu1 }
  0xd8   :  { %636 = vst [vmem:[%s895_s4 + $0x30] sm:$0xff] %v624_v22   ;;  %v317_v27 = vadd.f32 %v316_v25, %v267_v24  ;;  %v357_v30 = vmul.f32 %v828_v3, %v335_v26 }
  0xda   :  { %v350_v29 = vmul.f32 %v828_v3, %v317_v27  ;;  %v377_v37 = vadd.f32 %v834_v7, %v357_v30 }
  0xdc   :  { %v370_v31 = vadd.f32 %v834_v7, %v350_v29  ;;  %v287_v32 = vpop.f32.mrf.mxu2  ;;  %v393_v41 = vmax.f32 %v377_v37, 0.0 }
  0xdd   :  { %v336_v33 = vpop.f32.mrf.mxu3 }
  0xde   :  { %v386_v35 = vmax.f32 %v370_v31, 0.0  ;;  %v337_v36 = vadd.f32 %v336_v33, %v287_v32 }
  0xe0   :  { %v609_v38 = vpack.c.bf16 %v386_v35, %v385_v34  ;;  %v358_v39 = vmul.f32 %v828_v3, %v337_v36 }
  0xe2   :  { %633 = vst [vmem:[%s895_s4 + $0x18] sm:$0xff] %v609_v38   ;;  %v378_v40 = vadd.f32 %v834_v7, %v358_v39 }
  0xe4   :  { %v394_v42 = vmax.f32 %v378_v40, 0.0 }
  0xe6   :  { %v629_v43 = vpack.c.bf16 %v394_v42, %v393_v41 }
  0xe8   :  { %637 = vst [vmem:[%s895_s4 + $0x38] sm:$0xff] %v629_v43  }

// kernel: net_forward.22
= control target key start
LH: loop header
LB: loop body
LE: loop exit
PB: predicated region body
PF: predicated region fallthrough
CT: control target
= control target key end

     0   :  { %s1740_s1 = inlined_call_operand.vmem [shape: bf16[1152,128], index: 1, kind: input, shape index: {}]   ;;  %s1741_s0 = inlined_call_operand.vmem [shape: bf16[32,1152], index: 0, kind: input, shape index: {}]   ;;  %s1742_s2 = inlined_call_operand.vmem [shape: f32[1,128], index: 2, kind: input, shape index: {}]   ;;  %s1743_s3 = inlined_call_operand.vmem [shape: f32[1,128], index: 3, kind: input, shape index: {}]   ;;  %s1744_s4 = inlined_call_operand.vmem [shape: bf16[32,128], index: 4, kind: output, shape index: {}]  }
   0x1   :  { %v1293_v0 = vld [vmem:[%s1740_s1 + $0x38] sm:$0xff]  ;;  %v1292_v4 = vld [vmem:[%s1740_s1 + $0x30] sm:$0xff]  ;;  %v1291_v8 = vld [vmem:[%s1740_s1 + $0x28] sm:$0xff] }
   0x2   :  { %v1301_v1 = vld [vmem:[%s1740_s1 + $0x78] sm:$0xff]  ;;  %705 = vmatpush.bf16.msra.mxu0 %v1293_v0  ;;  %v1300_v5 = vld [vmem:[%s1740_s1 + $0x70] sm:$0xff]  ;;  %v1299_v9 = vld [vmem:[%s1740_s1 + $0x68] sm:$0xff] }
   0x3   :  { %v1309_v2 = vld [vmem:[%s1740_s1 + $0xb8] sm:$0xff]  ;;  %724 = vmatpush.bf16.msra.mxu1 %v1301_v1  ;;  %v1308_v6 = vld [vmem:[%s1740_s1 + $0xb0] sm:$0xff]  ;;  %v1307_v10 = vld [vmem:[%s1740_s1 + $0xa8] sm:$0xff] }
   0x4   :  { %v1317_v3 = vld [vmem:[%s1740_s1 + $0xf8] sm:$0xff]  ;;  %743 = vmatpush.bf16.msra.mxu2 %v1309_v2  ;;  %v1316_v7 = vld [vmem:[%s1740_s1 + $0xf0] sm:$0xff]  ;;  %v1315_v11 = vld [vmem:[%s1740_s1 + $0xe8] sm:$0xff] }
   0x5   :  { %762 = vmatpush.bf16.msra.mxu3 %v1317_v3  ;;  %v1290_v12 = vld [vmem:[%s1740_s1 + $0x20] sm:$0xff]  ;;  %v1289_v16 = vld [vmem:[%s1740_s1 + $0x18] sm:$0xff]  ;;  %v1288_v20 = vld [vmem:[%s1740_s1 + $0x10] sm:$0xff] }
   0x6   :  { %706 = vmatpush.bf16.msra.mxu0 %v1292_v4  ;;  %v1298_v13 = vld [vmem:[%s1740_s1 + $0x60] sm:$0xff]  ;;  %v1297_v17 = vld [vmem:[%s1740_s1 + $0x58] sm:$0xff]  ;;  %v1296_v21 = vld [vmem:[%s1740_s1 + $0x50] sm:$0xff] }
   0x7   :  { %725 = vmatpush.bf16.msra.mxu1 %v1300_v5  ;;  %v1306_v14 = vld [vmem:[%s1740_s1 + $0xa0] sm:$0xff]  ;;  %v1305_v18 = vld [vmem:[%s1740_s1 + $0x98] sm:$0xff]  ;;  %v1304_v22 = vld [vmem:[%s1740_s1 + $0x90] sm:$0xff] }
   0x8   :  { %744 = vmatpush.bf16.msra.mxu2 %v1308_v6  ;;  %v1314_v15 = vld [vmem:[%s1740_s1 + $0xe0] sm:$0xff]  ;;  %v1313_v19 = vld [vmem:[%s1740_s1 + $0xd8] sm:$0xff]  ;;  %v1312_v23 = vld [vmem:[%s1740_s1 + $0xd0] sm:$0xff] }
   0x9   :  { %763 = vmatpush.bf16.msra.mxu3 %v1316_v7  ;;  %v1287_v24 = vld [vmem:[%s1740_s1 + $0x8] sm:$0xff]  ;;  %v1286_v28 = vld [vmem:[%s1740_s1] sm:$0xff]  ;;  %v920_v39 = vld [vmem:[%s1741_s0 + $0x2c] sm:$0xf0] }
   0xa   :  { %707 = vmatpush.bf16.msra.mxu0 %v1291_v8  ;;  %v1295_v25 = vld [vmem:[%s1740_s1 + $0x48] sm:$0xff]  ;;  %v1294_v29 = vld [vmem:[%s1740_s1 + $0x40] sm:$0xff]  ;;  %v1325_v40 = vld [vmem:[%s1740_s1 + $0x138] sm:$0xff] }
   0xb   :  { %726 = vmatpush.bf16.msra.mxu1 %v1299_v9  ;;  %v1303_v26 = vld [vmem:[%s1740_s1 + $0x88] sm:$0xff]  ;;  %v1302_v30 = vld [vmem:[%s1740_s1 + $0x80] sm:$0xff]  ;;  %v1333_v41 = vld [vmem:[%s1740_s1 + $0x178] sm:$0xff] }
   0xc   :  { %745 = vmatpush.bf16.msra.mxu2 %v1307_v10  ;;  %v1311_v27 = vld [vmem:[%s1740_s1 + $0xc8] sm:$0xff]  ;;  %v1310_v31 = vld [vmem:[%s1740_s1 + $0xc0] sm:$0xff]  ;;  %v1341_v46 = vld [vmem:[%s1740_s1 + $0x1b8] sm:$0xff] }
   0xd   :  { %764 = vmatpush.bf16.msra.mxu3 %v1315_v11  ;;  %v910_v32 = vld [vmem:[%s1741_s0] sm:$0xf]  ;;  %v1272_v33 = vld [vmem:[%s1741_s0 + $0x20] sm:$0xf0]  ;;  %v912_v35 = vld [vmem:[%s1741_s0 + $0x24] sm:$0xf0] }
   0xe   :  { %708 = vmatpush.bf16.msra.mxu0 %v1290_v12  ;;  %v1268_v34 = vld [vmem:[%s1741_s0 + $0x4] sm:$0xf]  ;;  %v918_v36 = vld [vmem:[%s1741_s0 + $0x8] sm:$0xf]  ;;  %v1273_v37 = vld [vmem:[%s1741_s0 + $0x28] sm:$0xf0]  ;;  %v911_v42 = vor.u32 %v1272_v33, %v910_v32 }
   0xf   :  { %727 = vmatpush.bf16.msra.mxu1 %v1298_v13  ;;  %v1269_v38 = vld [vmem:[%s1741_s0 + $0xc] sm:$0xf]  ;;  %v915_v43 = vor.u32 %v1268_v34, %v912_v35  ;;  %v919_v44 = vor.u32 %v1273_v37, %v918_v36  ;;  %v1349_v47 = vld [vmem:[%s1740_s1 + $0x1f8] sm:$0xff]  ;;  %v1324_v48 = vld [vmem:[%s1740_s1 + $0x130] sm:$0xff] }
  0x10   :  { %746 = vmatpush.bf16.msra.mxu2 %v1306_v14  ;;  %v923_v45 = vor.u32 %v1269_v38, %v920_v39  ;;  %v1332_v49 = vld [vmem:[%s1740_s1 + $0x170] sm:$0xff]  ;;  %v1323_v52 = vld [vmem:[%s1740_s1 + $0x128] sm:$0xff]  ;;  %v1322_v56 = vld [vmem:[%s1740_s1 + $0x120] sm:$0xff] }
  0x11   :  { %765 = vmatpush.bf16.msra.mxu3 %v1314_v15  ;;  %v1340_v50 = vld [vmem:[%s1740_s1 + $0x1b0] sm:$0xff]  ;;  %v1331_v53 = vld [vmem:[%s1740_s1 + $0x168] sm:$0xff]  ;;  %v1330_v57 = vld [vmem:[%s1740_s1 + $0x160] sm:$0xff] }
  0x12   :  { %709 = vmatpush.bf16.msra.mxu0 %v1289_v16  ;;  %v1348_v51 = vld [vmem:[%s1740_s1 + $0x1f0] sm:$0xff]  ;;  %v1339_v54 = vld [vmem:[%s1740_s1 + $0x1a8] sm:$0xff]  ;;  %v1338_v58 = vld [vmem:[%s1740_s1 + $0x1a0] sm:$0xff] }
  0x13   :  { %728 = vmatpush.bf16.msra.mxu1 %v1297_v17  ;;  %v1347_v55 = vld [vmem:[%s1740_s1 + $0x1e8] sm:$0xff]  ;;  %v1346_v59 = vld [vmem:[%s1740_s1 + $0x1e0] sm:$0xff]  ;;  %v948_v63 = vld [vmem:[%s1741_s0 + $0x6c] sm:$0xf0] }
  0x14   :  { %747 = vmatpush.bf16.msra.mxu2 %v1305_v18  ;;  %v946_v60 = vld [vmem:[%s1741_s0 + $0x48] sm:$0xf]  ;;  %v1281_v61 = vld [vmem:[%s1741_s0 + $0x68] sm:$0xf0]  ;;  %v954_v0 = vld [vmem:[%s1741_s0 + $0x50] sm:$0xf] }
  0x15   :  { %766 = vmatpush.bf16.msra.mxu3 %v1313_v19  ;;  %v1277_v62 = vld [vmem:[%s1741_s0 + $0x4c] sm:$0xf]  ;;  %v1282_v1 = vld [vmem:[%s1741_s0 + $0x70] sm:$0xf0]  ;;  %v956_v3 = vld [vmem:[%s1741_s0 + $0x74] sm:$0xf0]  ;;  %v947_v6 = vor.u32 %v1281_v61, %v946_v60 }
  0x16   :  { %710 = vmatpush.bf16.msra.mxu0 %v1288_v20  ;;  %v1278_v2 = vld [vmem:[%s1741_s0 + $0x54] sm:$0xf]  ;;  %v1321_v4 = vld [vmem:[%s1740_s1 + $0x118] sm:$0xff]  ;;  %v951_v7 = vor.u32 %v1277_v62, %v948_v63  ;;  %v955_v8 = vor.u32 %v1282_v1, %v954_v0  ;;  %v1319_v16 = vld [vmem:[%s1740_s1 + $0x108] sm:$0xff] }
  0x17   :  { %729 = vmatpush.bf16.msra.mxu1 %v1296_v21  ;;  %v1329_v5 = vld [vmem:[%s1740_s1 + $0x158] sm:$0xff]  ;;  %v959_v9 = vor.u32 %v1278_v2, %v956_v3  ;;  %v1320_v12 = vld [vmem:[%s1740_s1 + $0x110] sm:$0xff]  ;;  %v1327_v17 = vld [vmem:[%s1740_s1 + $0x148] sm:$0xff] }
  0x18   :  { %748 = vmatpush.bf16.msra.mxu2 %v1304_v22  ;;  %v1337_v10 = vld [vmem:[%s1740_s1 + $0x198] sm:$0xff]  ;;  %v1328_v13 = vld [vmem:[%s1740_s1 + $0x150] sm:$0xff]  ;;  %v1335_v18 = vld [vmem:[%s1740_s1 + $0x188] sm:$0xff] }
  0x19   :  { %767 = vmatpush.bf16.msra.mxu3 %v1312_v23  ;;  %v1345_v11 = vld [vmem:[%s1740_s1 + $0x1d8] sm:$0xff]  ;;  %v1336_v14 = vld [vmem:[%s1740_s1 + $0x190] sm:$0xff]  ;;  %v1343_v19 = vld [vmem:[%s1740_s1 + $0x1c8] sm:$0xff] }
  0x1a   :  { %711 = vmatpush.bf16.msra.mxu0 %v1287_v24  ;;  %v1344_v15 = vld [vmem:[%s1740_s1 + $0x1d0] sm:$0xff]  ;;  %v1318_v20 = vld [vmem:[%s1740_s1 + $0x100] sm:$0xff]  ;;  %v1355_v38 = vld [vmem:[%s1740_s1 + $0x228] sm:$0xff] }
  0x1b   :  { %730 = vmatpush.bf16.msra.mxu1 %v1295_v25  ;;  %v1326_v21 = vld [vmem:[%s1740_s1 + $0x140] sm:$0xff]  ;;  %v926_v24 = vld [vmem:[%s1741_s0 + $0x10] sm:$0xf]  ;;  %v1274_v25 = vld [vmem:[%s1741_s0 + $0x30] sm:$0xf0] }
  0x1c   :  { %749 = vmatpush.bf16.msra.mxu2 %v1303_v26  ;;  %v1334_v22 = vld [vmem:[%s1740_s1 + $0x180] sm:$0xff]  ;;  %v1357_v26 = vld [vmem:[%s1740_s1 + $0x238] sm:$0xff]  ;;  %v927_v33 = vor.u32 %v1274_v25, %v926_v24  ;;  %v1356_v37 = vld [vmem:[%s1740_s1 + $0x230] sm:$0xff] }
  0x1d   :  { %768 = vmatpush.bf16.msra.mxu3 %v1311_v27  ;;  %v1342_v23 = vld [vmem:[%s1740_s1 + $0x1c0] sm:$0xff]  ;;  %v1270_v27 = vld [vmem:[%s1741_s0 + $0x14] sm:$0xf] }
  0x1e   :  { %712 = vmatpush.bf16.msra.mxu0 %v1286_v28  ;;  %v928_v28 = vld [vmem:[%s1741_s0 + $0x34] sm:$0xf0]  ;;  %v936_v32 = vld [vmem:[%s1741_s0 + $0x3c] sm:$0xf0] }
  0x1f   :  { %731 = vmatpush.bf16.msra.mxu1 %v1294_v29  ;;  %v934_v29 = vld [vmem:[%s1741_s0 + $0x18] sm:$0xf]  ;;  %v931_v34 = vor.u32 %v1270_v27, %v928_v28  ;;  %v1354_v39 = vld [vmem:[%s1740_s1 + $0x220] sm:$0xff] }
  0x20   :  { %750 = vmatpush.bf16.msra.mxu2 %v1302_v30  ;;  %v1275_v30 = vld [vmem:[%s1741_s0 + $0x38] sm:$0xf0] }
  0x21   :  { %769 = vmatpush.bf16.msra.mxu3 %v1310_v31  ;;  %713 = vmatmul.bf16.vlgmr.msra.gmra.mxu0 %v911_v42  ;;  %v1271_v31 = vld [vmem:[%s1741_s0 + $0x1c] sm:$0xf]  ;;  %v935_v35 = vor.u32 %v1275_v30, %v934_v29 }
  0x22   :  { %781 = vmatpush.bf16.msrb.mxu0 %v1325_v40  ;;  %732 = vmatmul.bf16.vlgmr.msra.gmra.mxu1 %v915_v43  ;;  %v939_v36 = vor.u32 %v1271_v31, %v936_v32  ;;  %v962_v40 = vld [vmem:[%s1741_s0 + $0x58] sm:$0xf]  ;;  %v1279_v42 = vld [vmem:[%s1741_s0 + $0x5c] sm:$0xf]  ;;  %v964_v43 = vld [vmem:[%s1741_s0 + $0x7c] sm:$0xf0] }
  0x23   :  { %800 = vmatpush.bf16.msrb.mxu1 %v1333_v41  ;;  %751 = vmatmul.bf16.vlgmr.msra.gmra.mxu2 %v919_v44  ;;  %v1283_v41 = vld [vmem:[%s1741_s0 + $0x78] sm:$0xf0]  ;;  %v970_v44 = vld [vmem:[%s1741_s0 + $0x60] sm:$0xf] }
  0x24   :  { %770 = vmatmul.bf16.vlgmr.msra.gmra.mxu3 %v923_v45  ;;  %819 = vmatpush.bf16.msrb.mxu2 %v1341_v46  ;;  %v1284_v45 = vld [vmem:[%s1741_s0 + $0x80] sm:$0xf0] }
  0x25   :  { %838 = vmatpush.bf16.msrb.mxu3 %v1349_v47  ;;  %v1280_v46 = vld [vmem:[%s1741_s0 + $0x64] sm:$0xf]  ;;  %v972_v47 = vld [vmem:[%s1741_s0 + $0x84] sm:$0xf0] }
  0x26   :  { %782 = vmatpush.bf16.msrb.mxu0 %v1324_v48  ;;  %v1353_v48 = vld [vmem:[%s1740_s1 + $0x218] sm:$0xff] }
  0x27   :  { %801 = vmatpush.bf16.msrb.mxu1 %v1332_v49  ;;  %v963_v49 = vor.u32 %v1283_v41, %v962_v40 }
  0x28   :  { %820 = vmatpush.bf16.msrb.mxu2 %v1340_v50  ;;  %v967_v50 = vor.u32 %v1279_v42, %v964_v43 }
  0x29   :  { %839 = vmatpush.bf16.msrb.mxu3 %v1348_v51  ;;  %v971_v51 = vor.u32 %v1284_v45, %v970_v44 }
  0x2a   :  { %783 = vmatpush.bf16.msrb.mxu0 %v1323_v52  ;;  %v975_v52 = vor.u32 %v1280_v46, %v972_v47 }
  0x2b   :  { %802 = vmatpush.bf16.msrb.mxu1 %v1331_v53  ;;  %v1352_v53 = vld [vmem:[%s1740_s1 + $0x210] sm:$0xff] }
  0x2c   :  { %821 = vmatpush.bf16.msrb.mxu2 %v1339_v54  ;;  %v1351_v54 = vld [vmem:[%s1740_s1 + $0x208] sm:$0xff] }
  0x2d   :  { %840 = vmatpush.bf16.msrb.mxu3 %v1347_v55  ;;  %v1350_v55 = vld [vmem:[%s1740_s1 + $0x200] sm:$0xff] }
  0x2e   :  { %784 = vmatpush.bf16.msrb.mxu0 %v1322_v56  ;;  %v942_v56 = vld [vmem:[%s1741_s0 + $0x20] sm:$0xf] }
  0x2f   :  { %803 = vmatpush.bf16.msrb.mxu1 %v1330_v57  ;;  %v1276_v57 = vld [vmem:[%s1741_s0 + $0x40] sm:$0xf0] }
  0x30   :  { %822 = vmatpush.bf16.msrb.mxu2 %v1338_v58  ;;  %v978_v58 = vld [vmem:[%s1741_s0 + $0x68] sm:$0xf]  ;;  %v943_v60 = vor.u32 %v1276_v57, %v942_v56 }
  0x31   :  { %841 = vmatpush.bf16.msrb.mxu3 %v1346_v59  ;;  %718 = vmatmul.bf16.gmra.mxu0 %v947_v6  ;;  %v1285_v59 = vld [vmem:[%s1741_s0 + $0x88] sm:$0xf0] }
  0x32   :  { %785 = vmatpush.bf16.msrb.mxu0 %v1321_v4  ;;  %737 = vmatmul.bf16.gmra.mxu1 %v951_v7  ;;  %v979_v61 = vor.u32 %v1285_v59, %v978_v58  ;;  %v1377_v58 = vld [vmem:[%s1742_s2] ss:$0 sm:$0xff] }
  0x33   :  { %804 = vmatpush.bf16.msrb.mxu1 %v1329_v5  ;;  %756 = vmatmul.bf16.gmra.mxu2 %v955_v8 }
  0x34   :  { %775 = vmatmul.bf16.gmra.mxu3 %v959_v9  ;;  %823 = vmatpush.bf16.msrb.mxu2 %v1337_v10 }
  0x35   :  { %842 = vmatpush.bf16.msrb.mxu3 %v1345_v11 }
  0x36   :  { %786 = vmatpush.bf16.msrb.mxu0 %v1320_v12 }
  0x37   :  { %805 = vmatpush.bf16.msrb.mxu1 %v1328_v13 }
  0x38   :  { %824 = vmatpush.bf16.msrb.mxu2 %v1336_v14 }
  0x39   :  { %843 = vmatpush.bf16.msrb.mxu3 %v1344_v15 }
  0x3a   :  { %787 = vmatpush.bf16.msrb.mxu0 %v1319_v16 }
  0x3b   :  { %806 = vmatpush.bf16.msrb.mxu1 %v1327_v17 }
  0x3c   :  { %825 = vmatpush.bf16.msrb.mxu2 %v1335_v18 }
  0x3d   :  { %844 = vmatpush.bf16.msrb.mxu3 %v1343_v19 }
  0x3e   :  { %788 = vmatpush.bf16.msrb.mxu0 %v1318_v20 }
  0x3f   :  { %807 = vmatpush.bf16.msrb.mxu1 %v1326_v21 }
  0x40   :  { %826 = vmatpush.bf16.msrb.mxu2 %v1334_v22 }
  0x41   :  { %845 = vmatpush.bf16.msrb.mxu3 %v1342_v23  ;;  %789 = vmatmul.bf16.vlgmr.msrb.gmra.mxu0 %v927_v33 }
  0x42   :  { %857 = vmatpush.bf16.msra.mxu0 %v1357_v26  ;;  %808 = vmatmul.bf16.vlgmr.msrb.gmra.mxu1 %v931_v34 }
  0x43   :  { %1369 = vmatpush.bf16.msra.mxu1 %v1357_v26  ;;  %827 = vmatmul.bf16.vlgmr.msrb.gmra.mxu2 %v935_v35 }
  0x44   :  { %846 = vmatmul.bf16.vlgmr.msrb.gmra.mxu3 %v939_v36 }
  0x46   :  { %858 = vmatpush.bf16.msra.mxu0 %v1356_v37 }
  0x47   :  { %1370 = vmatpush.bf16.msra.mxu1 %v1356_v37 }
  0x4a   :  { %859 = vmatpush.bf16.msra.mxu0 %v1355_v38 }
  0x4b   :  { %1371 = vmatpush.bf16.msra.mxu1 %v1355_v38 }
  0x4e   :  { %860 = vmatpush.bf16.msra.mxu0 %v1354_v39 }
  0x4f   :  { %1372 = vmatpush.bf16.msra.mxu1 %v1354_v39 }
  0x51   :  { %794 = vmatmul.bf16.gmra.mxu0 %v963_v49 }
  0x52   :  { %861 = vmatpush.bf16.msra.mxu0 %v1353_v48  ;;  %813 = vmatmul.bf16.gmra.mxu1 %v967_v50 }
  0x53   :  { %1373 = vmatpush.bf16.msra.mxu1 %v1353_v48  ;;  %832 = vmatmul.bf16.gmra.mxu2 %v971_v51 }
  0x54   :  { %851 = vmatmul.bf16.gmra.mxu3 %v975_v52 }
  0x56   :  { %862 = vmatpush.bf16.msra.mxu0 %v1352_v53 }
  0x57   :  { %1374 = vmatpush.bf16.msra.mxu1 %v1352_v53 }
  0x5a   :  { %863 = vmatpush.bf16.msra.mxu0 %v1351_v54 }
  0x5b   :  { %1375 = vmatpush.bf16.msra.mxu1 %v1351_v54 }
  0x5e   :  { %864 = vmatpush.bf16.msra.mxu0 %v1350_v55 }
  0x5f   :  { %1376 = vmatpush.bf16.msra.mxu1 %v1350_v55 }
  0x61   :  { %865 = vmatmul.bf16.vlgmr.msra.gmra.mxu0 %v943_v60 }
  0x62   :  { %870 = vmatmul.bf16.vlgmr.msra.gmra.mxu1 %v979_v61 }
  0x9e   :  { %v714_v62 = vpop.f32.mrf.mxu0 }
  0x9f   :  { %v733_v63 = vpop.f32.mrf.mxu1 }
  0xa0   :  { %v734_v20 = vadd.f32 %v733_v63, %v714_v62 }
  0xa6   :  { %v752_v0 = vpop.f32.mrf.mxu2  ;;  %v716_v2 = vpop.f32.mrf.mxu0 }
  0xa7   :  { %v771_v1 = vpop.f32.mrf.mxu3  ;;  %v735_v3 = vpop.f32.mrf.mxu1  ;;  %v753_v25 = vadd.f32 %v752_v0, %v734_v20  ;;  %v1378_v0 = vld [vmem:[%s1743_s3] ss:$0 sm:$0xff] }
  0xa8   :  { %v736_v29 = vadd.f32 %v735_v3, %v716_v2 }
  0xa9   :  { %v772_v28 = vadd.f32 %v771_v1, %v753_v25 }
  0xae   :  { %v754_v4 = vpop.f32.mrf.mxu2  ;;  %v719_v6 = vpop.f32.mrf.mxu0 }
  0xaf   :  { %v773_v5 = vpop.f32.mrf.mxu3  ;;  %v738_v7 = vpop.f32.mrf.mxu1  ;;  %v755_v32 = vadd.f32 %v754_v4, %v736_v29 }
  0xb0   :  { %v739_v21 = vadd.f32 %v738_v7, %v719_v6 }
  0xb1   :  { %v774_v39 = vadd.f32 %v773_v5, %v755_v32 }
  0xb6   :  { %v757_v8 = vpop.f32.mrf.mxu2  ;;  %v721_v10 = vpop.f32.mrf.mxu0 }
  0xb7   :  { %v776_v9 = vpop.f32.mrf.mxu3  ;;  %v740_v11 = vpop.f32.mrf.mxu1  ;;  %v758_v26 = vadd.f32 %v757_v8, %v739_v21 }
  0xb8   :  { %v741_v31 = vadd.f32 %v740_v11, %v721_v10 }
  0xb9   :  { %v777_v30 = vadd.f32 %v776_v9, %v758_v26 }
  0xbe   :  { %v759_v12 = vpop.f32.mrf.mxu2  ;;  %v790_v14 = vpop.f32.mrf.mxu0 }
  0xbf   :  { %v778_v13 = vpop.f32.mrf.mxu3  ;;  %v809_v15 = vpop.f32.mrf.mxu1  ;;  %v760_v33 = vadd.f32 %v759_v12, %v741_v31  ;;  %v791_v34 = vadd.f32 %v790_v14, %v772_v28 }
  0xc1   :  { %v779_v40 = vadd.f32 %v778_v13, %v760_v33  ;;  %v810_v41 = vadd.f32 %v809_v15, %v791_v34 }
  0xc6   :  { %v828_v16 = vpop.f32.mrf.mxu2  ;;  %v792_v18 = vpop.f32.mrf.mxu0 }
  0xc7   :  { %v847_v17 = vpop.f32.mrf.mxu3  ;;  %v811_v19 = vpop.f32.mrf.mxu1  ;;  %v829_v44 = vadd.f32 %v828_v16, %v810_v41  ;;  %v793_v45 = vadd.f32 %v792_v18, %v774_v39 }
  0xc9   :  { %v848_v51 = vadd.f32 %v847_v17, %v829_v44  ;;  %v812_v52 = vadd.f32 %v811_v19, %v793_v45 }
  0xce   :  { %v830_v22 = vpop.f32.mrf.mxu2  ;;  %v795_v23 = vpop.f32.mrf.mxu0 }
  0xcf   :  { %v814_v24 = vpop.f32.mrf.mxu1  ;;  %v849_v27 = vpop.f32.mrf.mxu3  ;;  %v796_v35 = vadd.f32 %v795_v23, %v777_v30  ;;  %v831_v55 = vadd.f32 %v830_v22, %v812_v52 }
  0xd1   :  { %v815_v42 = vadd.f32 %v814_v24, %v796_v35  ;;  %v850_v61 = vadd.f32 %v849_v27, %v831_v55 }
  0xd6   :  { %v833_v36 = vpop.f32.mrf.mxu2  ;;  %v797_v37 = vpop.f32.mrf.mxu0 }
  0xd7   :  { %v816_v38 = vpop.f32.mrf.mxu1  ;;  %v852_v43 = vpop.f32.mrf.mxu3  ;;  %v834_v46 = vadd.f32 %v833_v36, %v815_v42  ;;  %v798_v47 = vadd.f32 %v797_v37, %v779_v40 }
  0xd9   :  { %v853_v53 = vadd.f32 %v852_v43, %v834_v46  ;;  %v817_v54 = vadd.f32 %v816_v38, %v798_v47 }
  0xde   :  { %v835_v48 = vpop.f32.mrf.mxu2  ;;  %v866_v49 = vpop.f32.mrf.mxu0 }
  0xdf   :  { %v871_v50 = vpop.f32.mrf.mxu1  ;;  %v836_v56 = vadd.f32 %v835_v48, %v817_v54  ;;  %v867_v57 = vadd.f32 %v866_v49, %v848_v51  ;;  %v854_v60 = vpop.f32.mrf.mxu3 }
  0xe0   :  { %v872_v59 = vadd.f32 %v871_v50, %v853_v53 }
  0xe1   :  { %v855_v62 = vadd.f32 %v854_v60, %v836_v56  ;;  %v880_v63 = vmul.f32 %v1377_v58, %v867_v57 }
  0xe2   :  { %v882_v1 = vmul.f32 %v1377_v58, %v872_v59 }
  0xe3   :  { %v888_v6 = vadd.f32 %v1378_v0, %v880_v63 }
  0xe4   :  { %v890_v7 = vadd.f32 %v1378_v0, %v882_v1 }
  0xe5   :  { %v892_v12 = vmax.f32 %v888_v6, 0.0 }
  0xe6   :  { %v868_v2 = vpop.f32.mrf.mxu0  ;;  %v894_v13 = vmax.f32 %v890_v7, 0.0 }
  0xe7   :  { %v873_v3 = vpop.f32.mrf.mxu1  ;;  %v869_v4 = vadd.f32 %v868_v2, %v850_v61 }
  0xe8   :  { %v874_v5 = vadd.f32 %v873_v3, %v855_v62 }
  0xe9   :  { %v881_v8 = vmul.f32 %v1377_v58, %v869_v4 }
  0xea   :  { %v883_v9 = vmul.f32 %v1377_v58, %v874_v5 }
  0xeb   :  { %v889_v10 = vadd.f32 %v1378_v0, %v881_v8 }
  0xec   :  { %v891_v11 = vadd.f32 %v1378_v0, %v883_v9 }
  0xed   :  { %v893_v14 = vmax.f32 %v889_v10, 0.0 }
  0xee   :  { %v895_v15 = vmax.f32 %v891_v11, 0.0 }
  0xef   :  { %v1361_v16 = vpack.c.bf16 %v893_v14, %v892_v12 }
  0xf0   :  { %v1366_v17 = vpack.c.bf16 %v895_v15, %v894_v13 }
  0xf1   :  { %1362 = vst [vmem:[%s1744_s4] sm:$0xff] %v1361_v16  }
  0xf2   :  { %1368 = vst [vmem:[%s1744_s4 + $0x8] sm:$0xff] %v1366_v17  }

// kernel: net_forward.23
= control target key start
LH: loop header
LB: loop body
LE: loop exit
PB: predicated region body
PF: predicated region fallthrough
CT: control target
= control target key end

     0   :  { %s1775_s1 = inlined_call_operand.vmem [shape: bf16[1152,128], index: 1, kind: input, shape index: {}]   ;;  %s1776_s0 = inlined_call_operand.vmem [shape: bf16[32,1152], index: 0, kind: input, shape index: {}]   ;;  %s1777_s2 = inlined_call_operand.vmem [shape: f32[1,128], index: 2, kind: input, shape index: {}]   ;;  %s1778_s3 = inlined_call_operand.vmem [shape: f32[1,128], index: 3, kind: input, shape index: {}]   ;;  %s1779_s4 = inlined_call_operand.vmem [shape: bf16[32,128], index: 4, kind: input, shape index: {}]   ;;  %s1780_s5 = inlined_call_operand.vmem [shape: bf16[32,128], index: 5, kind: output, shape index: {}]  }
   0x1   :  { %v1308_v0 = vld [vmem:[%s1775_s1 + $0x38] sm:$0xff]  ;;  %v1307_v4 = vld [vmem:[%s1775_s1 + $0x30] sm:$0xff]  ;;  %v1306_v8 = vld [vmem:[%s1775_s1 + $0x28] sm:$0xff] }
   0x2   :  { %v1316_v1 = vld [vmem:[%s1775_s1 + $0x78] sm:$0xff]  ;;  %708 = vmatpush.bf16.msra.mxu0 %v1308_v0  ;;  %v1315_v5 = vld [vmem:[%s1775_s1 + $0x70] sm:$0xff]  ;;  %v1314_v9 = vld [vmem:[%s1775_s1 + $0x68] sm:$0xff] }
   0x3   :  { %v1324_v2 = vld [vmem:[%s1775_s1 + $0xb8] sm:$0xff]  ;;  %727 = vmatpush.bf16.msra.mxu1 %v1316_v1  ;;  %v1323_v6 = vld [vmem:[%s1775_s1 + $0xb0] sm:$0xff]  ;;  %v1322_v10 = vld [vmem:[%s1775_s1 + $0xa8] sm:$0xff] }
   0x4   :  { %v1332_v3 = vld [vmem:[%s1775_s1 + $0xf8] sm:$0xff]  ;;  %746 = vmatpush.bf16.msra.mxu2 %v1324_v2  ;;  %v1331_v7 = vld [vmem:[%s1775_s1 + $0xf0] sm:$0xff]  ;;  %v1330_v11 = vld [vmem:[%s1775_s1 + $0xe8] sm:$0xff] }
   0x5   :  { %765 = vmatpush.bf16.msra.mxu3 %v1332_v3  ;;  %v1305_v12 = vld [vmem:[%s1775_s1 + $0x20] sm:$0xff]  ;;  %v1304_v16 = vld [vmem:[%s1775_s1 + $0x18] sm:$0xff]  ;;  %v1303_v20 = vld [vmem:[%s1775_s1 + $0x10] sm:$0xff] }
   0x6   :  { %709 = vmatpush.bf16.msra.mxu0 %v1307_v4  ;;  %v1313_v13 = vld [vmem:[%s1775_s1 + $0x60] sm:$0xff]  ;;  %v1312_v17 = vld [vmem:[%s1775_s1 + $0x58] sm:$0xff]  ;;  %v1311_v21 = vld [vmem:[%s1775_s1 + $0x50] sm:$0xff] }
   0x7   :  { %728 = vmatpush.bf16.msra.mxu1 %v1315_v5  ;;  %v1321_v14 = vld [vmem:[%s1775_s1 + $0xa0] sm:$0xff]  ;;  %v1320_v18 = vld [vmem:[%s1775_s1 + $0x98] sm:$0xff]  ;;  %v1319_v22 = vld [vmem:[%s1775_s1 + $0x90] sm:$0xff] }
   0x8   :  { %747 = vmatpush.bf16.msra.mxu2 %v1323_v6  ;;  %v1329_v15 = vld [vmem:[%s1775_s1 + $0xe0] sm:$0xff]  ;;  %v1328_v19 = vld [vmem:[%s1775_s1 + $0xd8] sm:$0xff]  ;;  %v1327_v23 = vld [vmem:[%s1775_s1 + $0xd0] sm:$0xff] }
   0x9   :  { %766 = vmatpush.bf16.msra.mxu3 %v1331_v7  ;;  %v1302_v24 = vld [vmem:[%s1775_s1 + $0x8] sm:$0xff]  ;;  %v1301_v28 = vld [vmem:[%s1775_s1] sm:$0xff]  ;;  %v935_v39 = vld [vmem:[%s1776_s0 + $0x2c] sm:$0xf0] }
   0xa   :  { %710 = vmatpush.bf16.msra.mxu0 %v1306_v8  ;;  %v1310_v25 = vld [vmem:[%s1775_s1 + $0x48] sm:$0xff]  ;;  %v1309_v29 = vld [vmem:[%s1775_s1 + $0x40] sm:$0xff]  ;;  %v1340_v40 = vld [vmem:[%s1775_s1 + $0x138] sm:$0xff] }
   0xb   :  { %729 = vmatpush.bf16.msra.mxu1 %v1314_v9  ;;  %v1318_v26 = vld [vmem:[%s1775_s1 + $0x88] sm:$0xff]  ;;  %v1317_v30 = vld [vmem:[%s1775_s1 + $0x80] sm:$0xff]  ;;  %v1348_v41 = vld [vmem:[%s1775_s1 + $0x178] sm:$0xff] }
   0xc   :  { %748 = vmatpush.bf16.msra.mxu2 %v1322_v10  ;;  %v1326_v27 = vld [vmem:[%s1775_s1 + $0xc8] sm:$0xff]  ;;  %v1325_v31 = vld [vmem:[%s1775_s1 + $0xc0] sm:$0xff]  ;;  %v1356_v46 = vld [vmem:[%s1775_s1 + $0x1b8] sm:$0xff] }
   0xd   :  { %767 = vmatpush.bf16.msra.mxu3 %v1330_v11  ;;  %v925_v32 = vld [vmem:[%s1776_s0] sm:$0xf]  ;;  %v1287_v33 = vld [vmem:[%s1776_s0 + $0x20] sm:$0xf0]  ;;  %v927_v35 = vld [vmem:[%s1776_s0 + $0x24] sm:$0xf0] }
   0xe   :  { %711 = vmatpush.bf16.msra.mxu0 %v1305_v12  ;;  %v1283_v34 = vld [vmem:[%s1776_s0 + $0x4] sm:$0xf]  ;;  %v933_v36 = vld [vmem:[%s1776_s0 + $0x8] sm:$0xf]  ;;  %v1288_v37 = vld [vmem:[%s1776_s0 + $0x28] sm:$0xf0]  ;;  %v926_v42 = vor.u32 %v1287_v33, %v925_v32 }
   0xf   :  { %730 = vmatpush.bf16.msra.mxu1 %v1313_v13  ;;  %v1284_v38 = vld [vmem:[%s1776_s0 + $0xc] sm:$0xf]  ;;  %v930_v43 = vor.u32 %v1283_v34, %v927_v35  ;;  %v934_v44 = vor.u32 %v1288_v37, %v933_v36  ;;  %v1364_v47 = vld [vmem:[%s1775_s1 + $0x1f8] sm:$0xff]  ;;  %v1339_v48 = vld [vmem:[%s1775_s1 + $0x130] sm:$0xff] }
  0x10   :  { %749 = vmatpush.bf16.msra.mxu2 %v1321_v14  ;;  %v938_v45 = vor.u32 %v1284_v38, %v935_v39  ;;  %v1347_v49 = vld [vmem:[%s1775_s1 + $0x170] sm:$0xff]  ;;  %v1338_v52 = vld [vmem:[%s1775_s1 + $0x128] sm:$0xff]  ;;  %v1337_v56 = vld [vmem:[%s1775_s1 + $0x120] sm:$0xff] }
  0x11   :  { %768 = vmatpush.bf16.msra.mxu3 %v1329_v15  ;;  %v1355_v50 = vld [vmem:[%s1775_s1 + $0x1b0] sm:$0xff]  ;;  %v1346_v53 = vld [vmem:[%s1775_s1 + $0x168] sm:$0xff]  ;;  %v1345_v57 = vld [vmem:[%s1775_s1 + $0x160] sm:$0xff] }
  0x12   :  { %712 = vmatpush.bf16.msra.mxu0 %v1304_v16  ;;  %v1363_v51 = vld [vmem:[%s1775_s1 + $0x1f0] sm:$0xff]  ;;  %v1354_v54 = vld [vmem:[%s1775_s1 + $0x1a8] sm:$0xff]  ;;  %v1353_v58 = vld [vmem:[%s1775_s1 + $0x1a0] sm:$0xff] }
  0x13   :  { %731 = vmatpush.bf16.msra.mxu1 %v1312_v17  ;;  %v1362_v55 = vld [vmem:[%s1775_s1 + $0x1e8] sm:$0xff]  ;;  %v1361_v59 = vld [vmem:[%s1775_s1 + $0x1e0] sm:$0xff]  ;;  %v963_v63 = vld [vmem:[%s1776_s0 + $0x6c] sm:$0xf0] }
  0x14   :  { %750 = vmatpush.bf16.msra.mxu2 %v1320_v18  ;;  %v961_v60 = vld [vmem:[%s1776_s0 + $0x48] sm:$0xf]  ;;  %v1296_v61 = vld [vmem:[%s1776_s0 + $0x68] sm:$0xf0]  ;;  %v969_v0 = vld [vmem:[%s1776_s0 + $0x50] sm:$0xf] }
  0x15   :  { %769 = vmatpush.bf16.msra.mxu3 %v1328_v19  ;;  %v1292_v62 = vld [vmem:[%s1776_s0 + $0x4c] sm:$0xf]  ;;  %v1297_v1 = vld [vmem:[%s1776_s0 + $0x70] sm:$0xf0]  ;;  %v971_v3 = vld [vmem:[%s1776_s0 + $0x74] sm:$0xf0]  ;;  %v962_v6 = vor.u32 %v1296_v61, %v961_v60 }
  0x16   :  { %713 = vmatpush.bf16.msra.mxu0 %v1303_v20  ;;  %v1293_v2 = vld [vmem:[%s1776_s0 + $0x54] sm:$0xf]  ;;  %v1336_v4 = vld [vmem:[%s1775_s1 + $0x118] sm:$0xff]  ;;  %v966_v7 = vor.u32 %v1292_v62, %v963_v63  ;;  %v970_v8 = vor.u32 %v1297_v1, %v969_v0  ;;  %v1334_v16 = vld [vmem:[%s1775_s1 + $0x108] sm:$0xff] }
  0x17   :  { %732 = vmatpush.bf16.msra.mxu1 %v1311_v21  ;;  %v1344_v5 = vld [vmem:[%s1775_s1 + $0x158] sm:$0xff]  ;;  %v974_v9 = vor.u32 %v1293_v2, %v971_v3  ;;  %v1335_v12 = vld [vmem:[%s1775_s1 + $0x110] sm:$0xff]  ;;  %v1342_v17 = vld [vmem:[%s1775_s1 + $0x148] sm:$0xff] }
  0x18   :  { %751 = vmatpush.bf16.msra.mxu2 %v1319_v22  ;;  %v1352_v10 = vld [vmem:[%s1775_s1 + $0x198] sm:$0xff]  ;;  %v1343_v13 = vld [vmem:[%s1775_s1 + $0x150] sm:$0xff]  ;;  %v1350_v18 = vld [vmem:[%s1775_s1 + $0x188] sm:$0xff] }
  0x19   :  { %770 = vmatpush.bf16.msra.mxu3 %v1327_v23  ;;  %v1360_v11 = vld [vmem:[%s1775_s1 + $0x1d8] sm:$0xff]  ;;  %v1351_v14 = vld [vmem:[%s1775_s1 + $0x190] sm:$0xff]  ;;  %v1358_v19 = vld [vmem:[%s1775_s1 + $0x1c8] sm:$0xff] }
  0x1a   :  { %714 = vmatpush.bf16.msra.mxu0 %v1302_v24  ;;  %v1359_v15 = vld [vmem:[%s1775_s1 + $0x1d0] sm:$0xff]  ;;  %v1333_v20 = vld [vmem:[%s1775_s1 + $0x100] sm:$0xff]  ;;  %v1370_v38 = vld [vmem:[%s1775_s1 + $0x228] sm:$0xff] }
  0x1b   :  { %733 = vmatpush.bf16.msra.mxu1 %v1310_v25  ;;  %v1341_v21 = vld [vmem:[%s1775_s1 + $0x140] sm:$0xff]  ;;  %v941_v24 = vld [vmem:[%s1776_s0 + $0x10] sm:$0xf]  ;;  %v1289_v25 = vld [vmem:[%s1776_s0 + $0x30] sm:$0xf0] }
  0x1c   :  { %752 = vmatpush.bf16.msra.mxu2 %v1318_v26  ;;  %v1349_v22 = vld [vmem:[%s1775_s1 + $0x180] sm:$0xff]  ;;  %v1372_v26 = vld [vmem:[%s1775_s1 + $0x238] sm:$0xff]  ;;  %v942_v33 = vor.u32 %v1289_v25, %v941_v24  ;;  %v1371_v37 = vld [vmem:[%s1775_s1 + $0x230] sm:$0xff] }
  0x1d   :  { %771 = vmatpush.bf16.msra.mxu3 %v1326_v27  ;;  %v1357_v23 = vld [vmem:[%s1775_s1 + $0x1c0] sm:$0xff]  ;;  %v1285_v27 = vld [vmem:[%s1776_s0 + $0x14] sm:$0xf] }
  0x1e   :  { %715 = vmatpush.bf16.msra.mxu0 %v1301_v28  ;;  %v943_v28 = vld [vmem:[%s1776_s0 + $0x34] sm:$0xf0]  ;;  %v951_v32 = vld [vmem:[%s1776_s0 + $0x3c] sm:$0xf0] }
  0x1f   :  { %734 = vmatpush.bf16.msra.mxu1 %v1309_v29  ;;  %v949_v29 = vld [vmem:[%s1776_s0 + $0x18] sm:$0xf]  ;;  %v946_v34 = vor.u32 %v1285_v27, %v943_v28  ;;  %v1369_v39 = vld [vmem:[%s1775_s1 + $0x220] sm:$0xff] }
  0x20   :  { %753 = vmatpush.bf16.msra.mxu2 %v1317_v30  ;;  %v1290_v30 = vld [vmem:[%s1776_s0 + $0x38] sm:$0xf0] }
  0x21   :  { %772 = vmatpush.bf16.msra.mxu3 %v1325_v31  ;;  %716 = vmatmul.bf16.vlgmr.msra.gmra.mxu0 %v926_v42  ;;  %v1286_v31 = vld [vmem:[%s1776_s0 + $0x1c] sm:$0xf]  ;;  %v950_v35 = vor.u32 %v1290_v30, %v949_v29 }
  0x22   :  { %784 = vmatpush.bf16.msrb.mxu0 %v1340_v40  ;;  %735 = vmatmul.bf16.vlgmr.msra.gmra.mxu1 %v930_v43  ;;  %v954_v36 = vor.u32 %v1286_v31, %v951_v32  ;;  %v977_v40 = vld [vmem:[%s1776_s0 + $0x58] sm:$0xf]  ;;  %v1294_v42 = vld [vmem:[%s1776_s0 + $0x5c] sm:$0xf]  ;;  %v979_v43 = vld [vmem:[%s1776_s0 + $0x7c] sm:$0xf0] }
  0x23   :  { %803 = vmatpush.bf16.msrb.mxu1 %v1348_v41  ;;  %754 = vmatmul.bf16.vlgmr.msra.gmra.mxu2 %v934_v44  ;;  %v1298_v41 = vld [vmem:[%s1776_s0 + $0x78] sm:$0xf0]  ;;  %v985_v44 = vld [vmem:[%s1776_s0 + $0x60] sm:$0xf] }
  0x24   :  { %773 = vmatmul.bf16.vlgmr.msra.gmra.mxu3 %v938_v45  ;;  %822 = vmatpush.bf16.msrb.mxu2 %v1356_v46  ;;  %v1299_v45 = vld [vmem:[%s1776_s0 + $0x80] sm:$0xf0] }
  0x25   :  { %841 = vmatpush.bf16.msrb.mxu3 %v1364_v47  ;;  %v1295_v46 = vld [vmem:[%s1776_s0 + $0x64] sm:$0xf]  ;;  %v987_v47 = vld [vmem:[%s1776_s0 + $0x84] sm:$0xf0] }
  0x26   :  { %785 = vmatpush.bf16.msrb.mxu0 %v1339_v48  ;;  %v1368_v48 = vld [vmem:[%s1775_s1 + $0x218] sm:$0xff] }
  0x27   :  { %804 = vmatpush.bf16.msrb.mxu1 %v1347_v49  ;;  %v978_v49 = vor.u32 %v1298_v41, %v977_v40 }
  0x28   :  { %823 = vmatpush.bf16.msrb.mxu2 %v1355_v50  ;;  %v982_v50 = vor.u32 %v1294_v42, %v979_v43 }
  0x29   :  { %842 = vmatpush.bf16.msrb.mxu3 %v1363_v51  ;;  %v986_v51 = vor.u32 %v1299_v45, %v985_v44 }
  0x2a   :  { %786 = vmatpush.bf16.msrb.mxu0 %v1338_v52  ;;  %v990_v52 = vor.u32 %v1295_v46, %v987_v47 }
  0x2b   :  { %805 = vmatpush.bf16.msrb.mxu1 %v1346_v53  ;;  %v1367_v53 = vld [vmem:[%s1775_s1 + $0x210] sm:$0xff] }
  0x2c   :  { %824 = vmatpush.bf16.msrb.mxu2 %v1354_v54  ;;  %v1366_v54 = vld [vmem:[%s1775_s1 + $0x208] sm:$0xff] }
  0x2d   :  { %843 = vmatpush.bf16.msrb.mxu3 %v1362_v55  ;;  %v1365_v55 = vld [vmem:[%s1775_s1 + $0x200] sm:$0xff] }
  0x2e   :  { %787 = vmatpush.bf16.msrb.mxu0 %v1337_v56  ;;  %v957_v56 = vld [vmem:[%s1776_s0 + $0x20] sm:$0xf] }
  0x2f   :  { %806 = vmatpush.bf16.msrb.mxu1 %v1345_v57  ;;  %v1291_v57 = vld [vmem:[%s1776_s0 + $0x40] sm:$0xf0] }
  0x30   :  { %825 = vmatpush.bf16.msrb.mxu2 %v1353_v58  ;;  %v993_v58 = vld [vmem:[%s1776_s0 + $0x68] sm:$0xf]  ;;  %v958_v60 = vor.u32 %v1291_v57, %v957_v56  ;;  %v1401_v56 = vld [vmem:[%s1777_s2] ss:$0 sm:$0xff] }
  0x31   :  { %844 = vmatpush.bf16.msrb.mxu3 %v1361_v59  ;;  %721 = vmatmul.bf16.gmra.mxu0 %v962_v6  ;;  %v1300_v59 = vld [vmem:[%s1776_s0 + $0x88] sm:$0xf0] }
  0x32   :  { %788 = vmatpush.bf16.msrb.mxu0 %v1336_v4  ;;  %740 = vmatmul.bf16.gmra.mxu1 %v966_v7  ;;  %v994_v61 = vor.u32 %v1300_v59, %v993_v58 }
  0x33   :  { %807 = vmatpush.bf16.msrb.mxu1 %v1344_v5  ;;  %759 = vmatmul.bf16.gmra.mxu2 %v970_v8 }
  0x34   :  { %778 = vmatmul.bf16.gmra.mxu3 %v974_v9  ;;  %826 = vmatpush.bf16.msrb.mxu2 %v1352_v10 }
  0x35   :  { %845 = vmatpush.bf16.msrb.mxu3 %v1360_v11 }
  0x36   :  { %789 = vmatpush.bf16.msrb.mxu0 %v1335_v12 }
  0x37   :  { %808 = vmatpush.bf16.msrb.mxu1 %v1343_v13 }
  0x38   :  { %827 = vmatpush.bf16.msrb.mxu2 %v1351_v14 }
  0x39   :  { %846 = vmatpush.bf16.msrb.mxu3 %v1359_v15 }
  0x3a   :  { %790 = vmatpush.bf16.msrb.mxu0 %v1334_v16 }
  0x3b   :  { %809 = vmatpush.bf16.msrb.mxu1 %v1342_v17 }
  0x3c   :  { %828 = vmatpush.bf16.msrb.mxu2 %v1350_v18 }
  0x3d   :  { %847 = vmatpush.bf16.msrb.mxu3 %v1358_v19 }
  0x3e   :  { %791 = vmatpush.bf16.msrb.mxu0 %v1333_v20 }
  0x3f   :  { %810 = vmatpush.bf16.msrb.mxu1 %v1341_v21 }
  0x40   :  { %829 = vmatpush.bf16.msrb.mxu2 %v1349_v22 }
  0x41   :  { %848 = vmatpush.bf16.msrb.mxu3 %v1357_v23  ;;  %792 = vmatmul.bf16.vlgmr.msrb.gmra.mxu0 %v942_v33 }
  0x42   :  { %860 = vmatpush.bf16.msra.mxu0 %v1372_v26  ;;  %811 = vmatmul.bf16.vlgmr.msrb.gmra.mxu1 %v946_v34 }
  0x43   :  { %1393 = vmatpush.bf16.msra.mxu1 %v1372_v26  ;;  %830 = vmatmul.bf16.vlgmr.msrb.gmra.mxu2 %v950_v35 }
  0x44   :  { %849 = vmatmul.bf16.vlgmr.msrb.gmra.mxu3 %v954_v36 }
  0x46   :  { %861 = vmatpush.bf16.msra.mxu0 %v1371_v37 }
  0x47   :  { %1394 = vmatpush.bf16.msra.mxu1 %v1371_v37 }
  0x4a   :  { %862 = vmatpush.bf16.msra.mxu0 %v1370_v38 }
  0x4b   :  { %1395 = vmatpush.bf16.msra.mxu1 %v1370_v38 }
  0x4e   :  { %863 = vmatpush.bf16.msra.mxu0 %v1369_v39 }
  0x4f   :  { %1396 = vmatpush.bf16.msra.mxu1 %v1369_v39 }
  0x51   :  { %797 = vmatmul.bf16.gmra.mxu0 %v978_v49 }
  0x52   :  { %864 = vmatpush.bf16.msra.mxu0 %v1368_v48  ;;  %816 = vmatmul.bf16.gmra.mxu1 %v982_v50 }
  0x53   :  { %1397 = vmatpush.bf16.msra.mxu1 %v1368_v48  ;;  %835 = vmatmul.bf16.gmra.mxu2 %v986_v51 }
  0x54   :  { %854 = vmatmul.bf16.gmra.mxu3 %v990_v52 }
  0x56   :  { %865 = vmatpush.bf16.msra.mxu0 %v1367_v53 }
  0x57   :  { %1398 = vmatpush.bf16.msra.mxu1 %v1367_v53 }
  0x5a   :  { %866 = vmatpush.bf16.msra.mxu0 %v1366_v54 }
  0x5b   :  { %1399 = vmatpush.bf16.msra.mxu1 %v1366_v54 }
  0x5e   :  { %867 = vmatpush.bf16.msra.mxu0 %v1365_v55 }
  0x5f   :  { %1400 = vmatpush.bf16.msra.mxu1 %v1365_v55 }
  0x61   :  { %868 = vmatmul.bf16.vlgmr.msra.gmra.mxu0 %v958_v60 }
  0x62   :  { %873 = vmatmul.bf16.vlgmr.msra.gmra.mxu1 %v994_v61  ;;  %v1402_v61 = vld [vmem:[%s1778_s3] ss:$0 sm:$0xff] }
  0x9e   :  { %v717_v62 = vpop.f32.mrf.mxu0 }
  0x9f   :  { %v736_v63 = vpop.f32.mrf.mxu1 }
  0xa0   :  { %v737_v20 = vadd.f32 %v736_v63, %v717_v62  ;;  %v1374_v62 = vld [vmem:[%s1779_s4] sm:$0xff]  }
  0xa6   :  { %v755_v0 = vpop.f32.mrf.mxu2  ;;  %v719_v2 = vpop.f32.mrf.mxu0 }
  0xa7   :  { %v774_v1 = vpop.f32.mrf.mxu3  ;;  %v738_v3 = vpop.f32.mrf.mxu1  ;;  %v756_v22 = vadd.f32 %v755_v0, %v737_v20  ;;  %v1391_v0 = vld [vmem:[%s1779_s4 + $0x8] sm:$0xff]  }
  0xa8   :  { %v739_v30 = vadd.f32 %v738_v3, %v719_v2 }
  0xa9   :  { %v775_v28 = vadd.f32 %v774_v1, %v756_v22 }
  0xae   :  { %v757_v4 = vpop.f32.mrf.mxu2  ;;  %v722_v6 = vpop.f32.mrf.mxu0 }
  0xaf   :  { %v776_v5 = vpop.f32.mrf.mxu3  ;;  %v741_v7 = vpop.f32.mrf.mxu1  ;;  %v758_v34 = vadd.f32 %v757_v4, %v739_v30  ;;  %v1375_v4 = vunpack.c.l.bf16 %v1374_v62 }
  0xb0   :  { %v742_v21 = vadd.f32 %v741_v7, %v722_v6 }
  0xb1   :  { %v777_v41 = vadd.f32 %v776_v5, %v758_v34  ;;  %v1379_v5 = vunpack.c.l.bf16 %v1391_v0 }
  0xb6   :  { %v760_v8 = vpop.f32.mrf.mxu2  ;;  %v724_v10 = vpop.f32.mrf.mxu0 }
  0xb7   :  { %v779_v9 = vpop.f32.mrf.mxu3  ;;  %v743_v11 = vpop.f32.mrf.mxu1  ;;  %v761_v23 = vadd.f32 %v760_v8, %v742_v21 }
  0xb8   :  { %v744_v31 = vadd.f32 %v743_v11, %v724_v10 }
  0xb9   :  { %v780_v29 = vadd.f32 %v779_v9, %v761_v23 }
  0xbe   :  { %v762_v12 = vpop.f32.mrf.mxu2  ;;  %v793_v14 = vpop.f32.mrf.mxu0 }
  0xbf   :  { %v781_v13 = vpop.f32.mrf.mxu3  ;;  %v812_v15 = vpop.f32.mrf.mxu1  ;;  %v794_v32 = vadd.f32 %v793_v14, %v775_v28  ;;  %v763_v35 = vadd.f32 %v762_v12, %v744_v31 }
  0xc1   :  { %v813_v39 = vadd.f32 %v812_v15, %v794_v32  ;;  %v782_v42 = vadd.f32 %v781_v13, %v763_v35  ;;  %v1376_v13 = vunpack.c.h.bf16 %v1374_v62  ;;  %v1380_v15 = vunpack.c.h.bf16 %v1391_v0 }
  0xc6   :  { %v831_v16 = vpop.f32.mrf.mxu2  ;;  %v795_v18 = vpop.f32.mrf.mxu0 }
  0xc7   :  { %v850_v17 = vpop.f32.mrf.mxu3  ;;  %v814_v19 = vpop.f32.mrf.mxu1  ;;  %v832_v43 = vadd.f32 %v831_v16, %v813_v39  ;;  %v796_v46 = vadd.f32 %v795_v18, %v777_v41 }
  0xc9   :  { %v851_v48 = vadd.f32 %v850_v17, %v832_v43  ;;  %v815_v53 = vadd.f32 %v814_v19, %v796_v46 }
  0xce   :  { %v833_v24 = vpop.f32.mrf.mxu2  ;;  %v798_v25 = vpop.f32.mrf.mxu0 }
  0xcf   :  { %v817_v26 = vpop.f32.mrf.mxu1  ;;  %v852_v27 = vpop.f32.mrf.mxu3  ;;  %v799_v33 = vadd.f32 %v798_v25, %v780_v29  ;;  %v834_v58 = vadd.f32 %v833_v24, %v815_v53 }
  0xd1   :  { %v818_v40 = vadd.f32 %v817_v26, %v799_v33  ;;  %v853_v2 = vadd.f32 %v852_v27, %v834_v58 }
  0xd6   :  { %v836_v36 = vpop.f32.mrf.mxu2  ;;  %v800_v37 = vpop.f32.mrf.mxu0 }
  0xd7   :  { %v819_v38 = vpop.f32.mrf.mxu1  ;;  %v837_v44 = vadd.f32 %v836_v36, %v818_v40  ;;  %v855_v45 = vpop.f32.mrf.mxu3  ;;  %v801_v47 = vadd.f32 %v800_v37, %v782_v42 }
  0xd9   :  { %v856_v49 = vadd.f32 %v855_v45, %v837_v44  ;;  %v820_v54 = vadd.f32 %v819_v38, %v801_v47 }
  0xde   :  { %v838_v50 = vpop.f32.mrf.mxu2  ;;  %v869_v51 = vpop.f32.mrf.mxu0 }
  0xdf   :  { %v874_v52 = vpop.f32.mrf.mxu1  ;;  %v870_v55 = vadd.f32 %v869_v51, %v851_v48  ;;  %v839_v59 = vadd.f32 %v838_v50, %v820_v54  ;;  %v857_v1 = vpop.f32.mrf.mxu3 }
  0xe0   :  { %v875_v57 = vadd.f32 %v874_v52, %v856_v49 }
  0xe1   :  { %v883_v60 = vmul.f32 %v1401_v56, %v870_v55  ;;  %v858_v3 = vadd.f32 %v857_v1, %v839_v59 }
  0xe2   :  { %v885_v63 = vmul.f32 %v1401_v56, %v875_v57 }
  0xe3   :  { %v891_v8 = vadd.f32 %v1402_v61, %v883_v60 }
  0xe4   :  { %v893_v9 = vadd.f32 %v1402_v61, %v885_v63 }
  0xe5   :  { %v903_v16 = vadd.f32 %v1375_v4, %v891_v8 }
  0xe6   :  { %v871_v6 = vpop.f32.mrf.mxu0  ;;  %v905_v17 = vadd.f32 %v1379_v5, %v893_v9 }
  0xe7   :  { %v876_v7 = vpop.f32.mrf.mxu1  ;;  %v872_v10 = vadd.f32 %v871_v6, %v853_v2  ;;  %v907_v22 = vmax.f32 %v903_v16, 0.0 }
  0xe8   :  { %v877_v11 = vadd.f32 %v876_v7, %v858_v3  ;;  %v909_v23 = vmax.f32 %v905_v17, 0.0 }
  0xe9   :  { %v884_v12 = vmul.f32 %v1401_v56, %v872_v10 }
  0xea   :  { %v886_v14 = vmul.f32 %v1401_v56, %v877_v11 }
  0xeb   :  { %v892_v18 = vadd.f32 %v1402_v61, %v884_v12 }
  0xec   :  { %v894_v19 = vadd.f32 %v1402_v61, %v886_v14 }
  0xed   :  { %v904_v20 = vadd.f32 %v1376_v13, %v892_v18 }
  0xee   :  { %v906_v21 = vadd.f32 %v1380_v15, %v894_v19 }
  0xef   :  { %v908_v24 = vmax.f32 %v904_v20, 0.0 }
  0xf0   :  { %v910_v25 = vmax.f32 %v906_v21, 0.0 }
  0xf1   :  { %v1384_v26 = vpack.c.bf16 %v908_v24, %v907_v22 }
  0xf2   :  { %v1389_v27 = vpack.c.bf16 %v910_v25, %v909_v23 }
  0xf3   :  { %1385 = vst [vmem:[%s1780_s5] sm:$0xff] %v1384_v26  }
  0xf4   :  { %1392 = vst [vmem:[%s1780_s5 + $0x8] sm:$0xff] %v1389_v27  }

// kernel: net_forward.26
= control target key start
LH: loop header
LB: loop body
LE: loop exit
PB: predicated region body
PF: predicated region fallthrough
CT: control target
= control target key end

     0   :  { %s1513_s1 = inlined_call_operand.vmem [shape: bf16[1152,128], index: 1, kind: input, shape index: {}]   ;;  %s1514_s0 = inlined_call_operand.vmem [shape: bf16[16,1152], index: 0, kind: input, shape index: {}]   ;;  %s1515_s2 = inlined_call_operand.vmem [shape: f32[1,128], index: 2, kind: input, shape index: {}]   ;;  %s1516_s3 = inlined_call_operand.vmem [shape: f32[1,128], index: 3, kind: input, shape index: {}]   ;;  %s1517_s4 = inlined_call_operand.vmem [shape: bf16[16,128], index: 4, kind: output, shape index: {}]  }
   0x1   :  { %v1137_v0 = vld [vmem:[%s1513_s1 + $0x38] sm:$0xff]  ;;  %v1136_v4 = vld [vmem:[%s1513_s1 + $0x30] sm:$0xff]  ;;  %v1135_v8 = vld [vmem:[%s1513_s1 + $0x28] sm:$0xff] }
   0x2   :  { %v1153_v1 = vld [vmem:[%s1513_s1 + $0xb8] sm:$0xff]  ;;  %649 = vmatpush.bf16.msra.mxu0 %v1137_v0  ;;  %v1152_v5 = vld [vmem:[%s1513_s1 + $0xb0] sm:$0xff]  ;;  %v1151_v9 = vld [vmem:[%s1513_s1 + $0xa8] sm:$0xff] }
   0x3   :  { %v1145_v2 = vld [vmem:[%s1513_s1 + $0x78] sm:$0xff]  ;;  %677 = vmatpush.bf16.msra.mxu2 %v1153_v1  ;;  %v1144_v6 = vld [vmem:[%s1513_s1 + $0x70] sm:$0xff]  ;;  %v1143_v10 = vld [vmem:[%s1513_s1 + $0x68] sm:$0xff] }
   0x4   :  { %v1161_v3 = vld [vmem:[%s1513_s1 + $0xf8] sm:$0xff]  ;;  %663 = vmatpush.bf16.msra.mxu1 %v1145_v2  ;;  %v1160_v7 = vld [vmem:[%s1513_s1 + $0xf0] sm:$0xff]  ;;  %v1159_v11 = vld [vmem:[%s1513_s1 + $0xe8] sm:$0xff] }
   0x5   :  { %691 = vmatpush.bf16.msra.mxu3 %v1161_v3  ;;  %v1134_v12 = vld [vmem:[%s1513_s1 + $0x20] sm:$0xff]  ;;  %v1133_v16 = vld [vmem:[%s1513_s1 + $0x18] sm:$0xff]  ;;  %v1132_v20 = vld [vmem:[%s1513_s1 + $0x10] sm:$0xff] }
   0x6   :  { %650 = vmatpush.bf16.msra.mxu0 %v1136_v4  ;;  %v1150_v13 = vld [vmem:[%s1513_s1 + $0xa0] sm:$0xff]  ;;  %v1149_v17 = vld [vmem:[%s1513_s1 + $0x98] sm:$0xff]  ;;  %v1148_v21 = vld [vmem:[%s1513_s1 + $0x90] sm:$0xff] }
   0x7   :  { %678 = vmatpush.bf16.msra.mxu2 %v1152_v5  ;;  %v1142_v14 = vld [vmem:[%s1513_s1 + $0x60] sm:$0xff]  ;;  %v1141_v18 = vld [vmem:[%s1513_s1 + $0x58] sm:$0xff]  ;;  %v1140_v22 = vld [vmem:[%s1513_s1 + $0x50] sm:$0xff] }
   0x8   :  { %664 = vmatpush.bf16.msra.mxu1 %v1144_v6  ;;  %v1158_v15 = vld [vmem:[%s1513_s1 + $0xe0] sm:$0xff]  ;;  %v1157_v19 = vld [vmem:[%s1513_s1 + $0xd8] sm:$0xff]  ;;  %v1156_v23 = vld [vmem:[%s1513_s1 + $0xd0] sm:$0xff] }
   0x9   :  { %692 = vmatpush.bf16.msra.mxu3 %v1160_v7  ;;  %v1131_v24 = vld [vmem:[%s1513_s1 + $0x8] sm:$0xff]  ;;  %v1130_v28 = vld [vmem:[%s1513_s1] sm:$0xff]  ;;  %v1169_v30 = vld [vmem:[%s1513_s1 + $0x138] sm:$0xff] }
   0xa   :  { %651 = vmatpush.bf16.msra.mxu0 %v1135_v8  ;;  %v1147_v25 = vld [vmem:[%s1513_s1 + $0x88] sm:$0xff]  ;;  %v1146_v29 = vld [vmem:[%s1513_s1 + $0x80] sm:$0xff]  ;;  %v1185_v31 = vld [vmem:[%s1513_s1 + $0x1b8] sm:$0xff] }
   0xb   :  { %679 = vmatpush.bf16.msra.mxu2 %v1151_v9  ;;  %v1139_v26 = vld [vmem:[%s1513_s1 + $0x48] sm:$0xff]  ;;  %v1138_v32 = vld [vmem:[%s1513_s1 + $0x40] sm:$0xff]  ;;  %v1177_v38 = vld [vmem:[%s1513_s1 + $0x178] sm:$0xff] }
   0xc   :  { %665 = vmatpush.bf16.msra.mxu1 %v1143_v10  ;;  %v1155_v27 = vld [vmem:[%s1513_s1 + $0xc8] sm:$0xff]  ;;  %v1154_v33 = vld [vmem:[%s1513_s1 + $0xc0] sm:$0xff]  ;;  %v1193_v39 = vld [vmem:[%s1513_s1 + $0x1f8] sm:$0xff] }
   0xd   :  { %693 = vmatpush.bf16.msra.mxu3 %v1159_v11  ;;  %v799_v34 = vld [vmem:[%s1514_s0] sm:$0xf]  ;;  %v1125_v35 = vld [vmem:[%s1514_s0 + $0x20] sm:$0xf0]  ;;  %v807_v36 = vld [vmem:[%s1514_s0 + $0x8] sm:$0xf] }
   0xe   :  { %652 = vmatpush.bf16.msra.mxu0 %v1134_v12  ;;  %v1126_v37 = vld [vmem:[%s1514_s0 + $0x28] sm:$0xf0]  ;;  %v1121_v40 = vld [vmem:[%s1514_s0 + $0x4] sm:$0xf]  ;;  %v801_v41 = vld [vmem:[%s1514_s0 + $0x24] sm:$0xf0]  ;;  %v800_v44 = vor.u32 %v1125_v35, %v799_v34 }
   0xf   :  { %680 = vmatpush.bf16.msra.mxu2 %v1150_v13  ;;  %v1122_v42 = vld [vmem:[%s1514_s0 + $0xc] sm:$0xf]  ;;  %v809_v43 = vld [vmem:[%s1514_s0 + $0x2c] sm:$0xf0]  ;;  %v808_v45 = vor.u32 %v1126_v37, %v807_v36  ;;  %v804_v48 = vor.u32 %v1121_v40, %v801_v41  ;;  %v1166_v56 = vld [vmem:[%s1513_s1 + $0x120] sm:$0xff] }
  0x10   :  { %666 = vmatpush.bf16.msra.mxu1 %v1142_v14  ;;  %v1168_v46 = vld [vmem:[%s1513_s1 + $0x130] sm:$0xff]  ;;  %v812_v49 = vor.u32 %v1122_v42, %v809_v43  ;;  %v1167_v52 = vld [vmem:[%s1513_s1 + $0x128] sm:$0xff]  ;;  %v1182_v57 = vld [vmem:[%s1513_s1 + $0x1a0] sm:$0xff] }
  0x11   :  { %694 = vmatpush.bf16.msra.mxu3 %v1158_v15  ;;  %v1184_v47 = vld [vmem:[%s1513_s1 + $0x1b0] sm:$0xff]  ;;  %v1183_v53 = vld [vmem:[%s1513_s1 + $0x1a8] sm:$0xff]  ;;  %v1174_v58 = vld [vmem:[%s1513_s1 + $0x160] sm:$0xff] }
  0x12   :  { %653 = vmatpush.bf16.msra.mxu0 %v1133_v16  ;;  %v1176_v50 = vld [vmem:[%s1513_s1 + $0x170] sm:$0xff]  ;;  %v1175_v54 = vld [vmem:[%s1513_s1 + $0x168] sm:$0xff]  ;;  %v1190_v59 = vld [vmem:[%s1513_s1 + $0x1e0] sm:$0xff] }
  0x13   :  { %681 = vmatpush.bf16.msra.mxu2 %v1149_v17  ;;  %v1192_v51 = vld [vmem:[%s1513_s1 + $0x1f0] sm:$0xff]  ;;  %v1191_v55 = vld [vmem:[%s1513_s1 + $0x1e8] sm:$0xff]  ;;  %v1165_v60 = vld [vmem:[%s1513_s1 + $0x118] sm:$0xff] }
  0x14   :  { %667 = vmatpush.bf16.msra.mxu1 %v1141_v18  ;;  %v1181_v61 = vld [vmem:[%s1513_s1 + $0x198] sm:$0xff]  ;;  %v1164_v0 = vld [vmem:[%s1513_s1 + $0x110] sm:$0xff]  ;;  %v1163_v4 = vld [vmem:[%s1513_s1 + $0x108] sm:$0xff] }
  0x15   :  { %695 = vmatpush.bf16.msra.mxu3 %v1157_v19  ;;  %v1173_v62 = vld [vmem:[%s1513_s1 + $0x158] sm:$0xff]  ;;  %v1180_v1 = vld [vmem:[%s1513_s1 + $0x190] sm:$0xff]  ;;  %v1179_v5 = vld [vmem:[%s1513_s1 + $0x188] sm:$0xff] }
  0x16   :  { %654 = vmatpush.bf16.msra.mxu0 %v1132_v20  ;;  %v1189_v63 = vld [vmem:[%s1513_s1 + $0x1d8] sm:$0xff]  ;;  %v1172_v2 = vld [vmem:[%s1513_s1 + $0x150] sm:$0xff]  ;;  %v1171_v6 = vld [vmem:[%s1513_s1 + $0x148] sm:$0xff] }
  0x17   :  { %682 = vmatpush.bf16.msra.mxu2 %v1148_v21  ;;  %v1188_v3 = vld [vmem:[%s1513_s1 + $0x1d0] sm:$0xff]  ;;  %v1187_v7 = vld [vmem:[%s1513_s1 + $0x1c8] sm:$0xff]  ;;  %v1162_v8 = vld [vmem:[%s1513_s1 + $0x100] sm:$0xff] }
  0x18   :  { %668 = vmatpush.bf16.msra.mxu1 %v1140_v22  ;;  %v1178_v9 = vld [vmem:[%s1513_s1 + $0x180] sm:$0xff]  ;;  %v1201_v10 = vld [vmem:[%s1513_s1 + $0x238] sm:$0xff]  ;;  %v815_v11 = vld [vmem:[%s1514_s0 + $0x10] sm:$0xf] }
  0x19   :  { %696 = vmatpush.bf16.msra.mxu3 %v1156_v23  ;;  %v1127_v12 = vld [vmem:[%s1514_s0 + $0x30] sm:$0xf0]  ;;  %v823_v13 = vld [vmem:[%s1514_s0 + $0x18] sm:$0xf]  ;;  %v1128_v14 = vld [vmem:[%s1514_s0 + $0x38] sm:$0xf0] }
  0x1a   :  { %655 = vmatpush.bf16.msra.mxu0 %v1131_v24  ;;  %v1170_v15 = vld [vmem:[%s1513_s1 + $0x140] sm:$0xff]  ;;  %v1123_v17 = vld [vmem:[%s1514_s0 + $0x14] sm:$0xf]  ;;  %v817_v18 = vld [vmem:[%s1514_s0 + $0x34] sm:$0xf0]  ;;  %v816_v21 = vor.u32 %v1127_v12, %v815_v11  ;;  %v824_v22 = vor.u32 %v1128_v14, %v823_v13 }
  0x1b   :  { %683 = vmatpush.bf16.msra.mxu2 %v1147_v25  ;;  %v1186_v16 = vld [vmem:[%s1513_s1 + $0x1c0] sm:$0xff]  ;;  %v1124_v19 = vld [vmem:[%s1514_s0 + $0x1c] sm:$0xf]  ;;  %v820_v23 = vor.u32 %v1123_v17, %v817_v18  ;;  %v1200_v25 = vld [vmem:[%s1513_s1 + $0x230] sm:$0xff] }
  0x1c   :  { %669 = vmatpush.bf16.msra.mxu1 %v1139_v26  ;;  %v825_v20 = vld [vmem:[%s1514_s0 + $0x3c] sm:$0xf0]  ;;  %v1199_v26 = vld [vmem:[%s1513_s1 + $0x228] sm:$0xff] }
  0x1d   :  { %697 = vmatpush.bf16.msra.mxu3 %v1155_v27  ;;  %v828_v24 = vor.u32 %v1124_v19, %v825_v20  ;;  %v1198_v27 = vld [vmem:[%s1513_s1 + $0x220] sm:$0xff] }
  0x1e   :  { %656 = vmatpush.bf16.msra.mxu0 %v1130_v28  ;;  %v1197_v28 = vld [vmem:[%s1513_s1 + $0x218] sm:$0xff] }
  0x1f   :  { %684 = vmatpush.bf16.msra.mxu2 %v1146_v29  ;;  %v1196_v29 = vld [vmem:[%s1513_s1 + $0x210] sm:$0xff] }
  0x20   :  { %670 = vmatpush.bf16.msra.mxu1 %v1138_v32  ;;  %v831_v32 = vld [vmem:[%s1514_s0 + $0x20] sm:$0xf] }
  0x21   :  { %698 = vmatpush.bf16.msra.mxu3 %v1154_v33  ;;  %657 = vmatmul.bf16.vlgmr.msra.gmra.mxu0 %v800_v44  ;;  %v1129_v33 = vld [vmem:[%s1514_s0 + $0x40] sm:$0xf0] }
  0x22   :  { %705 = vmatpush.bf16.msrb.mxu0 %v1169_v30  ;;  %685 = vmatmul.bf16.vlgmr.msra.gmra.mxu2 %v808_v45  ;;  %v1195_v30 = vld [vmem:[%s1513_s1 + $0x208] sm:$0xff]  ;;  %v832_v34 = vor.u32 %v1129_v33, %v831_v32 }
  0x23   :  { %733 = vmatpush.bf16.msrb.mxu2 %v1185_v31  ;;  %671 = vmatmul.bf16.vlgmr.msra.gmra.mxu1 %v804_v48  ;;  %v1194_v31 = vld [vmem:[%s1513_s1 + $0x200] sm:$0xff] }
  0x24   :  { %719 = vmatpush.bf16.msrb.mxu1 %v1177_v38  ;;  %699 = vmatmul.bf16.vlgmr.msra.gmra.mxu3 %v812_v49 }
  0x25   :  { %747 = vmatpush.bf16.msrb.mxu3 %v1193_v39 }
  0x26   :  { %706 = vmatpush.bf16.msrb.mxu0 %v1168_v46 }
  0x27   :  { %734 = vmatpush.bf16.msrb.mxu2 %v1184_v47 }
  0x28   :  { %720 = vmatpush.bf16.msrb.mxu1 %v1176_v50 }
  0x29   :  { %748 = vmatpush.bf16.msrb.mxu3 %v1192_v51 }
  0x2a   :  { %707 = vmatpush.bf16.msrb.mxu0 %v1167_v52 }
  0x2b   :  { %735 = vmatpush.bf16.msrb.mxu2 %v1183_v53 }
  0x2c   :  { %721 = vmatpush.bf16.msrb.mxu1 %v1175_v54 }
  0x2d   :  { %749 = vmatpush.bf16.msrb.mxu3 %v1191_v55 }
  0x2e   :  { %708 = vmatpush.bf16.msrb.mxu0 %v1166_v56 }
  0x2f   :  { %736 = vmatpush.bf16.msrb.mxu2 %v1182_v57 }
  0x30   :  { %722 = vmatpush.bf16.msrb.mxu1 %v1174_v58 }
  0x31   :  { %750 = vmatpush.bf16.msrb.mxu3 %v1190_v59 }
  0x32   :  { %709 = vmatpush.bf16.msrb.mxu0 %v1165_v60 }
  0x33   :  { %737 = vmatpush.bf16.msrb.mxu2 %v1181_v61 }
  0x34   :  { %723 = vmatpush.bf16.msrb.mxu1 %v1173_v62 }
  0x35   :  { %751 = vmatpush.bf16.msrb.mxu3 %v1189_v63 }
  0x36   :  { %710 = vmatpush.bf16.msrb.mxu0 %v1164_v0 }
  0x37   :  { %738 = vmatpush.bf16.msrb.mxu2 %v1180_v1  ;;  %v1207_v1 = vld [vmem:[%s1515_s2] ss:$0 sm:$0xff] }
  0x38   :  { %724 = vmatpush.bf16.msrb.mxu1 %v1172_v2 }
  0x39   :  { %752 = vmatpush.bf16.msrb.mxu3 %v1188_v3 }
  0x3a   :  { %711 = vmatpush.bf16.msrb.mxu0 %v1163_v4 }
  0x3b   :  { %739 = vmatpush.bf16.msrb.mxu2 %v1179_v5  ;;  %v1208_v5 = vld [vmem:[%s1516_s3] ss:$0 sm:$0xff] }
  0x3c   :  { %725 = vmatpush.bf16.msrb.mxu1 %v1171_v6 }
  0x3d   :  { %753 = vmatpush.bf16.msrb.mxu3 %v1187_v7 }
  0x3e   :  { %712 = vmatpush.bf16.msrb.mxu0 %v1162_v8 }
  0x3f   :  { %740 = vmatpush.bf16.msrb.mxu2 %v1178_v9 }
  0x40   :  { %726 = vmatpush.bf16.msrb.mxu1 %v1170_v15 }
  0x41   :  { %754 = vmatpush.bf16.msrb.mxu3 %v1186_v16  ;;  %713 = vmatmul.bf16.vlgmr.msrb.gmra.mxu0 %v816_v21 }
  0x42   :  { %761 = vmatpush.bf16.msra.mxu0 %v1201_v10  ;;  %741 = vmatmul.bf16.vlgmr.msrb.gmra.mxu2 %v824_v22 }
  0x43   :  { %727 = vmatmul.bf16.vlgmr.msrb.gmra.mxu1 %v820_v23 }
  0x44   :  { %755 = vmatmul.bf16.vlgmr.msrb.gmra.mxu3 %v828_v24 }
  0x46   :  { %762 = vmatpush.bf16.msra.mxu0 %v1200_v25 }
  0x4a   :  { %763 = vmatpush.bf16.msra.mxu0 %v1199_v26 }
  0x4e   :  { %764 = vmatpush.bf16.msra.mxu0 %v1198_v27 }
  0x52   :  { %765 = vmatpush.bf16.msra.mxu0 %v1197_v28 }
  0x56   :  { %766 = vmatpush.bf16.msra.mxu0 %v1196_v29 }
  0x5a   :  { %767 = vmatpush.bf16.msra.mxu0 %v1195_v30 }
  0x5e   :  { %768 = vmatpush.bf16.msra.mxu0 %v1194_v31 }
  0x61   :  { %769 = vmatmul.bf16.vlgmr.msra.gmra.mxu0 %v832_v34 }
  0x9e   :  { %v658_v35 = vpop.f32.mrf.mxu0 }
  0xa0   :  { %v672_v36 = vpop.f32.mrf.mxu1 }
  0xa1   :  { %v673_v40 = vadd.f32 %v672_v36, %v658_v35 }
  0xa5   :  { %v686_v37 = vpop.f32.mrf.mxu2 }
  0xa6   :  { %v660_v38 = vpop.f32.mrf.mxu0  ;;  %v687_v43 = vadd.f32 %v686_v37, %v673_v40 }
  0xa7   :  { %v700_v39 = vpop.f32.mrf.mxu3 }
  0xa8   :  { %v674_v41 = vpop.f32.mrf.mxu1  ;;  %v701_v46 = vadd.f32 %v700_v39, %v687_v43 }
  0xa9   :  { %v675_v47 = vadd.f32 %v674_v41, %v660_v38 }
  0xad   :  { %v688_v42 = vpop.f32.mrf.mxu2 }
  0xae   :  { %v689_v51 = vadd.f32 %v688_v42, %v675_v47 }
  0xaf   :  { %v702_v45 = vpop.f32.mrf.mxu3 }
  0xb0   :  { %v703_v55 = vadd.f32 %v702_v45, %v689_v51 }
  0xbe   :  { %v714_v44 = vpop.f32.mrf.mxu0 }
  0xbf   :  { %v715_v49 = vadd.f32 %v714_v44, %v701_v46 }
  0xc0   :  { %v728_v48 = vpop.f32.mrf.mxu1 }
  0xc1   :  { %v729_v53 = vadd.f32 %v728_v48, %v715_v49 }
  0xc5   :  { %v742_v50 = vpop.f32.mrf.mxu2 }
  0xc6   :  { %v716_v52 = vpop.f32.mrf.mxu0  ;;  %v743_v56 = vadd.f32 %v742_v50, %v729_v53 }
  0xc7   :  { %v756_v54 = vpop.f32.mrf.mxu3  ;;  %v717_v57 = vadd.f32 %v716_v52, %v703_v55 }
  0xc8   :  { %v730_v58 = vpop.f32.mrf.mxu1  ;;  %v757_v61 = vadd.f32 %v756_v54, %v743_v56 }
  0xc9   :  { %v731_v62 = vadd.f32 %v730_v58, %v717_v57 }
  0xcd   :  { %v744_v59 = vpop.f32.mrf.mxu2 }
  0xce   :  { %v745_v63 = vadd.f32 %v744_v59, %v731_v62 }
  0xcf   :  { %v758_v2 = vpop.f32.mrf.mxu3 }
  0xd0   :  { %v759_v3 = vadd.f32 %v758_v2, %v745_v63 }
  0xde   :  { %v770_v60 = vpop.f32.mrf.mxu0 }
  0xdf   :  { %v771_v0 = vadd.f32 %v770_v60, %v757_v61 }
  0xe1   :  { %v779_v4 = vmul.f32 %v1207_v1, %v771_v0 }
  0xe3   :  { %v785_v8 = vadd.f32 %v1208_v5, %v779_v4 }
  0xe5   :  { %v787_v11 = vmax.f32 %v785_v8, 0.0 }
  0xe6   :  { %v772_v6 = vpop.f32.mrf.mxu0 }
  0xe7   :  { %v773_v7 = vadd.f32 %v772_v6, %v759_v3 }
  0xe9   :  { %v780_v9 = vmul.f32 %v1207_v1, %v773_v7 }
  0xeb   :  { %v786_v10 = vadd.f32 %v1208_v5, %v780_v9 }
  0xed   :  { %v788_v12 = vmax.f32 %v786_v10, 0.0 }
  0xef   :  { %v1205_v13 = vpack.c.bf16 %v788_v12, %v787_v11 }
  0xf1   :  { %1206 = vst [vmem:[%s1517_s4] sm:$0xff] %v1205_v13  }

// kernel: net_forward.27
= control target key start
LH: loop header
LB: loop body
LE: loop exit
PB: predicated region body
PF: predicated region fallthrough
CT: control target
= control target key end

     0   :  { %s236_s1 = inlined_call_operand.vmem [shape: bf16[128,128], index: 1, kind: input, shape index: {}]   ;;  %s237_s2 = inlined_call_operand.vmem [shape: f32[1,128], index: 2, kind: input, shape index: {}]   ;;  %s238_s3 = inlined_call_operand.vmem [shape: f32[1,128], index: 3, kind: input, shape index: {}]   ;;  %s239_s0 = inlined_call_operand.vmem [shape: bf16[16,128], index: 0, kind: input, shape index: {}]   ;;  %s240_s4 = inlined_call_operand.vmem [shape: bf16[16,128], index: 4, kind: output, shape index: {}]  }
   0x1   :  { %v167_v0 = vld [vmem:[%s236_s1 + $0x38] sm:$0xff]  ;;  %v166_v1 = vld [vmem:[%s236_s1 + $0x30] sm:$0xff]  ;;  %v165_v2 = vld [vmem:[%s236_s1 + $0x28] sm:$0xff] }
   0x2   :  { %89 = vmatpush.bf16.msra.mxu0 %v167_v0  ;;  %v164_v3 = vld [vmem:[%s236_s1 + $0x20] sm:$0xff]  ;;  %v163_v4 = vld [vmem:[%s236_s1 + $0x18] sm:$0xff]  ;;  %v162_v5 = vld [vmem:[%s236_s1 + $0x10] sm:$0xff] }
   0x3   :  { %v161_v6 = vld [vmem:[%s236_s1 + $0x8] sm:$0xff]  ;;  %v160_v7 = vld [vmem:[%s236_s1] sm:$0xff] }
   0x4   :  { %v159_v8 = vld [vmem:[%s239_s0] sm:$0xff] }
   0x5   :  { %v173_v10 = vld [vmem:[%s237_s2] ss:$0 sm:$0xff] }
   0x6   :  { %90 = vmatpush.bf16.msra.mxu0 %v166_v1  ;;  %v174_v12 = vld [vmem:[%s238_s3] ss:$0 sm:$0xff] }
   0xa   :  { %91 = vmatpush.bf16.msra.mxu0 %v165_v2 }
   0xe   :  { %92 = vmatpush.bf16.msra.mxu0 %v164_v3 }
  0x12   :  { %93 = vmatpush.bf16.msra.mxu0 %v163_v4 }
  0x16   :  { %94 = vmatpush.bf16.msra.mxu0 %v162_v5 }
  0x1a   :  { %95 = vmatpush.bf16.msra.mxu0 %v161_v6 }
  0x1e   :  { %96 = vmatpush.bf16.msra.mxu0 %v160_v7 }
  0x21   :  { %97 = vmatmul.bf16.vlgmr.msra.gmra.mxu0 %v159_v8 }
  0x9e   :  { %v98_v9 = vpop.f32.mrf.mxu0 }
  0x9f   :  { %v107_v11 = vmul.f32 %v173_v10, %v98_v9 }
  0xa1   :  { %v113_v15 = vadd.f32 %v174_v12, %v107_v11 }
  0xa6   :  { %v100_v13 = vpop.f32.mrf.mxu0 }
  0xa7   :  { %v108_v14 = vmul.f32 %v173_v10, %v100_v13 }
  0xa9   :  { %v114_v16 = vadd.f32 %v174_v12, %v108_v14 }
  0xab   :  { %v171_v17 = vpack.c.bf16 %v114_v16, %v113_v15 }
  0xad   :  { %172 = vst [vmem:[%s240_s4] sm:$0xff] %v171_v17  }

// kernel: net_forward.28
= control target key start
LH: loop header
LB: loop body
LE: loop exit
PB: predicated region body
PF: predicated region fallthrough
CT: control target
= control target key end

     0   :  { %s1534_s1 = inlined_call_operand.vmem [shape: bf16[1152,128], index: 1, kind: input, shape index: {}]   ;;  %s1535_s0 = inlined_call_operand.vmem [shape: bf16[16,1152], index: 0, kind: input, shape index: {}]   ;;  %s1536_s2 = inlined_call_operand.vmem [shape: f32[1,128], index: 2, kind: input, shape index: {}]   ;;  %s1537_s3 = inlined_call_operand.vmem [shape: f32[1,128], index: 3, kind: input, shape index: {}]   ;;  %s1538_s4 = inlined_call_operand.vmem [shape: bf16[16,128], index: 4, kind: input, shape index: {}]   ;;  %s1539_s5 = inlined_call_operand.vmem [shape: bf16[16,128], index: 5, kind: output, shape index: {}]  }
   0x1   :  { %v1146_v0 = vld [vmem:[%s1534_s1 + $0x38] sm:$0xff]  ;;  %v1145_v4 = vld [vmem:[%s1534_s1 + $0x30] sm:$0xff]  ;;  %v1144_v8 = vld [vmem:[%s1534_s1 + $0x28] sm:$0xff] }
   0x2   :  { %v1162_v1 = vld [vmem:[%s1534_s1 + $0xb8] sm:$0xff]  ;;  %652 = vmatpush.bf16.msra.mxu0 %v1146_v0  ;;  %v1161_v5 = vld [vmem:[%s1534_s1 + $0xb0] sm:$0xff]  ;;  %v1160_v9 = vld [vmem:[%s1534_s1 + $0xa8] sm:$0xff] }
   0x3   :  { %v1154_v2 = vld [vmem:[%s1534_s1 + $0x78] sm:$0xff]  ;;  %680 = vmatpush.bf16.msra.mxu2 %v1162_v1  ;;  %v1153_v6 = vld [vmem:[%s1534_s1 + $0x70] sm:$0xff]  ;;  %v1152_v10 = vld [vmem:[%s1534_s1 + $0x68] sm:$0xff] }
   0x4   :  { %v1170_v3 = vld [vmem:[%s1534_s1 + $0xf8] sm:$0xff]  ;;  %666 = vmatpush.bf16.msra.mxu1 %v1154_v2  ;;  %v1169_v7 = vld [vmem:[%s1534_s1 + $0xf0] sm:$0xff]  ;;  %v1168_v11 = vld [vmem:[%s1534_s1 + $0xe8] sm:$0xff] }
   0x5   :  { %694 = vmatpush.bf16.msra.mxu3 %v1170_v3  ;;  %v1143_v12 = vld [vmem:[%s1534_s1 + $0x20] sm:$0xff]  ;;  %v1142_v16 = vld [vmem:[%s1534_s1 + $0x18] sm:$0xff]  ;;  %v1141_v20 = vld [vmem:[%s1534_s1 + $0x10] sm:$0xff] }
   0x6   :  { %653 = vmatpush.bf16.msra.mxu0 %v1145_v4  ;;  %v1159_v13 = vld [vmem:[%s1534_s1 + $0xa0] sm:$0xff]  ;;  %v1158_v17 = vld [vmem:[%s1534_s1 + $0x98] sm:$0xff]  ;;  %v1157_v21 = vld [vmem:[%s1534_s1 + $0x90] sm:$0xff] }
   0x7   :  { %681 = vmatpush.bf16.msra.mxu2 %v1161_v5  ;;  %v1151_v14 = vld [vmem:[%s1534_s1 + $0x60] sm:$0xff]  ;;  %v1150_v18 = vld [vmem:[%s1534_s1 + $0x58] sm:$0xff]  ;;  %v1149_v22 = vld [vmem:[%s1534_s1 + $0x50] sm:$0xff] }
   0x8   :  { %667 = vmatpush.bf16.msra.mxu1 %v1153_v6  ;;  %v1167_v15 = vld [vmem:[%s1534_s1 + $0xe0] sm:$0xff]  ;;  %v1166_v19 = vld [vmem:[%s1534_s1 + $0xd8] sm:$0xff]  ;;  %v1165_v23 = vld [vmem:[%s1534_s1 + $0xd0] sm:$0xff] }
   0x9   :  { %695 = vmatpush.bf16.msra.mxu3 %v1169_v7  ;;  %v1140_v24 = vld [vmem:[%s1534_s1 + $0x8] sm:$0xff]  ;;  %v1139_v28 = vld [vmem:[%s1534_s1] sm:$0xff]  ;;  %v1178_v30 = vld [vmem:[%s1534_s1 + $0x138] sm:$0xff] }
   0xa   :  { %654 = vmatpush.bf16.msra.mxu0 %v1144_v8  ;;  %v1156_v25 = vld [vmem:[%s1534_s1 + $0x88] sm:$0xff]  ;;  %v1155_v29 = vld [vmem:[%s1534_s1 + $0x80] sm:$0xff]  ;;  %v1194_v31 = vld [vmem:[%s1534_s1 + $0x1b8] sm:$0xff] }
   0xb   :  { %682 = vmatpush.bf16.msra.mxu2 %v1160_v9  ;;  %v1148_v26 = vld [vmem:[%s1534_s1 + $0x48] sm:$0xff]  ;;  %v1147_v32 = vld [vmem:[%s1534_s1 + $0x40] sm:$0xff]  ;;  %v1186_v38 = vld [vmem:[%s1534_s1 + $0x178] sm:$0xff] }
   0xc   :  { %668 = vmatpush.bf16.msra.mxu1 %v1152_v10  ;;  %v1164_v27 = vld [vmem:[%s1534_s1 + $0xc8] sm:$0xff]  ;;  %v1163_v33 = vld [vmem:[%s1534_s1 + $0xc0] sm:$0xff]  ;;  %v1202_v39 = vld [vmem:[%s1534_s1 + $0x1f8] sm:$0xff] }
   0xd   :  { %696 = vmatpush.bf16.msra.mxu3 %v1168_v11  ;;  %v808_v34 = vld [vmem:[%s1535_s0] sm:$0xf]  ;;  %v1134_v35 = vld [vmem:[%s1535_s0 + $0x20] sm:$0xf0]  ;;  %v816_v36 = vld [vmem:[%s1535_s0 + $0x8] sm:$0xf] }
   0xe   :  { %655 = vmatpush.bf16.msra.mxu0 %v1143_v12  ;;  %v1135_v37 = vld [vmem:[%s1535_s0 + $0x28] sm:$0xf0]  ;;  %v1130_v40 = vld [vmem:[%s1535_s0 + $0x4] sm:$0xf]  ;;  %v810_v41 = vld [vmem:[%s1535_s0 + $0x24] sm:$0xf0]  ;;  %v809_v44 = vor.u32 %v1134_v35, %v808_v34 }
   0xf   :  { %683 = vmatpush.bf16.msra.mxu2 %v1159_v13  ;;  %v1131_v42 = vld [vmem:[%s1535_s0 + $0xc] sm:$0xf]  ;;  %v818_v43 = vld [vmem:[%s1535_s0 + $0x2c] sm:$0xf0]  ;;  %v817_v45 = vor.u32 %v1135_v37, %v816_v36  ;;  %v813_v48 = vor.u32 %v1130_v40, %v810_v41  ;;  %v1175_v56 = vld [vmem:[%s1534_s1 + $0x120] sm:$0xff] }
  0x10   :  { %669 = vmatpush.bf16.msra.mxu1 %v1151_v14  ;;  %v1177_v46 = vld [vmem:[%s1534_s1 + $0x130] sm:$0xff]  ;;  %v821_v49 = vor.u32 %v1131_v42, %v818_v43  ;;  %v1176_v52 = vld [vmem:[%s1534_s1 + $0x128] sm:$0xff]  ;;  %v1191_v57 = vld [vmem:[%s1534_s1 + $0x1a0] sm:$0xff] }
  0x11   :  { %697 = vmatpush.bf16.msra.mxu3 %v1167_v15  ;;  %v1193_v47 = vld [vmem:[%s1534_s1 + $0x1b0] sm:$0xff]  ;;  %v1192_v53 = vld [vmem:[%s1534_s1 + $0x1a8] sm:$0xff]  ;;  %v1183_v58 = vld [vmem:[%s1534_s1 + $0x160] sm:$0xff] }
  0x12   :  { %656 = vmatpush.bf16.msra.mxu0 %v1142_v16  ;;  %v1185_v50 = vld [vmem:[%s1534_s1 + $0x170] sm:$0xff]  ;;  %v1184_v54 = vld [vmem:[%s1534_s1 + $0x168] sm:$0xff]  ;;  %v1199_v59 = vld [vmem:[%s1534_s1 + $0x1e0] sm:$0xff] }
  0x13   :  { %684 = vmatpush.bf16.msra.mxu2 %v1158_v17  ;;  %v1201_v51 = vld [vmem:[%s1534_s1 + $0x1f0] sm:$0xff]  ;;  %v1200_v55 = vld [vmem:[%s1534_s1 + $0x1e8] sm:$0xff]  ;;  %v1174_v60 = vld [vmem:[%s1534_s1 + $0x118] sm:$0xff] }
  0x14   :  { %670 = vmatpush.bf16.msra.mxu1 %v1150_v18  ;;  %v1190_v61 = vld [vmem:[%s1534_s1 + $0x198] sm:$0xff]  ;;  %v1173_v0 = vld [vmem:[%s1534_s1 + $0x110] sm:$0xff]  ;;  %v1172_v4 = vld [vmem:[%s1534_s1 + $0x108] sm:$0xff] }
  0x15   :  { %698 = vmatpush.bf16.msra.mxu3 %v1166_v19  ;;  %v1182_v62 = vld [vmem:[%s1534_s1 + $0x158] sm:$0xff]  ;;  %v1189_v1 = vld [vmem:[%s1534_s1 + $0x190] sm:$0xff]  ;;  %v1188_v5 = vld [vmem:[%s1534_s1 + $0x188] sm:$0xff] }
  0x16   :  { %657 = vmatpush.bf16.msra.mxu0 %v1141_v20  ;;  %v1198_v63 = vld [vmem:[%s1534_s1 + $0x1d8] sm:$0xff]  ;;  %v1181_v2 = vld [vmem:[%s1534_s1 + $0x150] sm:$0xff]  ;;  %v1180_v6 = vld [vmem:[%s1534_s1 + $0x148] sm:$0xff] }
  0x17   :  { %685 = vmatpush.bf16.msra.mxu2 %v1157_v21  ;;  %v1197_v3 = vld [vmem:[%s1534_s1 + $0x1d0] sm:$0xff]  ;;  %v1196_v7 = vld [vmem:[%s1534_s1 + $0x1c8] sm:$0xff]  ;;  %v1171_v8 = vld [vmem:[%s1534_s1 + $0x100] sm:$0xff] }
  0x18   :  { %671 = vmatpush.bf16.msra.mxu1 %v1149_v22  ;;  %v1187_v9 = vld [vmem:[%s1534_s1 + $0x180] sm:$0xff]  ;;  %v1210_v10 = vld [vmem:[%s1534_s1 + $0x238] sm:$0xff]  ;;  %v824_v11 = vld [vmem:[%s1535_s0 + $0x10] sm:$0xf] }
  0x19   :  { %699 = vmatpush.bf16.msra.mxu3 %v1165_v23  ;;  %v1136_v12 = vld [vmem:[%s1535_s0 + $0x30] sm:$0xf0]  ;;  %v832_v13 = vld [vmem:[%s1535_s0 + $0x18] sm:$0xf]  ;;  %v1137_v14 = vld [vmem:[%s1535_s0 + $0x38] sm:$0xf0] }
  0x1a   :  { %658 = vmatpush.bf16.msra.mxu0 %v1140_v24  ;;  %v1179_v15 = vld [vmem:[%s1534_s1 + $0x140] sm:$0xff]  ;;  %v1132_v17 = vld [vmem:[%s1535_s0 + $0x14] sm:$0xf]  ;;  %v826_v18 = vld [vmem:[%s1535_s0 + $0x34] sm:$0xf0]  ;;  %v825_v21 = vor.u32 %v1136_v12, %v824_v11  ;;  %v833_v22 = vor.u32 %v1137_v14, %v832_v13 }
  0x1b   :  { %686 = vmatpush.bf16.msra.mxu2 %v1156_v25  ;;  %v1195_v16 = vld [vmem:[%s1534_s1 + $0x1c0] sm:$0xff]  ;;  %v1133_v19 = vld [vmem:[%s1535_s0 + $0x1c] sm:$0xf]  ;;  %v829_v23 = vor.u32 %v1132_v17, %v826_v18  ;;  %v1209_v25 = vld [vmem:[%s1534_s1 + $0x230] sm:$0xff] }
  0x1c   :  { %672 = vmatpush.bf16.msra.mxu1 %v1148_v26  ;;  %v834_v20 = vld [vmem:[%s1535_s0 + $0x3c] sm:$0xf0]  ;;  %v1208_v26 = vld [vmem:[%s1534_s1 + $0x228] sm:$0xff] }
  0x1d   :  { %700 = vmatpush.bf16.msra.mxu3 %v1164_v27  ;;  %v837_v24 = vor.u32 %v1133_v19, %v834_v20  ;;  %v1207_v27 = vld [vmem:[%s1534_s1 + $0x220] sm:$0xff] }
  0x1e   :  { %659 = vmatpush.bf16.msra.mxu0 %v1139_v28  ;;  %v1206_v28 = vld [vmem:[%s1534_s1 + $0x218] sm:$0xff] }
  0x1f   :  { %687 = vmatpush.bf16.msra.mxu2 %v1155_v29  ;;  %v1205_v29 = vld [vmem:[%s1534_s1 + $0x210] sm:$0xff] }
  0x20   :  { %673 = vmatpush.bf16.msra.mxu1 %v1147_v32  ;;  %v840_v32 = vld [vmem:[%s1535_s0 + $0x20] sm:$0xf] }
  0x21   :  { %701 = vmatpush.bf16.msra.mxu3 %v1163_v33  ;;  %660 = vmatmul.bf16.vlgmr.msra.gmra.mxu0 %v809_v44  ;;  %v1138_v33 = vld [vmem:[%s1535_s0 + $0x40] sm:$0xf0] }
  0x22   :  { %708 = vmatpush.bf16.msrb.mxu0 %v1178_v30  ;;  %688 = vmatmul.bf16.vlgmr.msra.gmra.mxu2 %v817_v45  ;;  %v1204_v30 = vld [vmem:[%s1534_s1 + $0x208] sm:$0xff]  ;;  %v841_v34 = vor.u32 %v1138_v33, %v840_v32 }
  0x23   :  { %736 = vmatpush.bf16.msrb.mxu2 %v1194_v31  ;;  %674 = vmatmul.bf16.vlgmr.msra.gmra.mxu1 %v813_v48  ;;  %v1203_v31 = vld [vmem:[%s1534_s1 + $0x200] sm:$0xff] }
  0x24   :  { %722 = vmatpush.bf16.msrb.mxu1 %v1186_v38  ;;  %702 = vmatmul.bf16.vlgmr.msra.gmra.mxu3 %v821_v49 }
  0x25   :  { %750 = vmatpush.bf16.msrb.mxu3 %v1202_v39 }
  0x26   :  { %709 = vmatpush.bf16.msrb.mxu0 %v1177_v46 }
  0x27   :  { %737 = vmatpush.bf16.msrb.mxu2 %v1193_v47 }
  0x28   :  { %723 = vmatpush.bf16.msrb.mxu1 %v1185_v50 }
  0x29   :  { %751 = vmatpush.bf16.msrb.mxu3 %v1201_v51 }
  0x2a   :  { %710 = vmatpush.bf16.msrb.mxu0 %v1176_v52 }
  0x2b   :  { %738 = vmatpush.bf16.msrb.mxu2 %v1192_v53 }
  0x2c   :  { %724 = vmatpush.bf16.msrb.mxu1 %v1184_v54 }
  0x2d   :  { %752 = vmatpush.bf16.msrb.mxu3 %v1200_v55 }
  0x2e   :  { %711 = vmatpush.bf16.msrb.mxu0 %v1175_v56 }
  0x2f   :  { %739 = vmatpush.bf16.msrb.mxu2 %v1191_v57 }
  0x30   :  { %725 = vmatpush.bf16.msrb.mxu1 %v1183_v58 }
  0x31   :  { %753 = vmatpush.bf16.msrb.mxu3 %v1199_v59 }
  0x32   :  { %712 = vmatpush.bf16.msrb.mxu0 %v1174_v60 }
  0x33   :  { %740 = vmatpush.bf16.msrb.mxu2 %v1190_v61 }
  0x34   :  { %726 = vmatpush.bf16.msrb.mxu1 %v1182_v62 }
  0x35   :  { %754 = vmatpush.bf16.msrb.mxu3 %v1198_v63 }
  0x36   :  { %713 = vmatpush.bf16.msrb.mxu0 %v1173_v0  ;;  %v1220_v0 = vld [vmem:[%s1536_s2] ss:$0 sm:$0xff] }
  0x37   :  { %741 = vmatpush.bf16.msrb.mxu2 %v1189_v1 }
  0x38   :  { %727 = vmatpush.bf16.msrb.mxu1 %v1181_v2 }
  0x39   :  { %755 = vmatpush.bf16.msrb.mxu3 %v1197_v3 }
  0x3a   :  { %714 = vmatpush.bf16.msrb.mxu0 %v1172_v4  ;;  %v1221_v4 = vld [vmem:[%s1537_s3] ss:$0 sm:$0xff] }
  0x3b   :  { %742 = vmatpush.bf16.msrb.mxu2 %v1188_v5  ;;  %v1212_v5 = vld [vmem:[%s1538_s4] sm:$0xff]  }
  0x3c   :  { %728 = vmatpush.bf16.msrb.mxu1 %v1180_v6  ;;  %v1214_v12 = vunpack.c.h.bf16 %v1212_v5 }
  0x3d   :  { %756 = vmatpush.bf16.msrb.mxu3 %v1196_v7 }
  0x3e   :  { %715 = vmatpush.bf16.msrb.mxu0 %v1171_v8 }
  0x3f   :  { %743 = vmatpush.bf16.msrb.mxu2 %v1187_v9  ;;  %v1213_v9 = vunpack.c.l.bf16 %v1212_v5 }
  0x40   :  { %729 = vmatpush.bf16.msrb.mxu1 %v1179_v15 }
  0x41   :  { %757 = vmatpush.bf16.msrb.mxu3 %v1195_v16  ;;  %716 = vmatmul.bf16.vlgmr.msrb.gmra.mxu0 %v825_v21 }
  0x42   :  { %764 = vmatpush.bf16.msra.mxu0 %v1210_v10  ;;  %744 = vmatmul.bf16.vlgmr.msrb.gmra.mxu2 %v833_v22 }
  0x43   :  { %730 = vmatmul.bf16.vlgmr.msrb.gmra.mxu1 %v829_v23 }
  0x44   :  { %758 = vmatmul.bf16.vlgmr.msrb.gmra.mxu3 %v837_v24 }
  0x46   :  { %765 = vmatpush.bf16.msra.mxu0 %v1209_v25 }
  0x4a   :  { %766 = vmatpush.bf16.msra.mxu0 %v1208_v26 }
  0x4e   :  { %767 = vmatpush.bf16.msra.mxu0 %v1207_v27 }
  0x52   :  { %768 = vmatpush.bf16.msra.mxu0 %v1206_v28 }
  0x56   :  { %769 = vmatpush.bf16.msra.mxu0 %v1205_v29 }
  0x5a   :  { %770 = vmatpush.bf16.msra.mxu0 %v1204_v30 }
  0x5e   :  { %771 = vmatpush.bf16.msra.mxu0 %v1203_v31 }
  0x61   :  { %772 = vmatmul.bf16.vlgmr.msra.gmra.mxu0 %v841_v34 }
  0x9e   :  { %v661_v35 = vpop.f32.mrf.mxu0 }
  0xa0   :  { %v675_v36 = vpop.f32.mrf.mxu1 }
  0xa1   :  { %v676_v40 = vadd.f32 %v675_v36, %v661_v35 }
  0xa5   :  { %v689_v37 = vpop.f32.mrf.mxu2 }
  0xa6   :  { %v663_v38 = vpop.f32.mrf.mxu0  ;;  %v690_v42 = vadd.f32 %v689_v37, %v676_v40 }
  0xa7   :  { %v703_v39 = vpop.f32.mrf.mxu3 }
  0xa8   :  { %v677_v41 = vpop.f32.mrf.mxu1  ;;  %v704_v45 = vadd.f32 %v703_v39, %v690_v42 }
  0xa9   :  { %v678_v47 = vadd.f32 %v677_v41, %v663_v38 }
  0xad   :  { %v691_v43 = vpop.f32.mrf.mxu2 }
  0xae   :  { %v692_v51 = vadd.f32 %v691_v43, %v678_v47 }
  0xaf   :  { %v705_v46 = vpop.f32.mrf.mxu3 }
  0xb0   :  { %v706_v55 = vadd.f32 %v705_v46, %v692_v51 }
  0xbe   :  { %v717_v44 = vpop.f32.mrf.mxu0 }
  0xbf   :  { %v718_v48 = vadd.f32 %v717_v44, %v704_v45 }
  0xc0   :  { %v731_v49 = vpop.f32.mrf.mxu1 }
  0xc1   :  { %v732_v52 = vadd.f32 %v731_v49, %v718_v48 }
  0xc5   :  { %v745_v50 = vpop.f32.mrf.mxu2 }
  0xc6   :  { %v719_v53 = vpop.f32.mrf.mxu0  ;;  %v746_v56 = vadd.f32 %v745_v50, %v732_v52 }
  0xc7   :  { %v759_v54 = vpop.f32.mrf.mxu3  ;;  %v720_v57 = vadd.f32 %v719_v53, %v706_v55 }
  0xc8   :  { %v733_v58 = vpop.f32.mrf.mxu1  ;;  %v760_v59 = vadd.f32 %v759_v54, %v746_v56 }
  0xc9   :  { %v734_v62 = vadd.f32 %v733_v58, %v720_v57 }
  0xcd   :  { %v747_v60 = vpop.f32.mrf.mxu2 }
  0xce   :  { %v748_v1 = vadd.f32 %v747_v60, %v734_v62 }
  0xcf   :  { %v761_v2 = vpop.f32.mrf.mxu3 }
  0xd0   :  { %v762_v6 = vadd.f32 %v761_v2, %v748_v1 }
  0xde   :  { %v773_v61 = vpop.f32.mrf.mxu0 }
  0xdf   :  { %v774_v63 = vadd.f32 %v773_v61, %v760_v59 }
  0xe1   :  { %v782_v3 = vmul.f32 %v1220_v0, %v774_v63 }
  0xe3   :  { %v788_v8 = vadd.f32 %v1221_v4, %v782_v3 }
  0xe5   :  { %v794_v13 = vadd.f32 %v1213_v9, %v788_v8 }
  0xe6   :  { %v775_v7 = vpop.f32.mrf.mxu0 }
  0xe7   :  { %v776_v10 = vadd.f32 %v775_v7, %v762_v6  ;;  %v796_v16 = vmax.f32 %v794_v13, 0.0 }
  0xe9   :  { %v783_v11 = vmul.f32 %v1220_v0, %v776_v10 }
  0xeb   :  { %v789_v14 = vadd.f32 %v1221_v4, %v783_v11 }
  0xed   :  { %v795_v15 = vadd.f32 %v1214_v12, %v789_v14 }
  0xef   :  { %v797_v17 = vmax.f32 %v795_v15, 0.0 }
  0xf1   :  { %v1218_v18 = vpack.c.bf16 %v797_v17, %v796_v16 }
  0xf3   :  { %1219 = vst [vmem:[%s1539_s5] sm:$0xff] %v1218_v18  }

// kernel: net_forward.31
= control target key start
LH: loop header
LB: loop body
LE: loop exit
PB: predicated region body
PF: predicated region fallthrough
CT: control target
= control target key end

     0   :  { %s1378_s1 = inlined_call_operand.vmem [shape: bf16[896,128], index: 1, kind: input, shape index: {}]   ;;  %s1379_s0 = inlined_call_operand.vmem [shape: bf16[32,896], index: 0, kind: input, shape index: {}]   ;;  %s1380_s2 = inlined_call_operand.vmem [shape: f32[1,128], index: 2, kind: input, shape index: {}]   ;;  %s1381_s3 = inlined_call_operand.vmem [shape: f32[1,128], index: 3, kind: input, shape index: {}]   ;;  %s1382_s4 = inlined_call_operand.vmem [shape: bf16[32,128], index: 4, kind: output, shape index: {}]  }
   0x1   :  { %v1019_v0 = vld [vmem:[%s1378_s1 + $0x38] sm:$0xff]  ;;  %v1018_v4 = vld [vmem:[%s1378_s1 + $0x30] sm:$0xff]  ;;  %v1017_v8 = vld [vmem:[%s1378_s1 + $0x28] sm:$0xff] }
   0x2   :  { %v1027_v1 = vld [vmem:[%s1378_s1 + $0x78] sm:$0xff]  ;;  %553 = vmatpush.bf16.msra.mxu0 %v1019_v0  ;;  %v1026_v5 = vld [vmem:[%s1378_s1 + $0x70] sm:$0xff]  ;;  %v1025_v9 = vld [vmem:[%s1378_s1 + $0x68] sm:$0xff] }
   0x3   :  { %v1035_v2 = vld [vmem:[%s1378_s1 + $0xb8] sm:$0xff]  ;;  %572 = vmatpush.bf16.msra.mxu1 %v1027_v1  ;;  %v1034_v6 = vld [vmem:[%s1378_s1 + $0xb0] sm:$0xff]  ;;  %v1033_v10 = vld [vmem:[%s1378_s1 + $0xa8] sm:$0xff] }
   0x4   :  { %v1043_v3 = vld [vmem:[%s1378_s1 + $0xf8] sm:$0xff]  ;;  %591 = vmatpush.bf16.msra.mxu2 %v1035_v2  ;;  %v1042_v7 = vld [vmem:[%s1378_s1 + $0xf0] sm:$0xff]  ;;  %v1041_v11 = vld [vmem:[%s1378_s1 + $0xe8] sm:$0xff] }
   0x5   :  { %610 = vmatpush.bf16.msra.mxu3 %v1043_v3  ;;  %v1016_v12 = vld [vmem:[%s1378_s1 + $0x20] sm:$0xff]  ;;  %v1015_v16 = vld [vmem:[%s1378_s1 + $0x18] sm:$0xff]  ;;  %v1014_v20 = vld [vmem:[%s1378_s1 + $0x10] sm:$0xff] }
   0x6   :  { %554 = vmatpush.bf16.msra.mxu0 %v1018_v4  ;;  %v1024_v13 = vld [vmem:[%s1378_s1 + $0x60] sm:$0xff]  ;;  %v1023_v17 = vld [vmem:[%s1378_s1 + $0x58] sm:$0xff]  ;;  %v1022_v21 = vld [vmem:[%s1378_s1 + $0x50] sm:$0xff] }
   0x7   :  { %573 = vmatpush.bf16.msra.mxu1 %v1026_v5  ;;  %v1032_v14 = vld [vmem:[%s1378_s1 + $0xa0] sm:$0xff]  ;;  %v1031_v18 = vld [vmem:[%s1378_s1 + $0x98] sm:$0xff]  ;;  %v1030_v22 = vld [vmem:[%s1378_s1 + $0x90] sm:$0xff] }
   0x8   :  { %592 = vmatpush.bf16.msra.mxu2 %v1034_v6  ;;  %v1040_v15 = vld [vmem:[%s1378_s1 + $0xe0] sm:$0xff]  ;;  %v1039_v19 = vld [vmem:[%s1378_s1 + $0xd8] sm:$0xff]  ;;  %v1038_v23 = vld [vmem:[%s1378_s1 + $0xd0] sm:$0xff] }
   0x9   :  { %611 = vmatpush.bf16.msra.mxu3 %v1042_v7  ;;  %v1013_v24 = vld [vmem:[%s1378_s1 + $0x8] sm:$0xff]  ;;  %v1012_v28 = vld [vmem:[%s1378_s1] sm:$0xff]  ;;  %v1001_v33 = vld [vmem:[%s1379_s0 + $0x18] sm:$0xf0] }
   0xa   :  { %555 = vmatpush.bf16.msra.mxu0 %v1017_v8  ;;  %v1021_v25 = vld [vmem:[%s1378_s1 + $0x48] sm:$0xff]  ;;  %v1020_v29 = vld [vmem:[%s1378_s1 + $0x40] sm:$0xff]  ;;  %v1067_v40 = vld [vmem:[%s1378_s1 + $0x1b8] sm:$0xff] }
   0xb   :  { %574 = vmatpush.bf16.msra.mxu1 %v1025_v9  ;;  %v1029_v26 = vld [vmem:[%s1378_s1 + $0x88] sm:$0xff]  ;;  %v1028_v30 = vld [vmem:[%s1378_s1 + $0x80] sm:$0xff]  ;;  %v1051_v41 = vld [vmem:[%s1378_s1 + $0x138] sm:$0xff] }
   0xc   :  { %593 = vmatpush.bf16.msra.mxu2 %v1033_v10  ;;  %v1037_v27 = vld [vmem:[%s1378_s1 + $0xc8] sm:$0xff]  ;;  %v1036_v31 = vld [vmem:[%s1378_s1 + $0xc0] sm:$0xff]  ;;  %v1059_v46 = vld [vmem:[%s1378_s1 + $0x178] sm:$0xff] }
   0xd   :  { %612 = vmatpush.bf16.msra.mxu3 %v1041_v11  ;;  %v720_v32 = vld [vmem:[%s1379_s0] sm:$0xf]  ;;  %v998_v34 = vld [vmem:[%s1379_s0 + $0x4] sm:$0xf]  ;;  %v728_v36 = vld [vmem:[%s1379_s0 + $0x8] sm:$0xf] }
   0xe   :  { %556 = vmatpush.bf16.msra.mxu0 %v1016_v12  ;;  %v722_v35 = vld [vmem:[%s1379_s0 + $0x1c] sm:$0xf0]  ;;  %v1002_v37 = vld [vmem:[%s1379_s0 + $0x20] sm:$0xf0]  ;;  %v999_v38 = vld [vmem:[%s1379_s0 + $0xc] sm:$0xf]  ;;  %v721_v42 = vor.u32 %v1001_v33, %v720_v32 }
   0xf   :  { %575 = vmatpush.bf16.msra.mxu1 %v1024_v13  ;;  %v730_v39 = vld [vmem:[%s1379_s0 + $0x24] sm:$0xf0]  ;;  %v725_v43 = vor.u32 %v998_v34, %v722_v35  ;;  %v729_v44 = vor.u32 %v1002_v37, %v728_v36  ;;  %v1066_v47 = vld [vmem:[%s1378_s1 + $0x1b0] sm:$0xff]  ;;  %v1064_v53 = vld [vmem:[%s1378_s1 + $0x1a0] sm:$0xff] }
  0x10   :  { %594 = vmatpush.bf16.msra.mxu2 %v1032_v14  ;;  %v733_v45 = vor.u32 %v999_v38, %v730_v39  ;;  %v1050_v48 = vld [vmem:[%s1378_s1 + $0x130] sm:$0xff]  ;;  %v1065_v50 = vld [vmem:[%s1378_s1 + $0x1a8] sm:$0xff]  ;;  %v1048_v54 = vld [vmem:[%s1378_s1 + $0x120] sm:$0xff] }
  0x11   :  { %613 = vmatpush.bf16.msra.mxu3 %v1040_v15  ;;  %v1058_v49 = vld [vmem:[%s1378_s1 + $0x170] sm:$0xff]  ;;  %v1049_v51 = vld [vmem:[%s1378_s1 + $0x128] sm:$0xff]  ;;  %v1056_v55 = vld [vmem:[%s1378_s1 + $0x160] sm:$0xff] }
  0x12   :  { %557 = vmatpush.bf16.msra.mxu0 %v1015_v16  ;;  %v1057_v52 = vld [vmem:[%s1378_s1 + $0x168] sm:$0xff]  ;;  %v748_v56 = vld [vmem:[%s1379_s0 + $0x38] sm:$0xf]  ;;  %v1008_v57 = vld [vmem:[%s1379_s0 + $0x50] sm:$0xf0] }
  0x13   :  { %576 = vmatpush.bf16.msra.mxu1 %v1023_v17  ;;  %v1005_v58 = vld [vmem:[%s1379_s0 + $0x3c] sm:$0xf]  ;;  %v750_v59 = vld [vmem:[%s1379_s0 + $0x54] sm:$0xf0]  ;;  %v756_v60 = vld [vmem:[%s1379_s0 + $0x40] sm:$0xf]  ;;  %v749_v2 = vor.u32 %v1008_v57, %v748_v56 }
  0x14   :  { %595 = vmatpush.bf16.msra.mxu2 %v1031_v18  ;;  %v1009_v61 = vld [vmem:[%s1379_s0 + $0x58] sm:$0xf0]  ;;  %v1006_v62 = vld [vmem:[%s1379_s0 + $0x44] sm:$0xf]  ;;  %v758_v63 = vld [vmem:[%s1379_s0 + $0x5c] sm:$0xf0]  ;;  %v753_v3 = vor.u32 %v1005_v58, %v750_v59 }
  0x15   :  { %614 = vmatpush.bf16.msra.mxu3 %v1039_v19  ;;  %v1063_v0 = vld [vmem:[%s1378_s1 + $0x198] sm:$0xff]  ;;  %v757_v4 = vor.u32 %v1009_v61, %v756_v60  ;;  %v761_v5 = vor.u32 %v1006_v62, %v758_v63  ;;  %v1062_v7 = vld [vmem:[%s1378_s1 + $0x190] sm:$0xff]  ;;  %v1061_v10 = vld [vmem:[%s1378_s1 + $0x188] sm:$0xff] }
  0x16   :  { %558 = vmatpush.bf16.msra.mxu0 %v1014_v20  ;;  %v1047_v1 = vld [vmem:[%s1378_s1 + $0x118] sm:$0xff]  ;;  %v1046_v8 = vld [vmem:[%s1378_s1 + $0x110] sm:$0xff]  ;;  %v1045_v11 = vld [vmem:[%s1378_s1 + $0x108] sm:$0xff] }
  0x17   :  { %577 = vmatpush.bf16.msra.mxu1 %v1022_v21  ;;  %v1055_v6 = vld [vmem:[%s1378_s1 + $0x158] sm:$0xff]  ;;  %v1054_v9 = vld [vmem:[%s1378_s1 + $0x150] sm:$0xff]  ;;  %v1053_v12 = vld [vmem:[%s1378_s1 + $0x148] sm:$0xff] }
  0x18   :  { %596 = vmatpush.bf16.msra.mxu2 %v1030_v22  ;;  %v1060_v13 = vld [vmem:[%s1378_s1 + $0x180] sm:$0xff]  ;;  %v736_v16 = vld [vmem:[%s1379_s0 + $0x10] sm:$0xf]  ;;  %v1003_v17 = vld [vmem:[%s1379_s0 + $0x28] sm:$0xf0] }
  0x19   :  { %615 = vmatpush.bf16.msra.mxu3 %v1038_v23  ;;  %v1044_v14 = vld [vmem:[%s1378_s1 + $0x100] sm:$0xff]  ;;  %v764_v18 = vld [vmem:[%s1379_s0 + $0x48] sm:$0xf]  ;;  %v1000_v20 = vld [vmem:[%s1379_s0 + $0x14] sm:$0xf] }
  0x1a   :  { %559 = vmatpush.bf16.msra.mxu0 %v1013_v24  ;;  %v1052_v15 = vld [vmem:[%s1378_s1 + $0x140] sm:$0xff]  ;;  %v738_v21 = vld [vmem:[%s1379_s0 + $0x2c] sm:$0xf0]  ;;  %v744_v22 = vld [vmem:[%s1379_s0 + $0x18] sm:$0xf]  ;;  %v737_v24 = vor.u32 %v1003_v17, %v736_v16 }
  0x1b   :  { %578 = vmatpush.bf16.msra.mxu1 %v1021_v25  ;;  %v1010_v19 = vld [vmem:[%s1379_s0 + $0x60] sm:$0xf0]  ;;  %v1004_v23 = vld [vmem:[%s1379_s0 + $0x30] sm:$0xf0] }
  0x1c   :  { %597 = vmatpush.bf16.msra.mxu2 %v1029_v26  ;;  %v765_v25 = vor.u32 %v1010_v19, %v764_v18  ;;  %v741_v26 = vor.u32 %v1000_v20, %v738_v21 }
  0x1d   :  { %616 = vmatpush.bf16.msra.mxu3 %v1037_v27  ;;  %v745_v27 = vor.u32 %v1004_v23, %v744_v22 }
  0x1e   :  { %560 = vmatpush.bf16.msra.mxu0 %v1012_v28  ;;  %v1007_v28 = vld [vmem:[%s1379_s0 + $0x4c] sm:$0xf] }
  0x1f   :  { %579 = vmatpush.bf16.msra.mxu1 %v1020_v29  ;;  %v766_v29 = vld [vmem:[%s1379_s0 + $0x64] sm:$0xf0] }
  0x20   :  { %598 = vmatpush.bf16.msra.mxu2 %v1028_v30  ;;  %v772_v30 = vld [vmem:[%s1379_s0 + $0x50] sm:$0xf]  ;;  %v769_v32 = vor.u32 %v1007_v28, %v766_v29 }
  0x21   :  { %617 = vmatpush.bf16.msra.mxu3 %v1036_v31  ;;  %561 = vmatmul.bf16.vlgmr.msra.gmra.mxu0 %v721_v42  ;;  %v1011_v31 = vld [vmem:[%s1379_s0 + $0x68] sm:$0xf0] }
  0x22   :  { %629 = vmatpush.bf16.msrb.mxu0 %v1051_v41  ;;  %580 = vmatmul.bf16.vlgmr.msra.gmra.mxu1 %v725_v43  ;;  %v773_v33 = vor.u32 %v1011_v31, %v772_v30 }
  0x23   :  { %599 = vmatmul.bf16.vlgmr.msra.gmra.mxu2 %v729_v44  ;;  %648 = vmatpush.bf16.msrb.mxu1 %v1059_v46 }
  0x24   :  { %667 = vmatpush.bf16.msrb.mxu2 %v1067_v40  ;;  %618 = vmatmul.bf16.vlgmr.msra.gmra.mxu3 %v733_v45 }
  0x25   :  { %1079 = vmatpush.bf16.msrb.mxu3 %v1051_v41 }
  0x26   :  { %630 = vmatpush.bf16.msrb.mxu0 %v1050_v48 }
  0x27   :  { %649 = vmatpush.bf16.msrb.mxu1 %v1058_v49 }
  0x28   :  { %668 = vmatpush.bf16.msrb.mxu2 %v1066_v47 }
  0x29   :  { %1080 = vmatpush.bf16.msrb.mxu3 %v1050_v48 }
  0x2a   :  { %631 = vmatpush.bf16.msrb.mxu0 %v1049_v51 }
  0x2b   :  { %650 = vmatpush.bf16.msrb.mxu1 %v1057_v52 }
  0x2c   :  { %669 = vmatpush.bf16.msrb.mxu2 %v1065_v50 }
  0x2d   :  { %1081 = vmatpush.bf16.msrb.mxu3 %v1049_v51 }
  0x2e   :  { %632 = vmatpush.bf16.msrb.mxu0 %v1048_v54 }
  0x2f   :  { %651 = vmatpush.bf16.msrb.mxu1 %v1056_v55 }
  0x30   :  { %670 = vmatpush.bf16.msrb.mxu2 %v1064_v53 }
  0x31   :  { %1082 = vmatpush.bf16.msrb.mxu3 %v1048_v54  ;;  %566 = vmatmul.bf16.gmra.mxu0 %v749_v2 }
  0x32   :  { %633 = vmatpush.bf16.msrb.mxu0 %v1047_v1  ;;  %585 = vmatmul.bf16.gmra.mxu1 %v753_v3 }
  0x33   :  { %604 = vmatmul.bf16.gmra.mxu2 %v757_v4  ;;  %652 = vmatpush.bf16.msrb.mxu1 %v1055_v6  ;;  %v1088_v4 = vld [vmem:[%s1381_s3] ss:$0 sm:$0xff] }
  0x34   :  { %671 = vmatpush.bf16.msrb.mxu2 %v1063_v0  ;;  %623 = vmatmul.bf16.gmra.mxu3 %v761_v5  ;;  %v1087_v0 = vld [vmem:[%s1380_s2] ss:$0 sm:$0xff] }
  0x35   :  { %1083 = vmatpush.bf16.msrb.mxu3 %v1047_v1 }
  0x36   :  { %634 = vmatpush.bf16.msrb.mxu0 %v1046_v8 }
  0x37   :  { %653 = vmatpush.bf16.msrb.mxu1 %v1054_v9 }
  0x38   :  { %672 = vmatpush.bf16.msrb.mxu2 %v1062_v7 }
  0x39   :  { %1084 = vmatpush.bf16.msrb.mxu3 %v1046_v8 }
  0x3a   :  { %635 = vmatpush.bf16.msrb.mxu0 %v1045_v11 }
  0x3b   :  { %654 = vmatpush.bf16.msrb.mxu1 %v1053_v12 }
  0x3c   :  { %673 = vmatpush.bf16.msrb.mxu2 %v1061_v10 }
  0x3d   :  { %1085 = vmatpush.bf16.msrb.mxu3 %v1045_v11 }
  0x3e   :  { %636 = vmatpush.bf16.msrb.mxu0 %v1044_v14 }
  0x3f   :  { %655 = vmatpush.bf16.msrb.mxu1 %v1052_v15 }
  0x40   :  { %674 = vmatpush.bf16.msrb.mxu2 %v1060_v13 }
  0x41   :  { %1086 = vmatpush.bf16.msrb.mxu3 %v1044_v14  ;;  %637 = vmatmul.bf16.vlgmr.msrb.gmra.mxu0 %v737_v24 }
  0x42   :  { %656 = vmatmul.bf16.vlgmr.msrb.gmra.mxu1 %v741_v26 }
  0x43   :  { %675 = vmatmul.bf16.vlgmr.msrb.gmra.mxu2 %v745_v27 }
  0x44   :  { %642 = vmatmul.bf16.vlgmr.msrb.gmra.mxu3 %v765_v25 }
  0x52   :  { %661 = vmatmul.bf16.gmra.mxu1 %v769_v32 }
  0x53   :  { %680 = vmatmul.bf16.gmra.mxu2 %v773_v33 }
  0x9e   :  { %v562_v34 = vpop.f32.mrf.mxu0 }
  0x9f   :  { %v581_v35 = vpop.f32.mrf.mxu1 }
  0xa0   :  { %v582_v47 = vadd.f32 %v581_v35, %v562_v34 }
  0xa6   :  { %v600_v36 = vpop.f32.mrf.mxu2  ;;  %v564_v38 = vpop.f32.mrf.mxu0 }
  0xa7   :  { %v619_v37 = vpop.f32.mrf.mxu3  ;;  %v583_v39 = vpop.f32.mrf.mxu1  ;;  %v601_v49 = vadd.f32 %v600_v36, %v582_v47 }
  0xa8   :  { %v584_v54 = vadd.f32 %v583_v39, %v564_v38 }
  0xa9   :  { %v620_v53 = vadd.f32 %v619_v37, %v601_v49 }
  0xae   :  { %v602_v40 = vpop.f32.mrf.mxu2  ;;  %v567_v41 = vpop.f32.mrf.mxu0 }
  0xaf   :  { %v586_v42 = vpop.f32.mrf.mxu1  ;;  %v621_v43 = vpop.f32.mrf.mxu3  ;;  %v603_v55 = vadd.f32 %v602_v40, %v584_v54 }
  0xb0   :  { %v587_v2 = vadd.f32 %v586_v42, %v567_v41 }
  0xb1   :  { %v622_v60 = vadd.f32 %v621_v43, %v603_v55 }
  0xb6   :  { %v605_v44 = vpop.f32.mrf.mxu2  ;;  %v569_v45 = vpop.f32.mrf.mxu0 }
  0xb7   :  { %v588_v46 = vpop.f32.mrf.mxu1  ;;  %v624_v48 = vpop.f32.mrf.mxu3  ;;  %v606_v8 = vadd.f32 %v605_v44, %v587_v2 }
  0xb8   :  { %v589_v14 = vadd.f32 %v588_v46, %v569_v45 }
  0xb9   :  { %v625_v13 = vadd.f32 %v624_v48, %v606_v8 }
  0xbe   :  { %v607_v50 = vpop.f32.mrf.mxu2  ;;  %v638_v51 = vpop.f32.mrf.mxu0 }
  0xbf   :  { %v657_v52 = vpop.f32.mrf.mxu1  ;;  %v639_v56 = vadd.f32 %v638_v51, %v620_v53  ;;  %v626_v57 = vpop.f32.mrf.mxu3  ;;  %v608_v16 = vadd.f32 %v607_v50, %v589_v14 }
  0xc1   :  { %v658_v61 = vadd.f32 %v657_v52, %v639_v56  ;;  %v627_v24 = vadd.f32 %v626_v57, %v608_v16 }
  0xc6   :  { %v676_v58 = vpop.f32.mrf.mxu2  ;;  %v640_v59 = vpop.f32.mrf.mxu0 }
  0xc7   :  { %v659_v62 = vpop.f32.mrf.mxu1  ;;  %v677_v63 = vadd.f32 %v676_v58, %v658_v61  ;;  %v641_v1 = vadd.f32 %v640_v59, %v622_v60  ;;  %v643_v6 = vpop.f32.mrf.mxu3 }
  0xc8   :  { %v644_v17 = vadd.f32 %v643_v6, %v625_v13 }
  0xc9   :  { %v690_v3 = vmul.f32 %v1087_v0, %v677_v63  ;;  %v660_v5 = vadd.f32 %v659_v62, %v641_v1 }
  0xcb   :  { %v698_v11 = vadd.f32 %v1088_v4, %v690_v3 }
  0xcd   :  { %v702_v18 = vmax.f32 %v698_v11, 0.0 }
  0xce   :  { %v678_v7 = vpop.f32.mrf.mxu2 }
  0xcf   :  { %v679_v9 = vadd.f32 %v678_v7, %v660_v5  ;;  %v662_v10 = vpop.f32.mrf.mxu1  ;;  %v645_v23 = vpop.f32.mrf.mxu3 }
  0xd0   :  { %v663_v22 = vadd.f32 %v662_v10, %v644_v17  ;;  %v646_v27 = vadd.f32 %v645_v23, %v627_v24 }
  0xd1   :  { %v691_v12 = vmul.f32 %v1087_v0, %v679_v9 }
  0xd3   :  { %v699_v15 = vadd.f32 %v1088_v4, %v691_v12 }
  0xd5   :  { %v703_v19 = vmax.f32 %v699_v15, 0.0 }
  0xd6   :  { %v681_v20 = vpop.f32.mrf.mxu2 }
  0xd7   :  { %v1071_v21 = vpack.c.bf16 %v703_v19, %v702_v18  ;;  %v682_v25 = vadd.f32 %v681_v20, %v663_v22  ;;  %v664_v26 = vpop.f32.mrf.mxu1 }
  0xd8   :  { %v665_v29 = vadd.f32 %v664_v26, %v646_v27 }
  0xd9   :  { %1072 = vst [vmem:[%s1382_s4] sm:$0xff] %v1071_v21   ;;  %v692_v28 = vmul.f32 %v1087_v0, %v682_v25 }
  0xdb   :  { %v700_v32 = vadd.f32 %v1088_v4, %v692_v28 }
  0xdd   :  { %v704_v35 = vmax.f32 %v700_v32, 0.0 }
  0xde   :  { %v683_v30 = vpop.f32.mrf.mxu2 }
  0xdf   :  { %v684_v31 = vadd.f32 %v683_v30, %v665_v29 }
  0xe1   :  { %v693_v33 = vmul.f32 %v1087_v0, %v684_v31 }
  0xe3   :  { %v701_v34 = vadd.f32 %v1088_v4, %v693_v33 }
  0xe5   :  { %v705_v36 = vmax.f32 %v701_v34, 0.0 }
  0xe7   :  { %v1076_v37 = vpack.c.bf16 %v705_v36, %v704_v35 }
  0xe9   :  { %1078 = vst [vmem:[%s1382_s4 + $0x8] sm:$0xff] %v1076_v37  }

// kernel: net_forward.41
= control target key start
LH: loop header
LB: loop body
LE: loop exit
PB: predicated region body
PF: predicated region fallthrough
CT: control target
= control target key end

     0   :  { %vm48_vm0 = vcmask 1041408   ;;  %vm25_vm1 = vcmask 1043456   ;;  %s463_s0 = inlined_call_operand.vmem [shape: bf16[2,4,128], index: 0, kind: input, shape index: {}]   ;;  %s464_s1 = inlined_call_operand.vmem [shape: bf16[2,2,128], index: 1, kind: input, shape index: {}]   ;;  %s465_s2 = inlined_call_operand.vmem [shape: bf16[128,128], index: 2, kind: input, shape index: {}]   ;;  %s466_s3 = inlined_call_operand.vmem [shape: bf16[128,128], index: 3, kind: input, shape index: {}]   ;;  %s467_s4 = inlined_call_operand.vmem [shape: f32[1,128], index: 4, kind: input, shape index: {}]   ;;  %s468_s5 = inlined_call_operand.hbm [shape: f32[2,128], index: 5, kind: output, shape index: {}]  }
   0x1   :  { %v337_v0 = vld [vmem:[%s466_s3 + $0x38] sm:$0xff]  ;;  %v336_v2 = vld [vmem:[%s466_s3 + $0x30] sm:$0xff]  ;;  %v335_v4 = vld [vmem:[%s466_s3 + $0x28] sm:$0xff] }
   0x2   :  { %v329_v1 = vld [vmem:[%s465_s2 + $0x38] sm:$0xff]  ;;  %155 = vmatpush.bf16.msra.mxu0 %v337_v0  ;;  %v328_v3 = vld [vmem:[%s465_s2 + $0x30] sm:$0xff]  ;;  %v327_v5 = vld [vmem:[%s465_s2 + $0x28] sm:$0xff] }
   0x3   :  { %223 = vmatpush.bf16.msra.mxu1 %v329_v1  ;;  %v44_v6 = vld [vmem:[%s464_s1] sm:$0x1]  ;;  %v45_v7 = vld [vmem:[%s464_s1 + $0x1] sm:$0x1]  ;;  %v22_v11 = vld [vmem:[%s463_s0 + $0x2] sm:$0x3] }
   0x4   :  { %v46_v8 = vunpack.c.l.bf16 %v44_v6  ;;  %v47_v9 = vunpack.c.l.bf16 %v45_v7  ;;  %v21_v10 = vld [vmem:[%s463_s0] sm:$0x3]  ;;  %v24_v13 = vunpack.c.l.bf16 %v22_v11 }
   0x5   :  { %v23_v12 = vunpack.c.l.bf16 %v21_v10 }
   0x6   :  { %156 = vmatpush.bf16.msra.mxu0 %v336_v2 }
   0x7   :  { %224 = vmatpush.bf16.msra.mxu1 %v328_v3 }
   0x8   :  { %10 = vsyncpa [#allocation3], 0  ;;  %v49_v14 = vsel %vm48_vm0, %v46_v8, 0.0  ;;  %v56_v15 = vsel %vm48_vm0, %v47_v9, 0.0  ;;  %v26_v18 = vsel %vm25_vm1, %v23_v12, 0.0  ;;  %v33_v19 = vsel %vm25_vm1, %v24_v13, 0.0 }
   0x9   :  { %v50_v16 = vrot.slane %v49_v14, 4  ;;  %v57_v17 = vrot.slane %v56_v15, 4  ;;  %v334_v20 = vld [vmem:[%s466_s3 + $0x20] sm:$0xff]  ;;  %v27_v22 = vrot.slane %v26_v18, 4  ;;  %v34_v23 = vrot.slane %v33_v19, 4  ;;  %v333_v30 = vld [vmem:[%s466_s3 + $0x18] sm:$0xff] }
   0xa   :  { %157 = vmatpush.bf16.msra.mxu0 %v335_v4  ;;  %v326_v21 = vld [vmem:[%s465_s2 + $0x20] sm:$0xff]  ;;  %v325_v31 = vld [vmem:[%s465_s2 + $0x18] sm:$0xff]  ;;  %v332_v40 = vld [vmem:[%s466_s3 + $0x10] sm:$0xff]  ;;  %vm103_vm2 = vcmask 1041409   ;;  %s249_s10 = sshll.u32 %s468_s5, 4  ;;  %s250_s10 = int_to_ptr.hbm [resolvable:$true] %s249_s10 }
   0xb   :  { %225 = vmatpush.bf16.msra.mxu1 %v327_v5  ;;  %v51_v24 = vadd.f32 %v50_v16, %v49_v14  ;;  %v58_v25 = vadd.f32 %v57_v17, %v56_v15  ;;  %v28_v26 = vadd.f32 %v27_v22, %v26_v18  ;;  %v35_v27 = vadd.f32 %v34_v23, %v33_v19  ;;  %v324_v41 = vld [vmem:[%s465_s2 + $0x10] sm:$0xff]  ;;  %v331_v50 = vld [vmem:[%s466_s3 + $0x8] sm:$0xff]  ;;  %v330_v60 = vld [vmem:[%s466_s3] sm:$0xff]  ;;  %s366_s3 = smov [#allocation2]  }
   0xc   :  { %v323_v51 = vld [vmem:[%s465_s2 + $0x8] sm:$0xff]  ;;  %v322_v61 = vld [vmem:[%s465_s2] sm:$0xff]  ;;  %s247_s8 = sshll.u32 %s366_s3, 4  ;;  %s248_s8 = int_to_ptr.vmem [resolvable:$true] %s247_s8 }
   0xd   :  { %v52_v28 = vrot.slane %v51_v24, 2  ;;  %v59_v29 = vrot.slane %v58_v25, 2  ;;  %v29_v32 = vrot.slane %v28_v26, 2  ;;  %v36_v33 = vrot.slane %v35_v27, 2  ;;  %v339_v4 = vld [vmem:[%s467_s4] ss:$0 sm:$0xff] }
   0xe   :  { %158 = vmatpush.bf16.msra.mxu0 %v334_v20 }
   0xf   :  { %226 = vmatpush.bf16.msra.mxu1 %v326_v21  ;;  %v53_v34 = vadd.f32 %v52_v28, %v51_v24  ;;  %v60_v35 = vadd.f32 %v59_v29, %v58_v25  ;;  %v30_v36 = vadd.f32 %v29_v32, %v28_v26  ;;  %v37_v37 = vadd.f32 %v36_v33, %v35_v27 }
  0x11   :  { %v54_v38 = vrot.slane %v53_v34, 1  ;;  %v61_v39 = vrot.slane %v60_v35, 1  ;;  %v31_v42 = vrot.slane %v30_v36, 1  ;;  %v38_v43 = vrot.slane %v37_v37, 1 }
  0x12   :  { %159 = vmatpush.bf16.msra.mxu0 %v333_v30 }
  0x13   :  { %227 = vmatpush.bf16.msra.mxu1 %v325_v31  ;;  %v55_v44 = vadd.f32 %v54_v38, %v53_v34  ;;  %v62_v45 = vadd.f32 %v61_v39, %v60_v35  ;;  %v32_v46 = vadd.f32 %v31_v42, %v30_v36  ;;  %v39_v47 = vadd.f32 %v38_v43, %v37_v37 }
  0x15   :  { %v63_v48 = vmul.f32 0.5, %v55_v44  ;;  %v64_v49 = vmul.f32 0.5, %v62_v45  ;;  %v40_v52 = vmul.f32 0.25, %v32_v46  ;;  %v41_v53 = vmul.f32 0.25, %v39_v47 }
  0x16   :  { %160 = vmatpush.bf16.msra.mxu0 %v332_v40 }
  0x17   :  { %228 = vmatpush.bf16.msra.mxu1 %v324_v41  ;;  %v65_v54 = vpack.c.bf16 %v63_v48, %v63_v48  ;;  %v66_v55 = vpack.c.bf16 %v64_v49, %v64_v49  ;;  %v42_v56 = vpack.c.bf16 %v40_v52, %v40_v52  ;;  %v43_v57 = vpack.c.bf16 %v41_v53, %v41_v53 }
  0x19   :  { %v101_v58 = vunpack.c.l.b16 %v65_v54  ;;  %v102_v59 = vunpack.c.l.b16 %v66_v55  ;;  %v170_v62 = vunpack.c.l.b16 %v42_v56  ;;  %v171_v63 = vunpack.c.l.b16 %v43_v57 }
  0x1a   :  { %161 = vmatpush.bf16.msra.mxu0 %v331_v50 }
  0x1b   :  { %229 = vmatpush.bf16.msra.mxu1 %v323_v51  ;;  %v104_v0 = vsel %vm103_vm2, %v102_v59, %v101_v58  ;;  %v172_v1 = vsel %vm103_vm2, %v171_v63, %v170_v62 }
  0x1c   :  { %v105_v2 = vpack.c.b16 %v104_v0, %v104_v0  ;;  %v173_v3 = vpack.c.b16 %v172_v1, %v172_v1 }
  0x1e   :  { %162 = vmatpush.bf16.msra.mxu0 %v330_v60 }
  0x1f   :  { %230 = vmatpush.bf16.msra.mxu1 %v322_v61 }
  0x21   :  { %163 = vmatmul.bf16.vlgmr.msra.gmra.mxu0 %v105_v2 }
  0x22   :  { %231 = vmatmul.bf16.vlgmr.msra.gmra.mxu1 %v173_v3 }
  0x9e   :  { %v164_v5 = vpop.f32.mrf.mxu0 }
  0x9f   :  { %v232_v6 = vpop.f32.mrf.mxu1 }
  0xa0   :  { %v233_v7 = vadd.f32 %v232_v6, %v164_v5 }
  0xa2   :  { %v240_v8 = vadd.f32 %v339_v4, %v233_v7 }
  0xa4   :  { %241 = vst [vmem:[#allocation2] sm:$0x3] %v240_v8 }
  0xa5   :  { %252 = dma.vmem_to_hbm [thread:$0]  %s248_s8, 32, %s250_s10, [#allocation3]  }
  0xa6   :  { %v166_v9 = vpop.f32.mrf.mxu0 }
  0xa7   :  { %v234_v10 = vpop.f32.mrf.mxu1 }
  0xa8   :  { %364 = dma.done.wait [#allocation3], 32  }
  0xa9   :  { %365 = vsyncadd [#allocation3], 4294967264 }
  0xaa   :  { %257 = vsyncpa [#allocation3], 1 }

</bundles_post_ra>
